<compile_context>
chip_gen: v6e
topology: v6e:2x2x1
jax: 0.10.0
libtpu: 0.0.40
codegen_flags: <defaults>
</compile_context>

<pallas_src>
import functools
import math

import numpy as np
import jax
import jax.numpy as jnp
from jax.experimental import pallas as pl
from jax.experimental.pallas import tpu as pltpu


# ----------------------- in-kernel building blocks ---------------------------

def _conv1d_cn_relu(x_lc, w, b, g, beta, *, k, s, p, l_out, cn_eps):
    """Conv1d + ChannelNorm + ReLU on a channels-last (L_in, C_in) value.

    im2col is done *inside the kernel* with one-hot selection matmuls built
    from 2-D iotas (no strided slices, no HBM patch tensor).  Zero padding is
    folded into the selection (out-of-range taps select nothing).
    w: (k*C_in, D), tap-major rows.  Returns (l_out, D).
    """
    l_in, c_in = x_lc.shape
    d = w.shape[1]
    row = jax.lax.broadcasted_iota(jnp.int32, (l_out, l_in), 0)   # output pos j
    col = jax.lax.broadcasted_iota(jnp.int32, (l_out, l_in), 1)   # input pos m
    acc = jnp.zeros((l_out, d), jnp.float32)
    for t in range(k):
        sel = (col == row * s + (t - p)).astype(jnp.float32)      # (l_out, l_in)
        tap = jnp.dot(sel, x_lc, preferred_element_type=jnp.float32)
        acc = acc + jnp.dot(tap, w[t * c_in:(t + 1) * c_in, :],
                            preferred_element_type=jnp.float32)
    acc = acc + b
    # ChannelNorm over channels (lane dim); torch.var default is unbiased.
    mu = jnp.mean(acc, axis=-1, keepdims=True)
    dv = acc - mu
    var = jnp.sum(dv * dv, axis=-1, keepdims=True) * (1.0 / (d - 1))
    y = dv * jax.lax.rsqrt(var + cn_eps) * g + beta
    return jnp.maximum(y, 0.0)


def _layer_norm(t, g, b, eps):
    mu = jnp.mean(t, axis=-1, keepdims=True)
    d = t - mu
    var = jnp.mean(d * d, axis=-1, keepdims=True)
    return d * jax.lax.rsqrt(var + eps) * g + b


def _sum_all(a):
    """Full reduction kept at rank 2: (M, N) -> (1, 1)."""
    return jnp.sum(jnp.sum(a, axis=-1, keepdims=True), axis=0, keepdims=True)


# --------------- Kernel 1: fused encoder (convs + transformer + pool) --------

def _encoder_kernel(x_ref, *refs, conv_meta, n_heads, cn_eps, ln_eps):
    n_conv = len(conv_meta)
    conv_refs = refs[:4 * n_conv]
    (wqkv_r, bqkv_r, wo_r, bo_r, l1g_r, l1b_r,
     fw1_r, fb1_r, fw2_r, fb2_r, l2g_r, l2b_r) = refs[4 * n_conv:4 * n_conv + 12]
    o_ref = refs[4 * n_conv + 12]
    attn_scr = refs[4 * n_conv + 13]

    x = x_ref[...]                                        # (L, C_in) channels-last
    for li in range(n_conv):
        k, s, p, l_out = conv_meta[li]
        w_r, b_r, g_r, beta_r = conv_refs[4 * li:4 * li + 4]
        x = _conv1d_cn_relu(x, w_r[...], b_r[...], g_r[...], beta_r[...],
                            k=k, s=s, p=p, l_out=l_out, cn_eps=cn_eps)

    # --- single post-LN transformer block (BertModel substitute) ---
    seq, d = x.shape
    dh = d // n_heads
    scale = 1.0 / math.sqrt(dh)
    qkv = jnp.dot(x, wqkv_r[...], preferred_element_type=jnp.float32) + bqkv_r[...]
    for h in range(n_heads):                              # n_heads-way only (tiny)
        q = qkv[:, h * dh:(h + 1) * dh]
        kk = qkv[:, d + h * dh:d + (h + 1) * dh]
        v = qkv[:, 2 * d + h * dh:2 * d + (h + 1) * dh]
        sc = jnp.dot(q, kk.T, preferred_element_type=jnp.float32) * scale
        sc = sc - jnp.max(sc, axis=-1, keepdims=True)
        pr = jnp.exp(sc)
        pr = pr / jnp.sum(pr, axis=-1, keepdims=True)
        # per-head result written straight into VMEM scratch (no concats)
        attn_scr[:, h * dh:(h + 1) * dh] = jnp.dot(
            pr, v, preferred_element_type=jnp.float32)
    attn = attn_scr[...]
    o = jnp.dot(attn, wo_r[...], preferred_element_type=jnp.float32) + bo_r[...]
    x1 = _layer_norm(x + o, l1g_r[...], l1b_r[...], ln_eps)
    ff = jnp.maximum(
        jnp.dot(x1, fw1_r[...], preferred_element_type=jnp.float32) + fb1_r[...], 0.0)
    ff = jnp.dot(ff, fw2_r[...], preferred_element_type=jnp.float32) + fb2_r[...]
    x2 = _layer_norm(x1 + ff, l2g_r[...], l2b_r[...], ln_eps)

    # mean-pool over the sequence as a (1, S) matmul (rides the idle MXU)
    pool = jnp.dot(jnp.full((1, seq), 1.0 / seq, jnp.float32), x2,
                   preferred_element_type=jnp.float32)
    o_ref[...] = pool                                     # (1, d_model)


def encoder_pallas(x_nlc, params, cfg):
    """x_nlc: (N, L, C_in) channels-last. Returns seg_r (N, d_model).

    One pallas_call; grid parallel over the N independent segments.
    """
    N, L, c_in = x_nlc.shape
    d = cfg["d_model"]
    conv_meta = []
    l_in = L
    for k, s, p in zip(cfg["kernel_size_list"], cfg["stride_size_list"],
                       cfg["padding_size_list"]):
        l_out = (l_in + 2 * p - k) // s + 1
        conv_meta.append((k, s, p, l_out))
        l_in = l_out
    seq = l_in

    conv_args = []
    for i in range(len(conv_meta)):
        conv_args += [params["conv_w"][i],
                      params["conv_b"][i].reshape(1, -1),
                      params["cn_g"][i].reshape(1, -1),
                      params["cn_b"][i].reshape(1, -1)]
    t = params["enc_bert"]
    t_args = [t["wqkv"], t["bqkv"].reshape(1, -1), t["wo"], t["bo"].reshape(1, -1),
              t["ln1_g"].reshape(1, -1), t["ln1_b"].reshape(1, -1),
              t["w1"], t["b1"].reshape(1, -1), t["w2"], t["b2"].reshape(1, -1),
              t["ln2_g"].reshape(1, -1), t["ln2_b"].reshape(1, -1)]
    args = [x_nlc] + conv_args + t_args

    in_specs = [pl.BlockSpec((None, L, c_in), lambda i: (i, 0, 0))]
    in_specs += [pl.BlockSpec(a.shape, lambda i: (0, 0)) for a in conv_args + t_args]

    kern = functools.partial(_encoder_kernel, conv_meta=tuple(conv_meta),
                             n_heads=cfg["n_heads"], cn_eps=1e-5, ln_eps=1e-12)
    out = pl.pallas_call(
        kern,
        out_shape=jax.ShapeDtypeStruct((N, 1, d), jnp.float32),
        grid=(N,),
        in_specs=in_specs,
        out_specs=pl.BlockSpec((None, 1, d), lambda i: (i, 0, 0)),
        scratch_shapes=[pltpu.VMEM((seq, d), jnp.float32)],
        compiler_params=pltpu.CompilerParams(dimension_semantics=("parallel",)),
    )(*args)
    return out.reshape(N, d)


# ---------- Kernel 2: aggregator transformer + predictor (heads + losses) ----

_OUT_LANES = 128   # lane-dense packed output slab


def _agg_predict_kernel(x_ref, yraw_ref, yhard_ref, mask_ref, gi_ref, gj_ref,
                        git_ref,
                        wqkv_r, bqkv_r, wo_r, bo_r, l1g_r, l1b_r,
                        fw1_r, fb1_r, fw2_r, fb2_r, l2g_r, l2b_r,
                        cw1_r, cb1_r, cw2_r, cb2_r, cw3_r, cb3_r,
                        sw1_r, sb1_r, sw2_r, sb2_r, sw3_r, sb3_r,
                        out_ref, attn_scr, *, n_heads, n_pairs, ln_eps):
    x = x_ref[...]                                       # (B*n, D)
    m, d = x.shape
    dh = d // n_heads
    scale = 1.0 / math.sqrt(dh)

    # --- aggregator transformer block: attention over all rows with a
    #     block-diagonal batch mask (no per-batch unrolling, no reshapes) ---
    in_batch = mask_ref[...] > 0.5                       # (m, m) bool
    qkv = jnp.dot(x, wqkv_r[...], preferred_element_type=jnp.float32) + bqkv_r[...]
    for h in range(n_heads):
        q = qkv[:, h * dh:(h + 1) * dh]
        k = qkv[:, d + h * dh:d + (h + 1) * dh]
        v = qkv[:, 2 * d + h * dh:2 * d + (h + 1) * dh]
        sc = jnp.dot(q, k.T, preferred_element_type=jnp.float32) * scale
        sc = jnp.where(in_batch, sc, -1e30)
        sc = sc - jnp.max(sc, axis=-1, keepdims=True)
        pr = jnp.exp(sc)
        pr = pr / jnp.sum(pr, axis=-1, keepdims=True)
        attn_scr[:, h * dh:(h + 1) * dh] = jnp.dot(
            pr, v, preferred_element_type=jnp.float32)
    attn = attn_scr[...]
    o = jnp.dot(attn, wo_r[...], preferred_element_type=jnp.float32) + bo_r[...]
    x1 = _layer_norm(x + o, l1g_r[...], l1b_r[...], ln_eps)
    ff = jnp.maximum(
        jnp.dot(x1, fw1_r[...], preferred_element_type=jnp.float32) + fb1_r[...], 0.0)
    ff = jnp.dot(ff, fw2_r[...], preferred_element_type=jnp.float32) + fb2_r[...]
    agg = _layer_norm(x1 + ff, l2g_r[...], l2b_r[...], ln_eps)   # (B*n, D)

    # --- class classifier (dropout = identity in eval) + softmax/log-softmax ---
    h1 = jnp.maximum(
        jnp.dot(agg, cw1_r[...], preferred_element_type=jnp.float32) + cb1_r[...], 0.0)
    h2 = jnp.maximum(
        jnp.dot(h1, cw2_r[...], preferred_element_type=jnp.float32) + cb2_r[...], 0.0)
    logit_p = jnp.dot(h2, cw3_r[...], preferred_element_type=jnp.float32) + cb3_r[...]
    zp = logit_p - jnp.max(logit_p, axis=-1, keepdims=True)
    ep = jnp.exp(zp)
    sp = jnp.sum(ep, axis=-1, keepdims=True)
    hat_p = ep / sp                                      # (B*n, C)
    logp = zp - jnp.log(sp)

    # --- pairwise "same" classifier: pair (b,i,j) features built with one-hot
    #     selection matmuls; cat([a_i, a_j]) @ W1 == Gi@(a@W1[:D]) + Gj@(a@W1[D:])
    gi = gi_ref[...]                                     # (P, B*n)
    gj = gj_ref[...]
    sw1 = sw1_r[...]                                     # (2D, Di)
    u = jnp.dot(agg, sw1[:d, :], preferred_element_type=jnp.float32)
    w = jnp.dot(agg, sw1[d:, :], preferred_element_type=jnp.float32)
    hq = jnp.maximum(jnp.dot(gi, u, preferred_element_type=jnp.float32)
                     + jnp.dot(gj, w, preferred_element_type=jnp.float32)
                     + sb1_r[...], 0.0)                  # (P, Di)
    hq = jnp.maximum(
        jnp.dot(hq, sw2_r[...], preferred_element_type=jnp.float32) + sb2_r[...], 0.0)
    logit_q = jnp.dot(hq, sw3_r[...], preferred_element_type=jnp.float32) + sb3_r[...]
    zq = logit_q - jnp.max(logit_q, axis=-1, keepdims=True)
    eq = jnp.exp(zq)
    sq = jnp.sum(eq, axis=-1, keepdims=True)
    prq = eq / sq                                        # (P, 2)
    logq = zq - jnp.log(sq)

    # --- cross-entropy losses (mean reduction), computed in-kernel ---
    loss1 = -_sum_all(yhard_ref[...] * logp) * (1.0 / float(m))
    yi = jnp.dot(gi, yraw_ref[...], preferred_element_type=jnp.float32)
    yj = jnp.dot(gj, yraw_ref[...], preferred_element_type=jnp.float32)
    same = jnp.max(yi * yj, axis=-1, keepdims=True)      # (P, 1) in {0, 1}
    loss2 = -_sum_all(same * logq[:, 1:2] + (1.0 - same) * logq[:, 0:1]) \
        * (1.0 / float(n_pairs))
    loss = loss1 + loss2                                 # (1, 1)

    # --- tilde_p[b,i,:] = sum_j q1[b,i,j] * hat_p[b,j,:], then normalize ---
    q1 = prq[:, 1:2]                                     # (P, 1)
    tp = jnp.dot(git_ref[...],
                 q1 * jnp.dot(gj, hat_p, preferred_element_type=jnp.float32),
                 preferred_element_type=jnp.float32)     # (B*n, C)
    tp = tp / jnp.sum(tp, axis=-1, keepdims=True)

    # --- single lane-dense packed output: [hat_p | tilde_p | loss | zeros] ---
    c = hat_p.shape[-1]
    loss_col = jnp.zeros((m, 1), jnp.float32) + loss
    pad = jnp.zeros((m, _OUT_LANES - (2 * c + 1)), jnp.float32)
    out_ref[...] = jnp.concatenate([hat_p, tp, loss_col, pad], axis=-1)


def _pair_selectors(batch, n):
    """One-hot G_i, G_j, G_i^T selecting (b,i) / (b,j) rows for pair (b,i,j)."""
    pnum, q = batch * n * n, batch * n
    gi = np.zeros((pnum, q), np.float32)
    gj = np.zeros((pnum, q), np.float32)
    for b in range(batch):
        for i in range(n):
            for j in range(n):
                r = (b * n + i) * n + j
                gi[r, b * n + i] = 1.0
                gj[r, b * n + j] = 1.0
    return jnp.asarray(gi), jnp.asarray(gj), jnp.asarray(gi.T)


def _block_diag_mask(batch, n):
    msk = np.zeros((batch * n, batch * n), np.float32)
    for b in range(batch):
        msk[b * n:(b + 1) * n, b * n:(b + 1) * n] = 1.0
    return jnp.asarray(msk)


def agg_predict_pallas(seg_r, y, params, cfg):
    """seg_r: (B*n, D), y: (B, n, C). Returns (loss, hat_p, tilde_p, seg_y)."""
    B, n, C = y.shape
    m, d = seg_r.shape
    t = params["agg_bert"]
    pr = params["pred"]

    seg_y = jnp.argmax(y, axis=-1)                       # (B, n) int
    y_hard = jax.nn.one_hot(seg_y, C, dtype=jnp.float32).reshape(m, C)
    y_raw = y.astype(jnp.float32).reshape(m, C)
    gi, gj, git = _pair_selectors(B, n)
    mask = _block_diag_mask(B, n)

    args = [seg_r, y_raw, y_hard, mask, gi, gj, git,
            t["wqkv"], t["bqkv"].reshape(1, -1), t["wo"], t["bo"].reshape(1, -1),
            t["ln1_g"].reshape(1, -1), t["ln1_b"].reshape(1, -1),
            t["w1"], t["b1"].reshape(1, -1), t["w2"], t["b2"].reshape(1, -1),
            t["ln2_g"].reshape(1, -1), t["ln2_b"].reshape(1, -1),
            pr["c_w1"], pr["c_b1"].reshape(1, -1),
            pr["c_w2"], pr["c_b2"].reshape(1, -1),
            pr["c_w3"], pr["c_b3"].reshape(1, -1),
            pr["s_w1"], pr["s_b1"].reshape(1, -1),
            pr["s_w2"], pr["s_b2"].reshape(1, -1),
            pr["s_w3"], pr["s_b3"].reshape(1, -1)]

    kern = functools.partial(_agg_predict_kernel, n_heads=cfg["n_heads"],
                             n_pairs=B * n * n, ln_eps=1e-12)
    out = pl.pallas_call(
        kern,
        out_shape=jax.ShapeDtypeStruct((m, _OUT_LANES), jnp.float32),
        grid=(1,),
        in_specs=[pl.BlockSpec(a.shape, lambda i: (0, 0)) for a in args],
        out_specs=pl.BlockSpec((m, _OUT_LANES), lambda i: (0, 0)),
        scratch_shapes=[pltpu.VMEM((m, d), jnp.float32)],
        compiler_params=pltpu.CompilerParams(dimension_semantics=("arbitrary",)),
    )(*args)

    # detach in torch only affects grads; forward values are identical
    hat_p = out[:, :C].reshape(B, n, C)
    tilde_p = out[:, C:2 * C].reshape(B, n, C)
    loss = out[0, 2 * C]
    return loss, hat_p, tilde_p, seg_y


# --------------------------------- model glue ---------------------------------

def cl_model(x, y, params, cfg):
    B, n_seg = y.shape[0], y.shape[1]
    # (B, n, C_in, L) -> (B*n, L, C_in): single layout op, everything else fused
    x_nlc = jnp.transpose(x.reshape(B * n_seg, x.shape[-2], x.shape[-1]), (0, 2, 1))
    seg_r = encoder_pallas(x_nlc, params, cfg)           # (B*n, d_model)
    return agg_predict_pallas(seg_r, y, params, cfg)


# ---------------------------------- parameters --------------------------------

def _dense_init(key, shape, scale=0.05):
    return (scale * jax.random.normal(key, shape)).astype(jnp.float32)


def init_bert_params(key, d_model, d_inner):
    ks = jax.random.split(key, 6)
    z = lambda n: jnp.zeros((n,), jnp.float32)
    o = lambda n: jnp.ones((n,), jnp.float32)
    wq = _dense_init(ks[0], (d_model, d_model))
    wk = _dense_init(ks[1], (d_model, d_model))
    wv = _dense_init(ks[2], (d_model, d_model))
    return dict(
        wqkv=jnp.concatenate([wq, wk, wv], axis=1), bqkv=z(3 * d_model),
        wo=_dense_init(ks[3], (d_model, d_model)), bo=z(d_model),
        ln1_g=o(d_model), ln1_b=z(d_model),
        w1=_dense_init(ks[4], (d_model, d_inner)), b1=z(d_inner),
        w2=_dense_init(ks[5], (d_inner, d_model)), b2=z(d_model),
        ln2_g=o(d_model), ln2_b=z(d_model),
    )


def init_params(key, cfg):
    d, di, nc = cfg["d_model"], cfg["d_inner"], cfg["n_class"]
    keys = jax.random.split(key, 12)
    params = {}

    conv_w, conv_b, cn_g, cn_b = [], [], [], []
    in_ch = [cfg["n_features"]] + [d] * (len(cfg["kernel_size_list"]) - 1)
    for i, k in enumerate(cfg["kernel_size_list"]):
        conv_w.append(_dense_init(jax.random.fold_in(keys[0], i), (k * in_ch[i], d)))
        conv_b.append(jnp.zeros((d,), jnp.float32))
        cn_g.append(jnp.ones((d,), jnp.float32))
        cn_b.append(jnp.zeros((d,), jnp.float32))
    params["conv_w"], params["conv_b"] = conv_w, conv_b
    params["cn_g"], params["cn_b"] = cn_g, cn_b

    params["enc_bert"] = init_bert_params(keys[1], d, di)
    params["agg_bert"] = init_bert_params(keys[2], d, di)

    params["pred"] = dict(
        c_w1=_dense_init(keys[3], (d, di)), c_b1=jnp.zeros((di,), jnp.float32),
        c_w2=_dense_init(keys[4], (di, di // 2)), c_b2=jnp.zeros((di // 2,), jnp.float32),
        c_w3=_dense_init(keys[5], (di // 2, nc)), c_b3=jnp.zeros((nc,), jnp.float32),
        s_w1=_dense_init(keys[6], (2 * d, di)), s_b1=jnp.zeros((di,), jnp.float32),
        s_w2=_dense_init(keys[7], (di, di // 2)), s_b2=jnp.zeros((di // 2,), jnp.float32),
        s_w3=_dense_init(keys[8], (di // 2, 2)), s_b3=jnp.zeros((2,), jnp.float32),
    )
    return params


# ------------------------------------- main ------------------------------------

if __name__ == "__main__":
    cfg = dict(
        n_features=4, d_model=32, d_inner=32, n_class=3, n_heads=4,
        kernel_size_list=[4, 4], stride_size_list=[2, 2], padding_size_list=[1, 1],
        raw_input_len=16, down_sampling=4, dropout=0.1,
    )
    B, n_seg = 2, 4

    key = jax.random.PRNGKey(0)
    kx, ky, kp = jax.random.split(key, 3)
    x = jax.random.normal(kx, (B, n_seg, cfg["n_features"], cfg["raw_input_len"]),
                          dtype=jnp.float32)
    labels = jax.random.randint(ky, (B, n_seg), 0, cfg["n_class"])
    y = jax.nn.one_hot(labels, cfg["n_class"], dtype=jnp.float32)

    params = init_params(kp, cfg)

    model = jax.jit(functools.partial(cl_model, cfg=cfg))
    loss, hat_p, tilde_p, seg_y = model(x, y, params)
    jax.block_until_ready((loss, hat_p, tilde_p, seg_y))

    assert loss.shape == ()
    assert hat_p.shape == (B, n_seg, cfg["n_class"])
    assert tilde_p.shape == (B, n_seg, cfg["n_class"])
    assert seg_y.shape == (B, n_seg)
    assert bool(jnp.isfinite(loss))
    assert bool(jnp.all(jnp.isfinite(hat_p)))
    assert bool(jnp.all(jnp.isfinite(tilde_p)))
    # softmax rows sum to 1
    assert bool(jnp.allclose(jnp.sum(hat_p, -1), 1.0, atol=1e-4))
    assert bool(jnp.allclose(jnp.sum(tilde_p, -1), 1.0, atol=1e-4))
    print("KERNEL_OK")
</pallas_src>

<mosaic_0001>
module attributes {stable_mosaic.version = 11 : i64} {
  func.func @_encoder_kernel(%arg0: i32, %arg1: memref<1x16x4xf32, #tpu.memory_space<vmem>>, %arg2: memref<16x32xf32, #tpu.memory_space<vmem>>, %arg3: memref<1x32xf32, #tpu.memory_space<vmem>>, %arg4: memref<1x32xf32, #tpu.memory_space<vmem>>, %arg5: memref<1x32xf32, #tpu.memory_space<vmem>>, %arg6: memref<128x32xf32, #tpu.memory_space<vmem>>, %arg7: memref<1x32xf32, #tpu.memory_space<vmem>>, %arg8: memref<1x32xf32, #tpu.memory_space<vmem>>, %arg9: memref<1x32xf32, #tpu.memory_space<vmem>>, %arg10: memref<32x96xf32, #tpu.memory_space<vmem>>, %arg11: memref<1x96xf32, #tpu.memory_space<vmem>>, %arg12: memref<32x32xf32, #tpu.memory_space<vmem>>, %arg13: memref<1x32xf32, #tpu.memory_space<vmem>>, %arg14: memref<1x32xf32, #tpu.memory_space<vmem>>, %arg15: memref<1x32xf32, #tpu.memory_space<vmem>>, %arg16: memref<32x32xf32, #tpu.memory_space<vmem>>, %arg17: memref<1x32xf32, #tpu.memory_space<vmem>>, %arg18: memref<32x32xf32, #tpu.memory_space<vmem>>, %arg19: memref<1x32xf32, #tpu.memory_space<vmem>>, %arg20: memref<1x32xf32, #tpu.memory_space<vmem>>, %arg21: memref<1x32xf32, #tpu.memory_space<vmem>>, %arg22: memref<1x1x32xf32, #tpu.memory_space<vmem>>, %arg23: memref<4x32xf32, #tpu.memory_space<vmem>>) attributes {dimension_semantics = [#tpu.dimension_semantics<parallel>], iteration_bounds = array<i64: 8>, scalar_prefetch = 0 : i64, scratch_operands = 1 : i64, tpu.core_type = #tpu.core_type<tc>, window_params = [{transform_indices = @transform_0, window_bounds = array<i64: 1, 16, 4>}, {pipeline_mode = #tpu.pipeline_mode<synchronous>, transform_indices = @transform_1, window_bounds = array<i64: 16, 32>}, {pipeline_mode = #tpu.pipeline_mode<synchronous>, transform_indices = @transform_2, window_bounds = array<i64: 1, 32>}, {pipeline_mode = #tpu.pipeline_mode<synchronous>, transform_indices = @transform_3, window_bounds = array<i64: 1, 32>}, {pipeline_mode = #tpu.pipeline_mode<synchronous>, transform_indices = @transform_4, window_bounds = array<i64: 1, 32>}, {pipeline_mode = #tpu.pipeline_mode<synchronous>, transform_indices = @transform_5, window_bounds = array<i64: 128, 32>}, {pipeline_mode = #tpu.pipeline_mode<synchronous>, transform_indices = @transform_6, window_bounds = array<i64: 1, 32>}, {pipeline_mode = #tpu.pipeline_mode<synchronous>, transform_indices = @transform_7, window_bounds = array<i64: 1, 32>}, {pipeline_mode = #tpu.pipeline_mode<synchronous>, transform_indices = @transform_8, window_bounds = array<i64: 1, 32>}, {pipeline_mode = #tpu.pipeline_mode<synchronous>, transform_indices = @transform_9, window_bounds = array<i64: 32, 96>}, {pipeline_mode = #tpu.pipeline_mode<synchronous>, transform_indices = @transform_10, window_bounds = array<i64: 1, 96>}, {pipeline_mode = #tpu.pipeline_mode<synchronous>, transform_indices = @transform_11, window_bounds = array<i64: 32, 32>}, {pipeline_mode = #tpu.pipeline_mode<synchronous>, transform_indices = @transform_12, window_bounds = array<i64: 1, 32>}, {pipeline_mode = #tpu.pipeline_mode<synchronous>, transform_indices = @transform_13, window_bounds = array<i64: 1, 32>}, {pipeline_mode = #tpu.pipeline_mode<synchronous>, transform_indices = @transform_14, window_bounds = array<i64: 1, 32>}, {pipeline_mode = #tpu.pipeline_mode<synchronous>, transform_indices = @transform_15, window_bounds = array<i64: 32, 32>}, {pipeline_mode = #tpu.pipeline_mode<synchronous>, transform_indices = @transform_16, window_bounds = array<i64: 1, 32>}, {pipeline_mode = #tpu.pipeline_mode<synchronous>, transform_indices = @transform_17, window_bounds = array<i64: 32, 32>}, {pipeline_mode = #tpu.pipeline_mode<synchronous>, transform_indices = @transform_18, window_bounds = array<i64: 1, 32>}, {pipeline_mode = #tpu.pipeline_mode<synchronous>, transform_indices = @transform_19, window_bounds = array<i64: 1, 32>}, {pipeline_mode = #tpu.pipeline_mode<synchronous>, transform_indices = @transform_20, window_bounds = array<i64: 1, 32>}, {transform_indices = @transform_21, window_bounds = array<i64: 1, 1, 32>}]} {
    %c0 = arith.constant 0 : index
    %c0_0 = arith.constant 0 : index
    %c0_1 = arith.constant 0 : index
    %0 = vector.load %arg1[%c0, %c0_0, %c0_1] : memref<1x16x4xf32, #tpu.memory_space<vmem>>, vector<1x16x4xf32>
    %1 = vector.shape_cast %0 : vector<1x16x4xf32> to vector<16x4xf32>
    %c0_2 = arith.constant 0 : index
    %c0_3 = arith.constant 0 : index
    %2 = vector.load %arg2[%c0_2, %c0_3] : memref<16x32xf32, #tpu.memory_space<vmem>>, vector<16x32xf32>
    %c0_4 = arith.constant 0 : index
    %c0_5 = arith.constant 0 : index
    %3 = vector.load %arg3[%c0_4, %c0_5] : memref<1x32xf32, #tpu.memory_space<vmem>>, vector<1x32xf32>
    %c0_6 = arith.constant 0 : index
    %c0_7 = arith.constant 0 : index
    %4 = vector.load %arg4[%c0_6, %c0_7] : memref<1x32xf32, #tpu.memory_space<vmem>>, vector<1x32xf32>
    %c0_8 = arith.constant 0 : index
    %c0_9 = arith.constant 0 : index
    %5 = vector.load %arg5[%c0_8, %c0_9] : memref<1x32xf32, #tpu.memory_space<vmem>>, vector<1x32xf32>
    %6 = tpu.iota {dimensions = array<i32: 0>} : vector<8x16xi32>
    %7 = tpu.iota {dimensions = array<i32: 1>} : vector<8x16xi32>
    %cst = arith.constant 0.000000e+00 : f32
    %8 = vector.broadcast %cst : f32 to vector<8x32xf32>
    %c2_i32 = arith.constant 2 : i32
    %9 = vector.broadcast %c2_i32 : i32 to vector<8x16xi32>
    %10 = arith.muli %6, %9 : vector<8x16xi32>
    %c-1_i32 = arith.constant -1 : i32
    %11 = vector.broadcast %c-1_i32 : i32 to vector<8x16xi32>
    %12 = arith.addi %10, %11 : vector<8x16xi32>
    %13 = arith.cmpi eq, %7, %12 : vector<8x16xi32>
    %14 = arith.extui %13 : vector<8x16xi1> to vector<8x16xi32>
    %15 = arith.sitofp %14 : vector<8x16xi32> to vector<8x16xf32>
    %cst_10 = arith.constant dense<0.000000e+00> : vector<8x4xf32>
    %16 = tpu.matmul %15, %1, %cst_10 {dimension_numbers = #tpu.dot_dimension_numbers<[1], [0], [0], [1], [0, 0, 1, 1], [], []>} : vector<8x16xf32>, vector<16x4xf32>, vector<8x4xf32> -> vector<8x4xf32>
    %17 = vector.extract_strided_slice %2 {offsets = [0, 0], sizes = [4, 32], strides = [1, 1]} : vector<16x32xf32> to vector<4x32xf32>
    %cst_11 = arith.constant dense<0.000000e+00> : vector<8x32xf32>
    %18 = tpu.matmul %16, %17, %cst_11 {dimension_numbers = #tpu.dot_dimension_numbers<[1], [0], [0], [1], [0, 0, 1, 1], [], []>} : vector<8x4xf32>, vector<4x32xf32>, vector<8x32xf32> -> vector<8x32xf32>
    %19 = arith.addf %8, %18 : vector<8x32xf32>
    %c2_i32_12 = arith.constant 2 : i32
    %20 = vector.broadcast %c2_i32_12 : i32 to vector<8x16xi32>
    %21 = arith.muli %6, %20 : vector<8x16xi32>
    %c0_i32 = arith.constant 0 : i32
    %22 = vector.broadcast %c0_i32 : i32 to vector<8x16xi32>
    %23 = arith.addi %21, %22 : vector<8x16xi32>
    %24 = arith.cmpi eq, %7, %23 : vector<8x16xi32>
    %25 = arith.extui %24 : vector<8x16xi1> to vector<8x16xi32>
    %26 = arith.sitofp %25 : vector<8x16xi32> to vector<8x16xf32>
    %cst_13 = arith.constant dense<0.000000e+00> : vector<8x4xf32>
    %27 = tpu.matmul %26, %1, %cst_13 {dimension_numbers = #tpu.dot_dimension_numbers<[1], [0], [0], [1], [0, 0, 1, 1], [], []>} : vector<8x16xf32>, vector<16x4xf32>, vector<8x4xf32> -> vector<8x4xf32>
    %28 = vector.extract_strided_slice %2 {offsets = [4, 0], sizes = [4, 32], strides = [1, 1]} : vector<16x32xf32> to vector<4x32xf32>
    %cst_14 = arith.constant dense<0.000000e+00> : vector<8x32xf32>
    %29 = tpu.matmul %27, %28, %cst_14 {dimension_numbers = #tpu.dot_dimension_numbers<[1], [0], [0], [1], [0, 0, 1, 1], [], []>} : vector<8x4xf32>, vector<4x32xf32>, vector<8x32xf32> -> vector<8x32xf32>
    %30 = arith.addf %19, %29 : vector<8x32xf32>
    %c2_i32_15 = arith.constant 2 : i32
    %31 = vector.broadcast %c2_i32_15 : i32 to vector<8x16xi32>
    %32 = arith.muli %6, %31 : vector<8x16xi32>
    %c1_i32 = arith.constant 1 : i32
    %33 = vector.broadcast %c1_i32 : i32 to vector<8x16xi32>
    %34 = arith.addi %32, %33 : vector<8x16xi32>
    %35 = arith.cmpi eq, %7, %34 : vector<8x16xi32>
    %36 = arith.extui %35 : vector<8x16xi1> to vector<8x16xi32>
    %37 = arith.sitofp %36 : vector<8x16xi32> to vector<8x16xf32>
    %cst_16 = arith.constant dense<0.000000e+00> : vector<8x4xf32>
    %38 = tpu.matmul %37, %1, %cst_16 {dimension_numbers = #tpu.dot_dimension_numbers<[1], [0], [0], [1], [0, 0, 1, 1], [], []>} : vector<8x16xf32>, vector<16x4xf32>, vector<8x4xf32> -> vector<8x4xf32>
    %39 = vector.extract_strided_slice %2 {offsets = [8, 0], sizes = [4, 32], strides = [1, 1]} : vector<16x32xf32> to vector<4x32xf32>
    %cst_17 = arith.constant dense<0.000000e+00> : vector<8x32xf32>
    %40 = tpu.matmul %38, %39, %cst_17 {dimension_numbers = #tpu.dot_dimension_numbers<[1], [0], [0], [1], [0, 0, 1, 1], [], []>} : vector<8x4xf32>, vector<4x32xf32>, vector<8x32xf32> -> vector<8x32xf32>
    %41 = arith.addf %30, %40 : vector<8x32xf32>
    %c2_i32_18 = arith.constant 2 : i32
    %42 = vector.broadcast %c2_i32_18 : i32 to vector<8x16xi32>
    %43 = arith.muli %6, %42 : vector<8x16xi32>
    %c2_i32_19 = arith.constant 2 : i32
    %44 = vector.broadcast %c2_i32_19 : i32 to vector<8x16xi32>
    %45 = arith.addi %43, %44 : vector<8x16xi32>
    %46 = arith.cmpi eq, %7, %45 : vector<8x16xi32>
    %47 = arith.extui %46 : vector<8x16xi1> to vector<8x16xi32>
    %48 = arith.sitofp %47 : vector<8x16xi32> to vector<8x16xf32>
    %cst_20 = arith.constant dense<0.000000e+00> : vector<8x4xf32>
    %49 = tpu.matmul %48, %1, %cst_20 {dimension_numbers = #tpu.dot_dimension_numbers<[1], [0], [0], [1], [0, 0, 1, 1], [], []>} : vector<8x16xf32>, vector<16x4xf32>, vector<8x4xf32> -> vector<8x4xf32>
    %50 = vector.extract_strided_slice %2 {offsets = [12, 0], sizes = [4, 32], strides = [1, 1]} : vector<16x32xf32> to vector<4x32xf32>
    %cst_21 = arith.constant dense<0.000000e+00> : vector<8x32xf32>
    %51 = tpu.matmul %49, %50, %cst_21 {dimension_numbers = #tpu.dot_dimension_numbers<[1], [0], [0], [1], [0, 0, 1, 1], [], []>} : vector<8x4xf32>, vector<4x32xf32>, vector<8x32xf32> -> vector<8x32xf32>
    %52 = arith.addf %41, %51 : vector<8x32xf32>
    %53 = vector.broadcast %3 : vector<1x32xf32> to vector<8x32xf32>
    %54 = arith.addf %52, %53 : vector<8x32xf32>
    %cst_22 = arith.constant dense<0.000000e+00> : vector<8xf32>
    %55 = vector.multi_reduction <add>, %54, %cst_22 [1] : vector<8x32xf32> to vector<8xf32>
    %56 = vector.shape_cast %55 : vector<8xf32> to vector<8x1xf32>
    %cst_23 = arith.constant 3.200000e+01 : f32
    %57 = vector.broadcast %cst_23 : f32 to vector<8x1xf32>
    %58 = arith.divf %56, %57 : vector<8x1xf32>
    %59 = vector.broadcast %58 : vector<8x1xf32> to vector<8x32xf32>
    %60 = arith.subf %54, %59 : vector<8x32xf32>
    %61 = arith.mulf %60, %60 : vector<8x32xf32>
    %cst_24 = arith.constant dense<0.000000e+00> : vector<8xf32>
    %62 = vector.multi_reduction <add>, %61, %cst_24 [1] : vector<8x32xf32> to vector<8xf32>
    %63 = vector.shape_cast %62 : vector<8xf32> to vector<8x1xf32>
    %cst_25 = arith.constant 0.0322580636 : f32
    %64 = vector.broadcast %cst_25 : f32 to vector<8x1xf32>
    %65 = arith.mulf %63, %64 : vector<8x1xf32>
    %cst_26 = arith.constant 9.99999974E-6 : f32
    %66 = vector.broadcast %cst_26 : f32 to vector<8x1xf32>
    %67 = arith.addf %65, %66 : vector<8x1xf32>
    %68 = math.rsqrt %67 : vector<8x1xf32>
    %69 = vector.broadcast %68 : vector<8x1xf32> to vector<8x32xf32>
    %70 = arith.mulf %60, %69 : vector<8x32xf32>
    %71 = vector.broadcast %4 : vector<1x32xf32> to vector<8x32xf32>
    %72 = arith.mulf %70, %71 : vector<8x32xf32>
    %73 = vector.broadcast %5 : vector<1x32xf32> to vector<8x32xf32>
    %74 = arith.addf %72, %73 : vector<8x32xf32>
    %cst_27 = arith.constant 0.000000e+00 : f32
    %75 = vector.broadcast %cst_27 : f32 to vector<8x32xf32>
    %76 = arith.maximumf %74, %75 : vector<8x32xf32>
    %c0_28 = arith.constant 0 : index
    %c0_29 = arith.constant 0 : index
    %77 = vector.load %arg6[%c0_28, %c0_29] : memref<128x32xf32, #tpu.memory_space<vmem>>, vector<128x32xf32>
    %c0_30 = arith.constant 0 : index
    %c0_31 = arith.constant 0 : index
    %78 = vector.load %arg7[%c0_30, %c0_31] : memref<1x32xf32, #tpu.memory_space<vmem>>, vector<1x32xf32>
    %c0_32 = arith.constant 0 : index
    %c0_33 = arith.constant 0 : index
    %79 = vector.load %arg8[%c0_32, %c0_33] : memref<1x32xf32, #tpu.memory_space<vmem>>, vector<1x32xf32>
    %c0_34 = arith.constant 0 : index
    %c0_35 = arith.constant 0 : index
    %80 = vector.load %arg9[%c0_34, %c0_35] : memref<1x32xf32, #tpu.memory_space<vmem>>, vector<1x32xf32>
    %81 = tpu.iota {dimensions = array<i32: 0>} : vector<4x8xi32>
    %82 = tpu.iota {dimensions = array<i32: 1>} : vector<4x8xi32>
    %cst_36 = arith.constant 0.000000e+00 : f32
    %83 = vector.broadcast %cst_36 : f32 to vector<4x32xf32>
    %c2_i32_37 = arith.constant 2 : i32
    %84 = vector.broadcast %c2_i32_37 : i32 to vector<4x8xi32>
    %85 = arith.muli %81, %84 : vector<4x8xi32>
    %c-1_i32_38 = arith.constant -1 : i32
    %86 = vector.broadcast %c-1_i32_38 : i32 to vector<4x8xi32>
    %87 = arith.addi %85, %86 : vector<4x8xi32>
    %88 = arith.cmpi eq, %82, %87 : vector<4x8xi32>
    %89 = arith.extui %88 : vector<4x8xi1> to vector<4x8xi32>
    %90 = arith.sitofp %89 : vector<4x8xi32> to vector<4x8xf32>
    %cst_39 = arith.constant dense<0.000000e+00> : vector<4x32xf32>
    %91 = tpu.matmul %90, %76, %cst_39 {dimension_numbers = #tpu.dot_dimension_numbers<[1], [0], [0], [1], [0, 0, 1, 1], [], []>} : vector<4x8xf32>, vector<8x32xf32>, vector<4x32xf32> -> vector<4x32xf32>
    %92 = vector.extract_strided_slice %77 {offsets = [0, 0], sizes = [32, 32], strides = [1, 1]} : vector<128x32xf32> to vector<32x32xf32>
    %cst_40 = arith.constant dense<0.000000e+00> : vector<4x32xf32>
    %93 = tpu.matmul %91, %92, %cst_40 {dimension_numbers = #tpu.dot_dimension_numbers<[1], [0], [0], [1], [0, 0, 1, 1], [], []>} : vector<4x32xf32>, vector<32x32xf32>, vector<4x32xf32> -> vector<4x32xf32>
    %94 = arith.addf %83, %93 : vector<4x32xf32>
    %c2_i32_41 = arith.constant 2 : i32
    %95 = vector.broadcast %c2_i32_41 : i32 to vector<4x8xi32>
    %96 = arith.muli %81, %95 : vector<4x8xi32>
    %c0_i32_42 = arith.constant 0 : i32
    %97 = vector.broadcast %c0_i32_42 : i32 to vector<4x8xi32>
    %98 = arith.addi %96, %97 : vector<4x8xi32>
    %99 = arith.cmpi eq, %82, %98 : vector<4x8xi32>
    %100 = arith.extui %99 : vector<4x8xi1> to vector<4x8xi32>
    %101 = arith.sitofp %100 : vector<4x8xi32> to vector<4x8xf32>
    %cst_43 = arith.constant dense<0.000000e+00> : vector<4x32xf32>
    %102 = tpu.matmul %101, %76, %cst_43 {dimension_numbers = #tpu.dot_dimension_numbers<[1], [0], [0], [1], [0, 0, 1, 1], [], []>} : vector<4x8xf32>, vector<8x32xf32>, vector<4x32xf32> -> vector<4x32xf32>
    %103 = vector.extract_strided_slice %77 {offsets = [32, 0], sizes = [32, 32], strides = [1, 1]} : vector<128x32xf32> to vector<32x32xf32>
    %cst_44 = arith.constant dense<0.000000e+00> : vector<4x32xf32>
    %104 = tpu.matmul %102, %103, %cst_44 {dimension_numbers = #tpu.dot_dimension_numbers<[1], [0], [0], [1], [0, 0, 1, 1], [], []>} : vector<4x32xf32>, vector<32x32xf32>, vector<4x32xf32> -> vector<4x32xf32>
    %105 = arith.addf %94, %104 : vector<4x32xf32>
    %c2_i32_45 = arith.constant 2 : i32
    %106 = vector.broadcast %c2_i32_45 : i32 to vector<4x8xi32>
    %107 = arith.muli %81, %106 : vector<4x8xi32>
    %c1_i32_46 = arith.constant 1 : i32
    %108 = vector.broadcast %c1_i32_46 : i32 to vector<4x8xi32>
    %109 = arith.addi %107, %108 : vector<4x8xi32>
    %110 = arith.cmpi eq, %82, %109 : vector<4x8xi32>
    %111 = arith.extui %110 : vector<4x8xi1> to vector<4x8xi32>
    %112 = arith.sitofp %111 : vector<4x8xi32> to vector<4x8xf32>
    %cst_47 = arith.constant dense<0.000000e+00> : vector<4x32xf32>
    %113 = tpu.matmul %112, %76, %cst_47 {dimension_numbers = #tpu.dot_dimension_numbers<[1], [0], [0], [1], [0, 0, 1, 1], [], []>} : vector<4x8xf32>, vector<8x32xf32>, vector<4x32xf32> -> vector<4x32xf32>
    %114 = vector.extract_strided_slice %77 {offsets = [64, 0], sizes = [32, 32], strides = [1, 1]} : vector<128x32xf32> to vector<32x32xf32>
    %cst_48 = arith.constant dense<0.000000e+00> : vector<4x32xf32>
    %115 = tpu.matmul %113, %114, %cst_48 {dimension_numbers = #tpu.dot_dimension_numbers<[1], [0], [0], [1], [0, 0, 1, 1], [], []>} : vector<4x32xf32>, vector<32x32xf32>, vector<4x32xf32> -> vector<4x32xf32>
    %116 = arith.addf %105, %115 : vector<4x32xf32>
    %c2_i32_49 = arith.constant 2 : i32
    %117 = vector.broadcast %c2_i32_49 : i32 to vector<4x8xi32>
    %118 = arith.muli %81, %117 : vector<4x8xi32>
    %c2_i32_50 = arith.constant 2 : i32
    %119 = vector.broadcast %c2_i32_50 : i32 to vector<4x8xi32>
    %120 = arith.addi %118, %119 : vector<4x8xi32>
    %121 = arith.cmpi eq, %82, %120 : vector<4x8xi32>
    %122 = arith.extui %121 : vector<4x8xi1> to vector<4x8xi32>
    %123 = arith.sitofp %122 : vector<4x8xi32> to vector<4x8xf32>
    %cst_51 = arith.constant dense<0.000000e+00> : vector<4x32xf32>
    %124 = tpu.matmul %123, %76, %cst_51 {dimension_numbers = #tpu.dot_dimension_numbers<[1], [0], [0], [1], [0, 0, 1, 1], [], []>} : vector<4x8xf32>, vector<8x32xf32>, vector<4x32xf32> -> vector<4x32xf32>
    %125 = vector.extract_strided_slice %77 {offsets = [96, 0], sizes = [32, 32], strides = [1, 1]} : vector<128x32xf32> to vector<32x32xf32>
    %cst_52 = arith.constant dense<0.000000e+00> : vector<4x32xf32>
    %126 = tpu.matmul %124, %125, %cst_52 {dimension_numbers = #tpu.dot_dimension_numbers<[1], [0], [0], [1], [0, 0, 1, 1], [], []>} : vector<4x32xf32>, vector<32x32xf32>, vector<4x32xf32> -> vector<4x32xf32>
    %127 = arith.addf %116, %126 : vector<4x32xf32>
    %128 = vector.broadcast %78 : vector<1x32xf32> to vector<4x32xf32>
    %129 = arith.addf %127, %128 : vector<4x32xf32>
    %cst_53 = arith.constant dense<0.000000e+00> : vector<4xf32>
    %130 = vector.multi_reduction <add>, %129, %cst_53 [1] : vector<4x32xf32> to vector<4xf32>
    %131 = vector.shape_cast %130 : vector<4xf32> to vector<4x1xf32>
    %cst_54 = arith.constant 3.200000e+01 : f32
    %132 = vector.broadcast %cst_54 : f32 to vector<4x1xf32>
    %133 = arith.divf %131, %132 : vector<4x1xf32>
    %134 = vector.broadcast %133 : vector<4x1xf32> to vector<4x32xf32>
    %135 = arith.subf %129, %134 : vector<4x32xf32>
    %136 = arith.mulf %135, %135 : vector<4x32xf32>
    %cst_55 = arith.constant dense<0.000000e+00> : vector<4xf32>
    %137 = vector.multi_reduction <add>, %136, %cst_55 [1] : vector<4x32xf32> to vector<4xf32>
    %138 = vector.shape_cast %137 : vector<4xf32> to vector<4x1xf32>
    %cst_56 = arith.constant 0.0322580636 : f32
    %139 = vector.broadcast %cst_56 : f32 to vector<4x1xf32>
    %140 = arith.mulf %138, %139 : vector<4x1xf32>
    %cst_57 = arith.constant 9.99999974E-6 : f32
    %141 = vector.broadcast %cst_57 : f32 to vector<4x1xf32>
    %142 = arith.addf %140, %141 : vector<4x1xf32>
    %143 = math.rsqrt %142 : vector<4x1xf32>
    %144 = vector.broadcast %143 : vector<4x1xf32> to vector<4x32xf32>
    %145 = arith.mulf %135, %144 : vector<4x32xf32>
    %146 = vector.broadcast %79 : vector<1x32xf32> to vector<4x32xf32>
    %147 = arith.mulf %145, %146 : vector<4x32xf32>
    %148 = vector.broadcast %80 : vector<1x32xf32> to vector<4x32xf32>
    %149 = arith.addf %147, %148 : vector<4x32xf32>
    %cst_58 = arith.constant 0.000000e+00 : f32
    %150 = vector.broadcast %cst_58 : f32 to vector<4x32xf32>
    %151 = arith.maximumf %149, %150 : vector<4x32xf32>
    %c0_59 = arith.constant 0 : index
    %c0_60 = arith.constant 0 : index
    %152 = vector.load %arg10[%c0_59, %c0_60] : memref<32x96xf32, #tpu.memory_space<vmem>>, vector<32x96xf32>
    %cst_61 = arith.constant dense<0.000000e+00> : vector<4x96xf32>
    %153 = tpu.matmul %151, %152, %cst_61 {dimension_numbers = #tpu.dot_dimension_numbers<[1], [0], [0], [1], [0, 0, 1, 1], [], []>} : vector<4x32xf32>, vector<32x96xf32>, vector<4x96xf32> -> vector<4x96xf32>
    %c0_62 = arith.constant 0 : index
    %c0_63 = arith.constant 0 : index
    %154 = vector.load %arg11[%c0_62, %c0_63] : memref<1x96xf32, #tpu.memory_space<vmem>>, vector<1x96xf32>
    %155 = vector.broadcast %154 : vector<1x96xf32> to vector<4x96xf32>
    %156 = arith.addf %153, %155 : vector<4x96xf32>
    %157 = vector.extract_strided_slice %156 {offsets = [0, 0], sizes = [4, 8], strides = [1, 1]} : vector<4x96xf32> to vector<4x8xf32>
    %158 = vector.extract_strided_slice %156 {offsets = [0, 32], sizes = [4, 8], strides = [1, 1]} : vector<4x96xf32> to vector<4x8xf32>
    %159 = vector.extract_strided_slice %156 {offsets = [0, 64], sizes = [4, 8], strides = [1, 1]} : vector<4x96xf32> to vector<4x8xf32>
    %160 = tpu.transpose %158, [1, 0] : vector<4x8xf32> -> vector<8x4xf32>
    %cst_64 = arith.constant dense<0.000000e+00> : vector<4x4xf32>
    %161 = tpu.matmul %157, %160, %cst_64 {dimension_numbers = #tpu.dot_dimension_numbers<[1], [0], [0], [1], [0, 0, 1, 1], [], []>} : vector<4x8xf32>, vector<8x4xf32>, vector<4x4xf32> -> vector<4x4xf32>
    %cst_65 = arith.constant 0.353553385 : f32
    %162 = vector.broadcast %cst_65 : f32 to vector<4x4xf32>
    %163 = arith.mulf %161, %162 : vector<4x4xf32>
    %cst_66 = arith.constant dense<0xFF800000> : vector<4xf32>
    %164 = vector.multi_reduction <maximumf>, %163, %cst_66 [1] : vector<4x4xf32> to vector<4xf32>
    %165 = vector.shape_cast %164 : vector<4xf32> to vector<4x1xf32>
    %166 = vector.broadcast %165 : vector<4x1xf32> to vector<4x4xf32>
    %167 = arith.subf %163, %166 : vector<4x4xf32>
    %168 = math.exp %167 : vector<4x4xf32>
    %cst_67 = arith.constant dense<0.000000e+00> : vector<4xf32>
    %169 = vector.multi_reduction <add>, %168, %cst_67 [1] : vector<4x4xf32> to vector<4xf32>
    %170 = vector.shape_cast %169 : vector<4xf32> to vector<4x1xf32>
    %171 = vector.broadcast %170 : vector<4x1xf32> to vector<4x4xf32>
    %172 = arith.divf %168, %171 : vector<4x4xf32>
    %cst_68 = arith.constant dense<0.000000e+00> : vector<4x8xf32>
    %173 = tpu.matmul %172, %159, %cst_68 {dimension_numbers = #tpu.dot_dimension_numbers<[1], [0], [0], [1], [0, 0, 1, 1], [], []>} : vector<4x4xf32>, vector<4x8xf32>, vector<4x8xf32> -> vector<4x8xf32>
    %c0_69 = arith.constant 0 : index
    %c0_70 = arith.constant 0 : index
    %174 = vector.load %arg23[%c0_69, %c0_70] : memref<4x32xf32, #tpu.memory_space<vmem>>, vector<4x8xf32>
    tpu.vector_store %arg23[%c0_69, %c0_70], %173 {strides = array<i32>} : memref<4x32xf32, #tpu.memory_space<vmem>>, vector<4x8xf32>,
    %175 = vector.extract_strided_slice %156 {offsets = [0, 8], sizes = [4, 8], strides = [1, 1]} : vector<4x96xf32> to vector<4x8xf32>
    %176 = vector.extract_strided_slice %156 {offsets = [0, 40], sizes = [4, 8], strides = [1, 1]} : vector<4x96xf32> to vector<4x8xf32>
    %177 = vector.extract_strided_slice %156 {offsets = [0, 72], sizes = [4, 8], strides = [1, 1]} : vector<4x96xf32> to vector<4x8xf32>
    %178 = tpu.transpose %176, [1, 0] : vector<4x8xf32> -> vector<8x4xf32>
    %cst_71 = arith.constant dense<0.000000e+00> : vector<4x4xf32>
    %179 = tpu.matmul %175, %178, %cst_71 {dimension_numbers = #tpu.dot_dimension_numbers<[1], [0], [0], [1], [0, 0, 1, 1], [], []>} : vector<4x8xf32>, vector<8x4xf32>, vector<4x4xf32> -> vector<4x4xf32>
    %cst_72 = arith.constant 0.353553385 : f32
    %180 = vector.broadcast %cst_72 : f32 to vector<4x4xf32>
    %181 = arith.mulf %179, %180 : vector<4x4xf32>
    %cst_73 = arith.constant dense<0xFF800000> : vector<4xf32>
    %182 = vector.multi_reduction <maximumf>, %181, %cst_73 [1] : vector<4x4xf32> to vector<4xf32>
    %183 = vector.shape_cast %182 : vector<4xf32> to vector<4x1xf32>
    %184 = vector.broadcast %183 : vector<4x1xf32> to vector<4x4xf32>
    %185 = arith.subf %181, %184 : vector<4x4xf32>
    %186 = math.exp %185 : vector<4x4xf32>
    %cst_74 = arith.constant dense<0.000000e+00> : vector<4xf32>
    %187 = vector.multi_reduction <add>, %186, %cst_74 [1] : vector<4x4xf32> to vector<4xf32>
    %188 = vector.shape_cast %187 : vector<4xf32> to vector<4x1xf32>
    %189 = vector.broadcast %188 : vector<4x1xf32> to vector<4x4xf32>
    %190 = arith.divf %186, %189 : vector<4x4xf32>
    %cst_75 = arith.constant dense<0.000000e+00> : vector<4x8xf32>
    %191 = tpu.matmul %190, %177, %cst_75 {dimension_numbers = #tpu.dot_dimension_numbers<[1], [0], [0], [1], [0, 0, 1, 1], [], []>} : vector<4x4xf32>, vector<4x8xf32>, vector<4x8xf32> -> vector<4x8xf32>
    %c0_76 = arith.constant 0 : index
    %c8 = arith.constant 8 : index
    %192 = vector.load %arg23[%c0_76, %c8] : memref<4x32xf32, #tpu.memory_space<vmem>>, vector<4x8xf32>
    tpu.vector_store %arg23[%c0_76, %c8], %191 {strides = array<i32>} : memref<4x32xf32, #tpu.memory_space<vmem>>, vector<4x8xf32>,
    %193 = vector.extract_strided_slice %156 {offsets = [0, 16], sizes = [4, 8], strides = [1, 1]} : vector<4x96xf32> to vector<4x8xf32>
    %194 = vector.extract_strided_slice %156 {offsets = [0, 48], sizes = [4, 8], strides = [1, 1]} : vector<4x96xf32> to vector<4x8xf32>
    %195 = vector.extract_strided_slice %156 {offsets = [0, 80], sizes = [4, 8], strides = [1, 1]} : vector<4x96xf32> to vector<4x8xf32>
    %196 = tpu.transpose %194, [1, 0] : vector<4x8xf32> -> vector<8x4xf32>
    %cst_77 = arith.constant dense<0.000000e+00> : vector<4x4xf32>
    %197 = tpu.matmul %193, %196, %cst_77 {dimension_numbers = #tpu.dot_dimension_numbers<[1], [0], [0], [1], [0, 0, 1, 1], [], []>} : vector<4x8xf32>, vector<8x4xf32>, vector<4x4xf32> -> vector<4x4xf32>
    %cst_78 = arith.constant 0.353553385 : f32
    %198 = vector.broadcast %cst_78 : f32 to vector<4x4xf32>
    %199 = arith.mulf %197, %198 : vector<4x4xf32>
    %cst_79 = arith.constant dense<0xFF800000> : vector<4xf32>
    %200 = vector.multi_reduction <maximumf>, %199, %cst_79 [1] : vector<4x4xf32> to vector<4xf32>
    %201 = vector.shape_cast %200 : vector<4xf32> to vector<4x1xf32>
    %202 = vector.broadcast %201 : vector<4x1xf32> to vector<4x4xf32>
    %203 = arith.subf %199, %202 : vector<4x4xf32>
    %204 = math.exp %203 : vector<4x4xf32>
    %cst_80 = arith.constant dense<0.000000e+00> : vector<4xf32>
    %205 = vector.multi_reduction <add>, %204, %cst_80 [1] : vector<4x4xf32> to vector<4xf32>
    %206 = vector.shape_cast %205 : vector<4xf32> to vector<4x1xf32>
    %207 = vector.broadcast %206 : vector<4x1xf32> to vector<4x4xf32>
    %208 = arith.divf %204, %207 : vector<4x4xf32>
    %cst_81 = arith.constant dense<0.000000e+00> : vector<4x8xf32>
    %209 = tpu.matmul %208, %195, %cst_81 {dimension_numbers = #tpu.dot_dimension_numbers<[1], [0], [0], [1], [0, 0, 1, 1], [], []>} : vector<4x4xf32>, vector<4x8xf32>, vector<4x8xf32> -> vector<4x8xf32>
    %c0_82 = arith.constant 0 : index
    %c16 = arith.constant 16 : index
    %210 = vector.load %arg23[%c0_82, %c16] : memref<4x32xf32, #tpu.memory_space<vmem>>, vector<4x8xf32>
    tpu.vector_store %arg23[%c0_82, %c16], %209 {strides = array<i32>} : memref<4x32xf32, #tpu.memory_space<vmem>>, vector<4x8xf32>,
    %211 = vector.extract_strided_slice %156 {offsets = [0, 24], sizes = [4, 8], strides = [1, 1]} : vector<4x96xf32> to vector<4x8xf32>
    %212 = vector.extract_strided_slice %156 {offsets = [0, 56], sizes = [4, 8], strides = [1, 1]} : vector<4x96xf32> to vector<4x8xf32>
    %213 = vector.extract_strided_slice %156 {offsets = [0, 88], sizes = [4, 8], strides = [1, 1]} : vector<4x96xf32> to vector<4x8xf32>
    %214 = tpu.transpose %212, [1, 0] : vector<4x8xf32> -> vector<8x4xf32>
    %cst_83 = arith.constant dense<0.000000e+00> : vector<4x4xf32>
    %215 = tpu.matmul %211, %214, %cst_83 {dimension_numbers = #tpu.dot_dimension_numbers<[1], [0], [0], [1], [0, 0, 1, 1], [], []>} : vector<4x8xf32>, vector<8x4xf32>, vector<4x4xf32> -> vector<4x4xf32>
    %cst_84 = arith.constant 0.353553385 : f32
    %216 = vector.broadcast %cst_84 : f32 to vector<4x4xf32>
    %217 = arith.mulf %215, %216 : vector<4x4xf32>
    %cst_85 = arith.constant dense<0xFF800000> : vector<4xf32>
    %218 = vector.multi_reduction <maximumf>, %217, %cst_85 [1] : vector<4x4xf32> to vector<4xf32>
    %219 = vector.shape_cast %218 : vector<4xf32> to vector<4x1xf32>
    %220 = vector.broadcast %219 : vector<4x1xf32> to vector<4x4xf32>
    %221 = arith.subf %217, %220 : vector<4x4xf32>
    %222 = math.exp %221 : vector<4x4xf32>
    %cst_86 = arith.constant dense<0.000000e+00> : vector<4xf32>
    %223 = vector.multi_reduction <add>, %222, %cst_86 [1] : vector<4x4xf32> to vector<4xf32>
    %224 = vector.shape_cast %223 : vector<4xf32> to vector<4x1xf32>
    %225 = vector.broadcast %224 : vector<4x1xf32> to vector<4x4xf32>
    %226 = arith.divf %222, %225 : vector<4x4xf32>
    %cst_87 = arith.constant dense<0.000000e+00> : vector<4x8xf32>
    %227 = tpu.matmul %226, %213, %cst_87 {dimension_numbers = #tpu.dot_dimension_numbers<[1], [0], [0], [1], [0, 0, 1, 1], [], []>} : vector<4x4xf32>, vector<4x8xf32>, vector<4x8xf32> -> vector<4x8xf32>
    %c0_88 = arith.constant 0 : index
    %c24 = arith.constant 24 : index
    %228 = vector.load %arg23[%c0_88, %c24] : memref<4x32xf32, #tpu.memory_space<vmem>>, vector<4x8xf32>
    tpu.vector_store %arg23[%c0_88, %c24], %227 {strides = array<i32>} : memref<4x32xf32, #tpu.memory_space<vmem>>, vector<4x8xf32>,
    %c0_89 = arith.constant 0 : index
    %c0_90 = arith.constant 0 : index
    %229 = vector.load %arg23[%c0_89, %c0_90] : memref<4x32xf32, #tpu.memory_space<vmem>>, vector<4x32xf32>
    %c0_91 = arith.constant 0 : index
    %c0_92 = arith.constant 0 : index
    %230 = vector.load %arg12[%c0_91, %c0_92] : memref<32x32xf32, #tpu.memory_space<vmem>>, vector<32x32xf32>
    %cst_93 = arith.constant dense<0.000000e+00> : vector<4x32xf32>
    %231 = tpu.matmul %229, %230, %cst_93 {dimension_numbers = #tpu.dot_dimension_numbers<[1], [0], [0], [1], [0, 0, 1, 1], [], []>} : vector<4x32xf32>, vector<32x32xf32>, vector<4x32xf32> -> vector<4x32xf32>
    %c0_94 = arith.constant 0 : index
    %c0_95 = arith.constant 0 : index
    %232 = vector.load %arg13[%c0_94, %c0_95] : memref<1x32xf32, #tpu.memory_space<vmem>>, vector<1x32xf32>
    %233 = vector.broadcast %232 : vector<1x32xf32> to vector<4x32xf32>
    %234 = arith.addf %231, %233 : vector<4x32xf32>
    %235 = arith.addf %151, %234 : vector<4x32xf32>
    %c0_96 = arith.constant 0 : index
    %c0_97 = arith.constant 0 : index
    %236 = vector.load %arg14[%c0_96, %c0_97] : memref<1x32xf32, #tpu.memory_space<vmem>>, vector<1x32xf32>
    %c0_98 = arith.constant 0 : index
    %c0_99 = arith.constant 0 : index
    %237 = vector.load %arg15[%c0_98, %c0_99] : memref<1x32xf32, #tpu.memory_space<vmem>>, vector<1x32xf32>
    %cst_100 = arith.constant dense<0.000000e+00> : vector<4xf32>
    %238 = vector.multi_reduction <add>, %235, %cst_100 [1] : vector<4x32xf32> to vector<4xf32>
    %239 = vector.shape_cast %238 : vector<4xf32> to vector<4x1xf32>
    %cst_101 = arith.constant 3.200000e+01 : f32
    %240 = vector.broadcast %cst_101 : f32 to vector<4x1xf32>
    %241 = arith.divf %239, %240 : vector<4x1xf32>
    %242 = vector.broadcast %241 : vector<4x1xf32> to vector<4x32xf32>
    %243 = arith.subf %235, %242 : vector<4x32xf32>
    %244 = arith.mulf %243, %243 : vector<4x32xf32>
    %cst_102 = arith.constant dense<0.000000e+00> : vector<4xf32>
    %245 = vector.multi_reduction <add>, %244, %cst_102 [1] : vector<4x32xf32> to vector<4xf32>
    %246 = vector.shape_cast %245 : vector<4xf32> to vector<4x1xf32>
    %cst_103 = arith.constant 3.200000e+01 : f32
    %247 = vector.broadcast %cst_103 : f32 to vector<4x1xf32>
    %248 = arith.divf %246, %247 : vector<4x1xf32>
    %cst_104 = arith.constant 9.99999996E-13 : f32
    %249 = vector.broadcast %cst_104 : f32 to vector<4x1xf32>
    %250 = arith.addf %248, %249 : vector<4x1xf32>
    %251 = math.rsqrt %250 : vector<4x1xf32>
    %252 = vector.broadcast %251 : vector<4x1xf32> to vector<4x32xf32>
    %253 = arith.mulf %243, %252 : vector<4x32xf32>
    %254 = vector.broadcast %236 : vector<1x32xf32> to vector<4x32xf32>
    %255 = arith.mulf %253, %254 : vector<4x32xf32>
    %256 = vector.broadcast %237 : vector<1x32xf32> to vector<4x32xf32>
    %257 = arith.addf %255, %256 : vector<4x32xf32>
    %c0_105 = arith.constant 0 : index
    %c0_106 = arith.constant 0 : index
    %258 = vector.load %arg16[%c0_105, %c0_106] : memref<32x32xf32, #tpu.memory_space<vmem>>, vector<32x32xf32>
    %cst_107 = arith.constant dense<0.000000e+00> : vector<4x32xf32>
    %259 = tpu.matmul %257, %258, %cst_107 {dimension_numbers = #tpu.dot_dimension_numbers<[1], [0], [0], [1], [0, 0, 1, 1], [], []>} : vector<4x32xf32>, vector<32x32xf32>, vector<4x32xf32> -> vector<4x32xf32>
    %c0_108 = arith.constant 0 : index
    %c0_109 = arith.constant 0 : index
    %260 = vector.load %arg17[%c0_108, %c0_109] : memref<1x32xf32, #tpu.memory_space<vmem>>, vector<1x32xf32>
    %261 = vector.broadcast %260 : vector<1x32xf32> to vector<4x32xf32>
    %262 = arith.addf %259, %261 : vector<4x32xf32>
    %cst_110 = arith.constant 0.000000e+00 : f32
    %263 = vector.broadcast %cst_110 : f32 to vector<4x32xf32>
    %264 = arith.maximumf %262, %263 : vector<4x32xf32>
    %c0_111 = arith.constant 0 : index
    %c0_112 = arith.constant 0 : index
    %265 = vector.load %arg18[%c0_111, %c0_112] : memref<32x32xf32, #tpu.memory_space<vmem>>, vector<32x32xf32>
    %cst_113 = arith.constant dense<0.000000e+00> : vector<4x32xf32>
    %266 = tpu.matmul %264, %265, %cst_113 {dimension_numbers = #tpu.dot_dimension_numbers<[1], [0], [0], [1], [0, 0, 1, 1], [], []>} : vector<4x32xf32>, vector<32x32xf32>, vector<4x32xf32> -> vector<4x32xf32>
    %c0_114 = arith.constant 0 : index
    %c0_115 = arith.constant 0 : index
    %267 = vector.load %arg19[%c0_114, %c0_115] : memref<1x32xf32, #tpu.memory_space<vmem>>, vector<1x32xf32>
    %268 = vector.broadcast %267 : vector<1x32xf32> to vector<4x32xf32>
    %269 = arith.addf %266, %268 : vector<4x32xf32>
    %270 = arith.addf %257, %269 : vector<4x32xf32>
    %c0_116 = arith.constant 0 : index
    %c0_117 = arith.constant 0 : index
    %271 = vector.load %arg20[%c0_116, %c0_117] : memref<1x32xf32, #tpu.memory_space<vmem>>, vector<1x32xf32>
    %c0_118 = arith.constant 0 : index
    %c0_119 = arith.constant 0 : index
    %272 = vector.load %arg21[%c0_118, %c0_119] : memref<1x32xf32, #tpu.memory_space<vmem>>, vector<1x32xf32>
    %cst_120 = arith.constant dense<0.000000e+00> : vector<4xf32>
    %273 = vector.multi_reduction <add>, %270, %cst_120 [1] : vector<4x32xf32> to vector<4xf32>
    %274 = vector.shape_cast %273 : vector<4xf32> to vector<4x1xf32>
    %cst_121 = arith.constant 3.200000e+01 : f32
    %275 = vector.broadcast %cst_121 : f32 to vector<4x1xf32>
    %276 = arith.divf %274, %275 : vector<4x1xf32>
    %277 = vector.broadcast %276 : vector<4x1xf32> to vector<4x32xf32>
    %278 = arith.subf %270, %277 : vector<4x32xf32>
    %279 = arith.mulf %278, %278 : vector<4x32xf32>
    %cst_122 = arith.constant dense<0.000000e+00> : vector<4xf32>
    %280 = vector.multi_reduction <add>, %279, %cst_122 [1] : vector<4x32xf32> to vector<4xf32>
    %281 = vector.shape_cast %280 : vector<4xf32> to vector<4x1xf32>
    %cst_123 = arith.constant 3.200000e+01 : f32
    %282 = vector.broadcast %cst_123 : f32 to vector<4x1xf32>
    %283 = arith.divf %281, %282 : vector<4x1xf32>
    %cst_124 = arith.constant 9.99999996E-13 : f32
    %284 = vector.broadcast %cst_124 : f32 to vector<4x1xf32>
    %285 = arith.addf %283, %284 : vector<4x1xf32>
    %286 = math.rsqrt %285 : vector<4x1xf32>
    %287 = vector.broadcast %286 : vector<4x1xf32> to vector<4x32xf32>
    %288 = arith.mulf %278, %287 : vector<4x32xf32>
    %289 = vector.broadcast %271 : vector<1x32xf32> to vector<4x32xf32>
    %290 = arith.mulf %288, %289 : vector<4x32xf32>
    %291 = vector.broadcast %272 : vector<1x32xf32> to vector<4x32xf32>
    %292 = arith.addf %290, %291 : vector<4x32xf32>
    %cst_125 = arith.constant 2.500000e-01 : f32
    %293 = vector.broadcast %cst_125 : f32 to vector<1x4xf32>
    %cst_126 = arith.constant dense<0.000000e+00> : vector<1x32xf32>
    %294 = tpu.matmul %293, %292, %cst_126 {dimension_numbers = #tpu.dot_dimension_numbers<[1], [0], [0], [1], [0, 0, 1, 1], [], []>} : vector<1x4xf32>, vector<4x32xf32>, vector<1x32xf32> -> vector<1x32xf32>
    %c0_127 = arith.constant 0 : index
    %c0_128 = arith.constant 0 : index
    %c0_129 = arith.constant 0 : index
    %295 = vector.load %arg22[%c0_127, %c0_128, %c0_129] : memref<1x1x32xf32, #tpu.memory_space<vmem>>, vector<1x1x32xf32>
    %296 = vector.shape_cast %295 : vector<1x1x32xf32> to vector<1x32xf32>
    %297 = vector.shape_cast %294 : vector<1x32xf32> to vector<1x1x32xf32>
    tpu.vector_store %arg22[%c0_127, %c0_128, %c0_129], %297 {strides = array<i32>} : memref<1x1x32xf32, #tpu.memory_space<vmem>>, vector<1x1x32xf32>,
    return
  }
  func.func @transform_0(%arg0: i32) -> (i32, i32, i32) {
    %c0_i32 = arith.constant 0 : i32
    %c0_i32_0 = arith.constant 0 : i32
    %c0_i32_1 = arith.constant 0 : i32
    return %arg0, %c0_i32, %c0_i32_0 : i32, i32, i32
  }
  func.func @transform_1(%arg0: i32) -> (i32, i32) {
    %c0_i32 = arith.constant 0 : i32
    %c0_i32_0 = arith.constant 0 : i32
    %c0_i32_1 = arith.constant 0 : i32
    return %c0_i32, %c0_i32_0 : i32, i32
  }
  func.func @transform_2(%arg0: i32) -> (i32, i32) {
    %c0_i32 = arith.constant 0 : i32
    %c0_i32_0 = arith.constant 0 : i32
    %c0_i32_1 = arith.constant 0 : i32
    return %c0_i32, %c0_i32_0 : i32, i32
  }
  func.func @transform_3(%arg0: i32) -> (i32, i32) {
    %c0_i32 = arith.constant 0 : i32
    %c0_i32_0 = arith.constant 0 : i32
    %c0_i32_1 = arith.constant 0 : i32
    return %c0_i32, %c0_i32_0 : i32, i32
  }
  func.func @transform_4(%arg0: i32) -> (i32, i32) {
    %c0_i32 = arith.constant 0 : i32
    %c0_i32_0 = arith.constant 0 : i32
    %c0_i32_1 = arith.constant 0 : i32
    return %c0_i32, %c0_i32_0 : i32, i32
  }
  func.func @transform_5(%arg0: i32) -> (i32, i32) {
    %c0_i32 = arith.constant 0 : i32
    %c0_i32_0 = arith.constant 0 : i32
    %c0_i32_1 = arith.constant 0 : i32
    return %c0_i32, %c0_i32_0 : i32, i32
  }
  func.func @transform_6(%arg0: i32) -> (i32, i32) {
    %c0_i32 = arith.constant 0 : i32
    %c0_i32_0 = arith.constant 0 : i32
    %c0_i32_1 = arith.constant 0 : i32
    return %c0_i32, %c0_i32_0 : i32, i32
  }
  func.func @transform_7(%arg0: i32) -> (i32, i32) {
    %c0_i32 = arith.constant 0 : i32
    %c0_i32_0 = arith.constant 0 : i32
    %c0_i32_1 = arith.constant 0 : i32
    return %c0_i32, %c0_i32_0 : i32, i32
  }
  func.func @transform_8(%arg0: i32) -> (i32, i32) {
    %c0_i32 = arith.constant 0 : i32
    %c0_i32_0 = arith.constant 0 : i32
    %c0_i32_1 = arith.constant 0 : i32
    return %c0_i32, %c0_i32_0 : i32, i32
  }
  func.func @transform_9(%arg0: i32) -> (i32, i32) {
    %c0_i32 = arith.constant 0 : i32
    %c0_i32_0 = arith.constant 0 : i32
    %c0_i32_1 = arith.constant 0 : i32
    return %c0_i32, %c0_i32_0 : i32, i32
  }
  func.func @transform_10(%arg0: i32) -> (i32, i32) {
    %c0_i32 = arith.constant 0 : i32
    %c0_i32_0 = arith.constant 0 : i32
    %c0_i32_1 = arith.constant 0 : i32
    return %c0_i32, %c0_i32_0 : i32, i32
  }
  func.func @transform_11(%arg0: i32) -> (i32, i32) {
    %c0_i32 = arith.constant 0 : i32
    %c0_i32_0 = arith.constant 0 : i32
    %c0_i32_1 = arith.constant 0 : i32
    return %c0_i32, %c0_i32_0 : i32, i32
  }
  func.func @transform_12(%arg0: i32) -> (i32, i32) {
    %c0_i32 = arith.constant 0 : i32
    %c0_i32_0 = arith.constant 0 : i32
    %c0_i32_1 = arith.constant 0 : i32
    return %c0_i32, %c0_i32_0 : i32, i32
  }
  func.func @transform_13(%arg0: i32) -> (i32, i32) {
    %c0_i32 = arith.constant 0 : i32
    %c0_i32_0 = arith.constant 0 : i32
    %c0_i32_1 = arith.constant 0 : i32
    return %c0_i32, %c0_i32_0 : i32, i32
  }
  func.func @transform_14(%arg0: i32) -> (i32, i32) {
    %c0_i32 = arith.constant 0 : i32
    %c0_i32_0 = arith.constant 0 : i32
    %c0_i32_1 = arith.constant 0 : i32
    return %c0_i32, %c0_i32_0 : i32, i32
  }
  func.func @transform_15(%arg0: i32) -> (i32, i32) {
    %c0_i32 = arith.constant 0 : i32
    %c0_i32_0 = arith.constant 0 : i32
    %c0_i32_1 = arith.constant 0 : i32
    return %c0_i32, %c0_i32_0 : i32, i32
  }
  func.func @transform_16(%arg0: i32) -> (i32, i32) {
    %c0_i32 = arith.constant 0 : i32
    %c0_i32_0 = arith.constant 0 : i32
    %c0_i32_1 = arith.constant 0 : i32
    return %c0_i32, %c0_i32_0 : i32, i32
  }
  func.func @transform_17(%arg0: i32) -> (i32, i32) {
    %c0_i32 = arith.constant 0 : i32
    %c0_i32_0 = arith.constant 0 : i32
    %c0_i32_1 = arith.constant 0 : i32
    return %c0_i32, %c0_i32_0 : i32, i32
  }
  func.func @transform_18(%arg0: i32) -> (i32, i32) {
    %c0_i32 = arith.constant 0 : i32
    %c0_i32_0 = arith.constant 0 : i32
    %c0_i32_1 = arith.constant 0 : i32
    return %c0_i32, %c0_i32_0 : i32, i32
  }
  func.func @transform_19(%arg0: i32) -> (i32, i32) {
    %c0_i32 = arith.constant 0 : i32
    %c0_i32_0 = arith.constant 0 : i32
    %c0_i32_1 = arith.constant 0 : i32
    return %c0_i32, %c0_i32_0 : i32, i32
  }
  func.func @transform_20(%arg0: i32) -> (i32, i32) {
    %c0_i32 = arith.constant 0 : i32
    %c0_i32_0 = arith.constant 0 : i32
    %c0_i32_1 = arith.constant 0 : i32
    return %c0_i32, %c0_i32_0 : i32, i32
  }
  func.func @transform_21(%arg0: i32) -> (i32, i32, i32) {
    %c0_i32 = arith.constant 0 : i32
    %c0_i32_0 = arith.constant 0 : i32
    %c0_i32_1 = arith.constant 0 : i32
    return %arg0, %c0_i32, %c0_i32_0 : i32, i32, i32
  }
}

module attributes {stable_mosaic.version = 11 : i64} {
  func.func @_agg_predict_kernel(%arg0: i32, %arg1: memref<8x32xf32, #tpu.memory_space<vmem>>, %arg2: memref<8x3xf32, #tpu.memory_space<vmem>>, %arg3: memref<8x3xf32, #tpu.memory_space<vmem>>, %arg4: memref<8x8xf32, #tpu.memory_space<vmem>>, %arg5: memref<32x8xf32, #tpu.memory_space<vmem>>, %arg6: memref<32x8xf32, #tpu.memory_space<vmem>>, %arg7: memref<8x32xf32, #tpu.memory_space<vmem>>, %arg8: memref<32x96xf32, #tpu.memory_space<vmem>>, %arg9: memref<1x96xf32, #tpu.memory_space<vmem>>, %arg10: memref<32x32xf32, #tpu.memory_space<vmem>>, %arg11: memref<1x32xf32, #tpu.memory_space<vmem>>, %arg12: memref<1x32xf32, #tpu.memory_space<vmem>>, %arg13: memref<1x32xf32, #tpu.memory_space<vmem>>, %arg14: memref<32x32xf32, #tpu.memory_space<vmem>>, %arg15: memref<1x32xf32, #tpu.memory_space<vmem>>, %arg16: memref<32x32xf32, #tpu.memory_space<vmem>>, %arg17: memref<1x32xf32, #tpu.memory_space<vmem>>, %arg18: memref<1x32xf32, #tpu.memory_space<vmem>>, %arg19: memref<1x32xf32, #tpu.memory_space<vmem>>, %arg20: memref<32x32xf32, #tpu.memory_space<vmem>>, %arg21: memref<1x32xf32, #tpu.memory_space<vmem>>, %arg22: memref<32x16xf32, #tpu.memory_space<vmem>>, %arg23: memref<1x16xf32, #tpu.memory_space<vmem>>, %arg24: memref<16x3xf32, #tpu.memory_space<vmem>>, %arg25: memref<1x3xf32, #tpu.memory_space<vmem>>, %arg26: memref<64x32xf32, #tpu.memory_space<vmem>>, %arg27: memref<1x32xf32, #tpu.memory_space<vmem>>, %arg28: memref<32x16xf32, #tpu.memory_space<vmem>>, %arg29: memref<1x16xf32, #tpu.memory_space<vmem>>, %arg30: memref<16x2xf32, #tpu.memory_space<vmem>>, %arg31: memref<1x2xf32, #tpu.memory_space<vmem>>, %arg32: memref<8x128xf32, #tpu.memory_space<vmem>>, %arg33: memref<8x32xf32, #tpu.memory_space<vmem>>) attributes {dimension_semantics = [#tpu.dimension_semantics<arbitrary>], iteration_bounds = array<i64: 1>, scalar_prefetch = 0 : i64, scratch_operands = 1 : i64, tpu.core_type = #tpu.core_type<tc>, window_params = [{pipeline_mode = #tpu.pipeline_mode<synchronous>, transform_indices = @transform_0, window_bounds = array<i64: 8, 32>}, {pipeline_mode = #tpu.pipeline_mode<synchronous>, transform_indices = @transform_1, window_bounds = array<i64: 8, 3>}, {pipeline_mode = #tpu.pipeline_mode<synchronous>, transform_indices = @transform_2, window_bounds = array<i64: 8, 3>}, {pipeline_mode = #tpu.pipeline_mode<synchronous>, transform_indices = @transform_3, window_bounds = array<i64: 8, 8>}, {pipeline_mode = #tpu.pipeline_mode<synchronous>, transform_indices = @transform_4, window_bounds = array<i64: 32, 8>}, {pipeline_mode = #tpu.pipeline_mode<synchronous>, transform_indices = @transform_5, window_bounds = array<i64: 32, 8>}, {pipeline_mode = #tpu.pipeline_mode<synchronous>, transform_indices = @transform_6, window_bounds = array<i64: 8, 32>}, {pipeline_mode = #tpu.pipeline_mode<synchronous>, transform_indices = @transform_7, window_bounds = array<i64: 32, 96>}, {pipeline_mode = #tpu.pipeline_mode<synchronous>, transform_indices = @transform_8, window_bounds = array<i64: 1, 96>}, {pipeline_mode = #tpu.pipeline_mode<synchronous>, transform_indices = @transform_9, window_bounds = array<i64: 32, 32>}, {pipeline_mode = #tpu.pipeline_mode<synchronous>, transform_indices = @transform_10, window_bounds = array<i64: 1, 32>}, {pipeline_mode = #tpu.pipeline_mode<synchronous>, transform_indices = @transform_11, window_bounds = array<i64: 1, 32>}, {pipeline_mode = #tpu.pipeline_mode<synchronous>, transform_indices = @transform_12, window_bounds = array<i64: 1, 32>}, {pipeline_mode = #tpu.pipeline_mode<synchronous>, transform_indices = @transform_13, window_bounds = array<i64: 32, 32>}, {pipeline_mode = #tpu.pipeline_mode<synchronous>, transform_indices = @transform_14, window_bounds = array<i64: 1, 32>}, {pipeline_mode = #tpu.pipeline_mode<synchronous>, transform_indices = @transform_15, window_bounds = array<i64: 32, 32>}, {pipeline_mode = #tpu.pipeline_mode<synchronous>, transform_indices = @transform_16, window_bounds = array<i64: 1, 32>}, {pipeline_mode = #tpu.pipeline_mode<synchronous>, transform_indices = @transform_17, window_bounds = array<i64: 1, 32>}, {pipeline_mode = #tpu.pipeline_mode<synchronous>, transform_indices = @transform_18, window_bounds = array<i64: 1, 32>}, {pipeline_mode = #tpu.pipeline_mode<synchronous>, transform_indices = @transform_19, window_bounds = array<i64: 32, 32>}, {pipeline_mode = #tpu.pipeline_mode<synchronous>, transform_indices = @transform_20, window_bounds = array<i64: 1, 32>}, {pipeline_mode = #tpu.pipeline_mode<synchronous>, transform_indices = @transform_21, window_bounds = array<i64: 32, 16>}, {pipeline_mode = #tpu.pipeline_mode<synchronous>, transform_indices = @transform_22, window_bounds = array<i64: 1, 16>}, {pipeline_mode = #tpu.pipeline_mode<synchronous>, transform_indices = @transform_23, window_bounds = array<i64: 16, 3>}, {pipeline_mode = #tpu.pipeline_mode<synchronous>, transform_indices = @transform_24, window_bounds = array<i64: 1, 3>}, {pipeline_mode = #tpu.pipeline_mode<synchronous>, transform_indices = @transform_25, window_bounds = array<i64: 64, 32>}, {pipeline_mode = #tpu.pipeline_mode<synchronous>, transform_indices = @transform_26, window_bounds = array<i64: 1, 32>}, {pipeline_mode = #tpu.pipeline_mode<synchronous>, transform_indices = @transform_27, window_bounds = array<i64: 32, 16>}, {pipeline_mode = #tpu.pipeline_mode<synchronous>, transform_indices = @transform_28, window_bounds = array<i64: 1, 16>}, {pipeline_mode = #tpu.pipeline_mode<synchronous>, transform_indices = @transform_29, window_bounds = array<i64: 16, 2>}, {pipeline_mode = #tpu.pipeline_mode<synchronous>, transform_indices = @transform_30, window_bounds = array<i64: 1, 2>}, {pipeline_mode = #tpu.pipeline_mode<synchronous>, transform_indices = @transform_31, window_bounds = array<i64: 8, 128>}]} {
    %c0 = arith.constant 0 : index
    %c0_0 = arith.constant 0 : index
    %0 = vector.load %arg1[%c0, %c0_0] : memref<8x32xf32, #tpu.memory_space<vmem>>, vector<8x32xf32>
    %c0_1 = arith.constant 0 : index
    %c0_2 = arith.constant 0 : index
    %1 = vector.load %arg4[%c0_1, %c0_2] : memref<8x8xf32, #tpu.memory_space<vmem>>, vector<8x8xf32>
    %cst = arith.constant 5.000000e-01 : f32
    %2 = vector.broadcast %cst : f32 to vector<8x8xf32>
    %3 = arith.cmpf ogt, %1, %2 : vector<8x8xf32>
    %c0_3 = arith.constant 0 : index
    %c0_4 = arith.constant 0 : index
    %4 = vector.load %arg8[%c0_3, %c0_4] : memref<32x96xf32, #tpu.memory_space<vmem>>, vector<32x96xf32>
    %cst_5 = arith.constant dense<0.000000e+00> : vector<8x96xf32>
    %5 = tpu.matmul %0, %4, %cst_5 {dimension_numbers = #tpu.dot_dimension_numbers<[1], [0], [0], [1], [0, 0, 1, 1], [], []>} : vector<8x32xf32>, vector<32x96xf32>, vector<8x96xf32> -> vector<8x96xf32>
    %c0_6 = arith.constant 0 : index
    %c0_7 = arith.constant 0 : index
    %6 = vector.load %arg9[%c0_6, %c0_7] : memref<1x96xf32, #tpu.memory_space<vmem>>, vector<1x96xf32>
    %7 = vector.broadcast %6 : vector<1x96xf32> to vector<8x96xf32>
    %8 = arith.addf %5, %7 : vector<8x96xf32>
    %9 = vector.extract_strided_slice %8 {offsets = [0, 0], sizes = [8, 8], strides = [1, 1]} : vector<8x96xf32> to vector<8x8xf32>
    %10 = vector.extract_strided_slice %8 {offsets = [0, 32], sizes = [8, 8], strides = [1, 1]} : vector<8x96xf32> to vector<8x8xf32>
    %11 = vector.extract_strided_slice %8 {offsets = [0, 64], sizes = [8, 8], strides = [1, 1]} : vector<8x96xf32> to vector<8x8xf32>
    %12 = tpu.transpose %10, [1, 0] : vector<8x8xf32> -> vector<8x8xf32>
    %cst_8 = arith.constant dense<0.000000e+00> : vector<8x8xf32>
    %13 = tpu.matmul %9, %12, %cst_8 {dimension_numbers = #tpu.dot_dimension_numbers<[1], [0], [0], [1], [0, 0, 1, 1], [], []>} : vector<8x8xf32>, vector<8x8xf32>, vector<8x8xf32> -> vector<8x8xf32>
    %cst_9 = arith.constant 0.353553385 : f32
    %14 = vector.broadcast %cst_9 : f32 to vector<8x8xf32>
    %15 = arith.mulf %13, %14 : vector<8x8xf32>
    %cst_10 = arith.constant -1.000000e+30 : f32
    %16 = vector.broadcast %cst_10 : f32 to vector<8x8xf32>
    %17 = arith.select %3, %15, %16 : vector<8x8xi1>, vector<8x8xf32>
    %cst_11 = arith.constant dense<0xFF800000> : vector<8xf32>
    %18 = vector.multi_reduction <maximumf>, %17, %cst_11 [1] : vector<8x8xf32> to vector<8xf32>
    %19 = vector.shape_cast %18 : vector<8xf32> to vector<8x1xf32>
    %20 = vector.broadcast %19 : vector<8x1xf32> to vector<8x8xf32>
    %21 = arith.subf %17, %20 : vector<8x8xf32>
    %22 = math.exp %21 : vector<8x8xf32>
    %cst_12 = arith.constant dense<0.000000e+00> : vector<8xf32>
    %23 = vector.multi_reduction <add>, %22, %cst_12 [1] : vector<8x8xf32> to vector<8xf32>
    %24 = vector.shape_cast %23 : vector<8xf32> to vector<8x1xf32>
    %25 = vector.broadcast %24 : vector<8x1xf32> to vector<8x8xf32>
    %26 = arith.divf %22, %25 : vector<8x8xf32>
    %cst_13 = arith.constant dense<0.000000e+00> : vector<8x8xf32>
    %27 = tpu.matmul %26, %11, %cst_13 {dimension_numbers = #tpu.dot_dimension_numbers<[1], [0], [0], [1], [0, 0, 1, 1], [], []>} : vector<8x8xf32>, vector<8x8xf32>, vector<8x8xf32> -> vector<8x8xf32>
    %c0_14 = arith.constant 0 : index
    %c0_15 = arith.constant 0 : index
    %28 = vector.load %arg33[%c0_14, %c0_15] : memref<8x32xf32, #tpu.memory_space<vmem>>, vector<8x8xf32>
    tpu.vector_store %arg33[%c0_14, %c0_15], %27 {strides = array<i32>} : memref<8x32xf32, #tpu.memory_space<vmem>>, vector<8x8xf32>,
    %29 = vector.extract_strided_slice %8 {offsets = [0, 8], sizes = [8, 8], strides = [1, 1]} : vector<8x96xf32> to vector<8x8xf32>
    %30 = vector.extract_strided_slice %8 {offsets = [0, 40], sizes = [8, 8], strides = [1, 1]} : vector<8x96xf32> to vector<8x8xf32>
    %31 = vector.extract_strided_slice %8 {offsets = [0, 72], sizes = [8, 8], strides = [1, 1]} : vector<8x96xf32> to vector<8x8xf32>
    %32 = tpu.transpose %30, [1, 0] : vector<8x8xf32> -> vector<8x8xf32>
    %cst_16 = arith.constant dense<0.000000e+00> : vector<8x8xf32>
    %33 = tpu.matmul %29, %32, %cst_16 {dimension_numbers = #tpu.dot_dimension_numbers<[1], [0], [0], [1], [0, 0, 1, 1], [], []>} : vector<8x8xf32>, vector<8x8xf32>, vector<8x8xf32> -> vector<8x8xf32>
    %cst_17 = arith.constant 0.353553385 : f32
    %34 = vector.broadcast %cst_17 : f32 to vector<8x8xf32>
    %35 = arith.mulf %33, %34 : vector<8x8xf32>
    %cst_18 = arith.constant -1.000000e+30 : f32
    %36 = vector.broadcast %cst_18 : f32 to vector<8x8xf32>
    %37 = arith.select %3, %35, %36 : vector<8x8xi1>, vector<8x8xf32>
    %cst_19 = arith.constant dense<0xFF800000> : vector<8xf32>
    %38 = vector.multi_reduction <maximumf>, %37, %cst_19 [1] : vector<8x8xf32> to vector<8xf32>
    %39 = vector.shape_cast %38 : vector<8xf32> to vector<8x1xf32>
    %40 = vector.broadcast %39 : vector<8x1xf32> to vector<8x8xf32>
    %41 = arith.subf %37, %40 : vector<8x8xf32>
    %42 = math.exp %41 : vector<8x8xf32>
    %cst_20 = arith.constant dense<0.000000e+00> : vector<8xf32>
    %43 = vector.multi_reduction <add>, %42, %cst_20 [1] : vector<8x8xf32> to vector<8xf32>
    %44 = vector.shape_cast %43 : vector<8xf32> to vector<8x1xf32>
    %45 = vector.broadcast %44 : vector<8x1xf32> to vector<8x8xf32>
    %46 = arith.divf %42, %45 : vector<8x8xf32>
    %cst_21 = arith.constant dense<0.000000e+00> : vector<8x8xf32>
    %47 = tpu.matmul %46, %31, %cst_21 {dimension_numbers = #tpu.dot_dimension_numbers<[1], [0], [0], [1], [0, 0, 1, 1], [], []>} : vector<8x8xf32>, vector<8x8xf32>, vector<8x8xf32> -> vector<8x8xf32>
    %c0_22 = arith.constant 0 : index
    %c8 = arith.constant 8 : index
    %48 = vector.load %arg33[%c0_22, %c8] : memref<8x32xf32, #tpu.memory_space<vmem>>, vector<8x8xf32>
    tpu.vector_store %arg33[%c0_22, %c8], %47 {strides = array<i32>} : memref<8x32xf32, #tpu.memory_space<vmem>>, vector<8x8xf32>,
    %49 = vector.extract_strided_slice %8 {offsets = [0, 16], sizes = [8, 8], strides = [1, 1]} : vector<8x96xf32> to vector<8x8xf32>
    %50 = vector.extract_strided_slice %8 {offsets = [0, 48], sizes = [8, 8], strides = [1, 1]} : vector<8x96xf32> to vector<8x8xf32>
    %51 = vector.extract_strided_slice %8 {offsets = [0, 80], sizes = [8, 8], strides = [1, 1]} : vector<8x96xf32> to vector<8x8xf32>
    %52 = tpu.transpose %50, [1, 0] : vector<8x8xf32> -> vector<8x8xf32>
    %cst_23 = arith.constant dense<0.000000e+00> : vector<8x8xf32>
    %53 = tpu.matmul %49, %52, %cst_23 {dimension_numbers = #tpu.dot_dimension_numbers<[1], [0], [0], [1], [0, 0, 1, 1], [], []>} : vector<8x8xf32>, vector<8x8xf32>, vector<8x8xf32> -> vector<8x8xf32>
    %cst_24 = arith.constant 0.353553385 : f32
    %54 = vector.broadcast %cst_24 : f32 to vector<8x8xf32>
    %55 = arith.mulf %53, %54 : vector<8x8xf32>
    %cst_25 = arith.constant -1.000000e+30 : f32
    %56 = vector.broadcast %cst_25 : f32 to vector<8x8xf32>
    %57 = arith.select %3, %55, %56 : vector<8x8xi1>, vector<8x8xf32>
    %cst_26 = arith.constant dense<0xFF800000> : vector<8xf32>
    %58 = vector.multi_reduction <maximumf>, %57, %cst_26 [1] : vector<8x8xf32> to vector<8xf32>
    %59 = vector.shape_cast %58 : vector<8xf32> to vector<8x1xf32>
    %60 = vector.broadcast %59 : vector<8x1xf32> to vector<8x8xf32>
    %61 = arith.subf %57, %60 : vector<8x8xf32>
    %62 = math.exp %61 : vector<8x8xf32>
    %cst_27 = arith.constant dense<0.000000e+00> : vector<8xf32>
    %63 = vector.multi_reduction <add>, %62, %cst_27 [1] : vector<8x8xf32> to vector<8xf32>
    %64 = vector.shape_cast %63 : vector<8xf32> to vector<8x1xf32>
    %65 = vector.broadcast %64 : vector<8x1xf32> to vector<8x8xf32>
    %66 = arith.divf %62, %65 : vector<8x8xf32>
    %cst_28 = arith.constant dense<0.000000e+00> : vector<8x8xf32>
    %67 = tpu.matmul %66, %51, %cst_28 {dimension_numbers = #tpu.dot_dimension_numbers<[1], [0], [0], [1], [0, 0, 1, 1], [], []>} : vector<8x8xf32>, vector<8x8xf32>, vector<8x8xf32> -> vector<8x8xf32>
    %c0_29 = arith.constant 0 : index
    %c16 = arith.constant 16 : index
    %68 = vector.load %arg33[%c0_29, %c16] : memref<8x32xf32, #tpu.memory_space<vmem>>, vector<8x8xf32>
    tpu.vector_store %arg33[%c0_29, %c16], %67 {strides = array<i32>} : memref<8x32xf32, #tpu.memory_space<vmem>>, vector<8x8xf32>,
    %69 = vector.extract_strided_slice %8 {offsets = [0, 24], sizes = [8, 8], strides = [1, 1]} : vector<8x96xf32> to vector<8x8xf32>
    %70 = vector.extract_strided_slice %8 {offsets = [0, 56], sizes = [8, 8], strides = [1, 1]} : vector<8x96xf32> to vector<8x8xf32>
    %71 = vector.extract_strided_slice %8 {offsets = [0, 88], sizes = [8, 8], strides = [1, 1]} : vector<8x96xf32> to vector<8x8xf32>
    %72 = tpu.transpose %70, [1, 0] : vector<8x8xf32> -> vector<8x8xf32>
    %cst_30 = arith.constant dense<0.000000e+00> : vector<8x8xf32>
    %73 = tpu.matmul %69, %72, %cst_30 {dimension_numbers = #tpu.dot_dimension_numbers<[1], [0], [0], [1], [0, 0, 1, 1], [], []>} : vector<8x8xf32>, vector<8x8xf32>, vector<8x8xf32> -> vector<8x8xf32>
    %cst_31 = arith.constant 0.353553385 : f32
    %74 = vector.broadcast %cst_31 : f32 to vector<8x8xf32>
    %75 = arith.mulf %73, %74 : vector<8x8xf32>
    %cst_32 = arith.constant -1.000000e+30 : f32
    %76 = vector.broadcast %cst_32 : f32 to vector<8x8xf32>
    %77 = arith.select %3, %75, %76 : vector<8x8xi1>, vector<8x8xf32>
    %cst_33 = arith.constant dense<0xFF800000> : vector<8xf32>
    %78 = vector.multi_reduction <maximumf>, %77, %cst_33 [1] : vector<8x8xf32> to vector<8xf32>
    %79 = vector.shape_cast %78 : vector<8xf32> to vector<8x1xf32>
    %80 = vector.broadcast %79 : vector<8x1xf32> to vector<8x8xf32>
    %81 = arith.subf %77, %80 : vector<8x8xf32>
    %82 = math.exp %81 : vector<8x8xf32>
    %cst_34 = arith.constant dense<0.000000e+00> : vector<8xf32>
    %83 = vector.multi_reduction <add>, %82, %cst_34 [1] : vector<8x8xf32> to vector<8xf32>
    %84 = vector.shape_cast %83 : vector<8xf32> to vector<8x1xf32>
    %85 = vector.broadcast %84 : vector<8x1xf32> to vector<8x8xf32>
    %86 = arith.divf %82, %85 : vector<8x8xf32>
    %cst_35 = arith.constant dense<0.000000e+00> : vector<8x8xf32>
    %87 = tpu.matmul %86, %71, %cst_35 {dimension_numbers = #tpu.dot_dimension_numbers<[1], [0], [0], [1], [0, 0, 1, 1], [], []>} : vector<8x8xf32>, vector<8x8xf32>, vector<8x8xf32> -> vector<8x8xf32>
    %c0_36 = arith.constant 0 : index
    %c24 = arith.constant 24 : index
    %88 = vector.load %arg33[%c0_36, %c24] : memref<8x32xf32, #tpu.memory_space<vmem>>, vector<8x8xf32>
    tpu.vector_store %arg33[%c0_36, %c24], %87 {strides = array<i32>} : memref<8x32xf32, #tpu.memory_space<vmem>>, vector<8x8xf32>,
    %c0_37 = arith.constant 0 : index
    %c0_38 = arith.constant 0 : index
    %89 = vector.load %arg33[%c0_37, %c0_38] : memref<8x32xf32, #tpu.memory_space<vmem>>, vector<8x32xf32>
    %c0_39 = arith.constant 0 : index
    %c0_40 = arith.constant 0 : index
    %90 = vector.load %arg10[%c0_39, %c0_40] : memref<32x32xf32, #tpu.memory_space<vmem>>, vector<32x32xf32>
    %cst_41 = arith.constant dense<0.000000e+00> : vector<8x32xf32>
    %91 = tpu.matmul %89, %90, %cst_41 {dimension_numbers = #tpu.dot_dimension_numbers<[1], [0], [0], [1], [0, 0, 1, 1], [], []>} : vector<8x32xf32>, vector<32x32xf32>, vector<8x32xf32> -> vector<8x32xf32>
    %c0_42 = arith.constant 0 : index
    %c0_43 = arith.constant 0 : index
    %92 = vector.load %arg11[%c0_42, %c0_43] : memref<1x32xf32, #tpu.memory_space<vmem>>, vector<1x32xf32>
    %93 = vector.broadcast %92 : vector<1x32xf32> to vector<8x32xf32>
    %94 = arith.addf %91, %93 : vector<8x32xf32>
    %95 = arith.addf %0, %94 : vector<8x32xf32>
    %c0_44 = arith.constant 0 : index
    %c0_45 = arith.constant 0 : index
    %96 = vector.load %arg12[%c0_44, %c0_45] : memref<1x32xf32, #tpu.memory_space<vmem>>, vector<1x32xf32>
    %c0_46 = arith.constant 0 : index
    %c0_47 = arith.constant 0 : index
    %97 = vector.load %arg13[%c0_46, %c0_47] : memref<1x32xf32, #tpu.memory_space<vmem>>, vector<1x32xf32>
    %cst_48 = arith.constant dense<0.000000e+00> : vector<8xf32>
    %98 = vector.multi_reduction <add>, %95, %cst_48 [1] : vector<8x32xf32> to vector<8xf32>
    %99 = vector.shape_cast %98 : vector<8xf32> to vector<8x1xf32>
    %cst_49 = arith.constant 3.200000e+01 : f32
    %100 = vector.broadcast %cst_49 : f32 to vector<8x1xf32>
    %101 = arith.divf %99, %100 : vector<8x1xf32>
    %102 = vector.broadcast %101 : vector<8x1xf32> to vector<8x32xf32>
    %103 = arith.subf %95, %102 : vector<8x32xf32>
    %104 = arith.mulf %103, %103 : vector<8x32xf32>
    %cst_50 = arith.constant dense<0.000000e+00> : vector<8xf32>
    %105 = vector.multi_reduction <add>, %104, %cst_50 [1] : vector<8x32xf32> to vector<8xf32>
    %106 = vector.shape_cast %105 : vector<8xf32> to vector<8x1xf32>
    %cst_51 = arith.constant 3.200000e+01 : f32
    %107 = vector.broadcast %cst_51 : f32 to vector<8x1xf32>
    %108 = arith.divf %106, %107 : vector<8x1xf32>
    %cst_52 = arith.constant 9.99999996E-13 : f32
    %109 = vector.broadcast %cst_52 : f32 to vector<8x1xf32>
    %110 = arith.addf %108, %109 : vector<8x1xf32>
    %111 = math.rsqrt %110 : vector<8x1xf32>
    %112 = vector.broadcast %111 : vector<8x1xf32> to vector<8x32xf32>
    %113 = arith.mulf %103, %112 : vector<8x32xf32>
    %114 = vector.broadcast %96 : vector<1x32xf32> to vector<8x32xf32>
    %115 = arith.mulf %113, %114 : vector<8x32xf32>
    %116 = vector.broadcast %97 : vector<1x32xf32> to vector<8x32xf32>
    %117 = arith.addf %115, %116 : vector<8x32xf32>
    %c0_53 = arith.constant 0 : index
    %c0_54 = arith.constant 0 : index
    %118 = vector.load %arg14[%c0_53, %c0_54] : memref<32x32xf32, #tpu.memory_space<vmem>>, vector<32x32xf32>
    %cst_55 = arith.constant dense<0.000000e+00> : vector<8x32xf32>
    %119 = tpu.matmul %117, %118, %cst_55 {dimension_numbers = #tpu.dot_dimension_numbers<[1], [0], [0], [1], [0, 0, 1, 1], [], []>} : vector<8x32xf32>, vector<32x32xf32>, vector<8x32xf32> -> vector<8x32xf32>
    %c0_56 = arith.constant 0 : index
    %c0_57 = arith.constant 0 : index
    %120 = vector.load %arg15[%c0_56, %c0_57] : memref<1x32xf32, #tpu.memory_space<vmem>>, vector<1x32xf32>
    %121 = vector.broadcast %120 : vector<1x32xf32> to vector<8x32xf32>
    %122 = arith.addf %119, %121 : vector<8x32xf32>
    %cst_58 = arith.constant 0.000000e+00 : f32
    %123 = vector.broadcast %cst_58 : f32 to vector<8x32xf32>
    %124 = arith.maximumf %122, %123 : vector<8x32xf32>
    %c0_59 = arith.constant 0 : index
    %c0_60 = arith.constant 0 : index
    %125 = vector.load %arg16[%c0_59, %c0_60] : memref<32x32xf32, #tpu.memory_space<vmem>>, vector<32x32xf32>
    %cst_61 = arith.constant dense<0.000000e+00> : vector<8x32xf32>
    %126 = tpu.matmul %124, %125, %cst_61 {dimension_numbers = #tpu.dot_dimension_numbers<[1], [0], [0], [1], [0, 0, 1, 1], [], []>} : vector<8x32xf32>, vector<32x32xf32>, vector<8x32xf32> -> vector<8x32xf32>
    %c0_62 = arith.constant 0 : index
    %c0_63 = arith.constant 0 : index
    %127 = vector.load %arg17[%c0_62, %c0_63] : memref<1x32xf32, #tpu.memory_space<vmem>>, vector<1x32xf32>
    %128 = vector.broadcast %127 : vector<1x32xf32> to vector<8x32xf32>
    %129 = arith.addf %126, %128 : vector<8x32xf32>
    %130 = arith.addf %117, %129 : vector<8x32xf32>
    %c0_64 = arith.constant 0 : index
    %c0_65 = arith.constant 0 : index
    %131 = vector.load %arg18[%c0_64, %c0_65] : memref<1x32xf32, #tpu.memory_space<vmem>>, vector<1x32xf32>
    %c0_66 = arith.constant 0 : index
    %c0_67 = arith.constant 0 : index
    %132 = vector.load %arg19[%c0_66, %c0_67] : memref<1x32xf32, #tpu.memory_space<vmem>>, vector<1x32xf32>
    %cst_68 = arith.constant dense<0.000000e+00> : vector<8xf32>
    %133 = vector.multi_reduction <add>, %130, %cst_68 [1] : vector<8x32xf32> to vector<8xf32>
    %134 = vector.shape_cast %133 : vector<8xf32> to vector<8x1xf32>
    %cst_69 = arith.constant 3.200000e+01 : f32
    %135 = vector.broadcast %cst_69 : f32 to vector<8x1xf32>
    %136 = arith.divf %134, %135 : vector<8x1xf32>
    %137 = vector.broadcast %136 : vector<8x1xf32> to vector<8x32xf32>
    %138 = arith.subf %130, %137 : vector<8x32xf32>
    %139 = arith.mulf %138, %138 : vector<8x32xf32>
    %cst_70 = arith.constant dense<0.000000e+00> : vector<8xf32>
    %140 = vector.multi_reduction <add>, %139, %cst_70 [1] : vector<8x32xf32> to vector<8xf32>
    %141 = vector.shape_cast %140 : vector<8xf32> to vector<8x1xf32>
    %cst_71 = arith.constant 3.200000e+01 : f32
    %142 = vector.broadcast %cst_71 : f32 to vector<8x1xf32>
    %143 = arith.divf %141, %142 : vector<8x1xf32>
    %cst_72 = arith.constant 9.99999996E-13 : f32
    %144 = vector.broadcast %cst_72 : f32 to vector<8x1xf32>
    %145 = arith.addf %143, %144 : vector<8x1xf32>
    %146 = math.rsqrt %145 : vector<8x1xf32>
    %147 = vector.broadcast %146 : vector<8x1xf32> to vector<8x32xf32>
    %148 = arith.mulf %138, %147 : vector<8x32xf32>
    %149 = vector.broadcast %131 : vector<1x32xf32> to vector<8x32xf32>
    %150 = arith.mulf %148, %149 : vector<8x32xf32>
    %151 = vector.broadcast %132 : vector<1x32xf32> to vector<8x32xf32>
    %152 = arith.addf %150, %151 : vector<8x32xf32>
    %c0_73 = arith.constant 0 : index
    %c0_74 = arith.constant 0 : index
    %153 = vector.load %arg20[%c0_73, %c0_74] : memref<32x32xf32, #tpu.memory_space<vmem>>, vector<32x32xf32>
    %cst_75 = arith.constant dense<0.000000e+00> : vector<8x32xf32>
    %154 = tpu.matmul %152, %153, %cst_75 {dimension_numbers = #tpu.dot_dimension_numbers<[1], [0], [0], [1], [0, 0, 1, 1], [], []>} : vector<8x32xf32>, vector<32x32xf32>, vector<8x32xf32> -> vector<8x32xf32>
    %c0_76 = arith.constant 0 : index
    %c0_77 = arith.constant 0 : index
    %155 = vector.load %arg21[%c0_76, %c0_77] : memref<1x32xf32, #tpu.memory_space<vmem>>, vector<1x32xf32>
    %156 = vector.broadcast %155 : vector<1x32xf32> to vector<8x32xf32>
    %157 = arith.addf %154, %156 : vector<8x32xf32>
    %cst_78 = arith.constant 0.000000e+00 : f32
    %158 = vector.broadcast %cst_78 : f32 to vector<8x32xf32>
    %159 = arith.maximumf %157, %158 : vector<8x32xf32>
    %c0_79 = arith.constant 0 : index
    %c0_80 = arith.constant 0 : index
    %160 = vector.load %arg22[%c0_79, %c0_80] : memref<32x16xf32, #tpu.memory_space<vmem>>, vector<32x16xf32>
    %cst_81 = arith.constant dense<0.000000e+00> : vector<8x16xf32>
    %161 = tpu.matmul %159, %160, %cst_81 {dimension_numbers = #tpu.dot_dimension_numbers<[1], [0], [0], [1], [0, 0, 1, 1], [], []>} : vector<8x32xf32>, vector<32x16xf32>, vector<8x16xf32> -> vector<8x16xf32>
    %c0_82 = arith.constant 0 : index
    %c0_83 = arith.constant 0 : index
    %162 = vector.load %arg23[%c0_82, %c0_83] : memref<1x16xf32, #tpu.memory_space<vmem>>, vector<1x16xf32>
    %163 = vector.broadcast %162 : vector<1x16xf32> to vector<8x16xf32>
    %164 = arith.addf %161, %163 : vector<8x16xf32>
    %cst_84 = arith.constant 0.000000e+00 : f32
    %165 = vector.broadcast %cst_84 : f32 to vector<8x16xf32>
    %166 = arith.maximumf %164, %165 : vector<8x16xf32>
    %c0_85 = arith.constant 0 : index
    %c0_86 = arith.constant 0 : index
    %167 = vector.load %arg24[%c0_85, %c0_86] : memref<16x3xf32, #tpu.memory_space<vmem>>, vector<16x3xf32>
    %cst_87 = arith.constant dense<0.000000e+00> : vector<8x3xf32>
    %168 = tpu.matmul %166, %167, %cst_87 {dimension_numbers = #tpu.dot_dimension_numbers<[1], [0], [0], [1], [0, 0, 1, 1], [], []>} : vector<8x16xf32>, vector<16x3xf32>, vector<8x3xf32> -> vector<8x3xf32>
    %c0_88 = arith.constant 0 : index
    %c0_89 = arith.constant 0 : index
    %169 = vector.load %arg25[%c0_88, %c0_89] : memref<1x3xf32, #tpu.memory_space<vmem>>, vector<1x3xf32>
    %170 = vector.broadcast %169 : vector<1x3xf32> to vector<8x3xf32>
    %171 = arith.addf %168, %170 : vector<8x3xf32>
    %cst_90 = arith.constant dense<0xFF800000> : vector<8xf32>
    %172 = vector.multi_reduction <maximumf>, %171, %cst_90 [1] : vector<8x3xf32> to vector<8xf32>
    %173 = vector.shape_cast %172 : vector<8xf32> to vector<8x1xf32>
    %174 = vector.broadcast %173 : vector<8x1xf32> to vector<8x3xf32>
    %175 = arith.subf %171, %174 : vector<8x3xf32>
    %176 = math.exp %175 : vector<8x3xf32>
    %cst_91 = arith.constant dense<0.000000e+00> : vector<8xf32>
    %177 = vector.multi_reduction <add>, %176, %cst_91 [1] : vector<8x3xf32> to vector<8xf32>
    %178 = vector.shape_cast %177 : vector<8xf32> to vector<8x1xf32>
    %179 = vector.broadcast %178 : vector<8x1xf32> to vector<8x3xf32>
    %180 = arith.divf %176, %179 : vector<8x3xf32>
    %181 = math.log %178 : vector<8x1xf32>
    %182 = vector.broadcast %181 : vector<8x1xf32> to vector<8x3xf32>
    %183 = arith.subf %175, %182 : vector<8x3xf32>
    %c0_92 = arith.constant 0 : index
    %c0_93 = arith.constant 0 : index
    %184 = vector.load %arg5[%c0_92, %c0_93] : memref<32x8xf32, #tpu.memory_space<vmem>>, vector<32x8xf32>
    %c0_94 = arith.constant 0 : index
    %c0_95 = arith.constant 0 : index
    %185 = vector.load %arg6[%c0_94, %c0_95] : memref<32x8xf32, #tpu.memory_space<vmem>>, vector<32x8xf32>
    %c0_96 = arith.constant 0 : index
    %c0_97 = arith.constant 0 : index
    %186 = vector.load %arg26[%c0_96, %c0_97] : memref<64x32xf32, #tpu.memory_space<vmem>>, vector<64x32xf32>
    %187 = vector.extract_strided_slice %186 {offsets = [0, 0], sizes = [32, 32], strides = [1, 1]} : vector<64x32xf32> to vector<32x32xf32>
    %cst_98 = arith.constant dense<0.000000e+00> : vector<8x32xf32>
    %188 = tpu.matmul %152, %187, %cst_98 {dimension_numbers = #tpu.dot_dimension_numbers<[1], [0], [0], [1], [0, 0, 1, 1], [], []>} : vector<8x32xf32>, vector<32x32xf32>, vector<8x32xf32> -> vector<8x32xf32>
    %189 = vector.extract_strided_slice %186 {offsets = [32, 0], sizes = [32, 32], strides = [1, 1]} : vector<64x32xf32> to vector<32x32xf32>
    %cst_99 = arith.constant dense<0.000000e+00> : vector<8x32xf32>
    %190 = tpu.matmul %152, %189, %cst_99 {dimension_numbers = #tpu.dot_dimension_numbers<[1], [0], [0], [1], [0, 0, 1, 1], [], []>} : vector<8x32xf32>, vector<32x32xf32>, vector<8x32xf32> -> vector<8x32xf32>
    %cst_100 = arith.constant dense<0.000000e+00> : vector<32x32xf32>
    %191 = tpu.matmul %184, %188, %cst_100 {dimension_numbers = #tpu.dot_dimension_numbers<[1], [0], [0], [1], [0, 0, 1, 1], [], []>} : vector<32x8xf32>, vector<8x32xf32>, vector<32x32xf32> -> vector<32x32xf32>
    %cst_101 = arith.constant dense<0.000000e+00> : vector<32x32xf32>
    %192 = tpu.matmul %185, %190, %cst_101 {dimension_numbers = #tpu.dot_dimension_numbers<[1], [0], [0], [1], [0, 0, 1, 1], [], []>} : vector<32x8xf32>, vector<8x32xf32>, vector<32x32xf32> -> vector<32x32xf32>
    %193 = arith.addf %191, %192 : vector<32x32xf32>
    %c0_102 = arith.constant 0 : index
    %c0_103 = arith.constant 0 : index
    %194 = vector.load %arg27[%c0_102, %c0_103] : memref<1x32xf32, #tpu.memory_space<vmem>>, vector<1x32xf32>
    %195 = vector.broadcast %194 : vector<1x32xf32> to vector<32x32xf32>
    %196 = arith.addf %193, %195 : vector<32x32xf32>
    %cst_104 = arith.constant 0.000000e+00 : f32
    %197 = vector.broadcast %cst_104 : f32 to vector<32x32xf32>
    %198 = arith.maximumf %196, %197 : vector<32x32xf32>
    %c0_105 = arith.constant 0 : index
    %c0_106 = arith.constant 0 : index
    %199 = vector.load %arg28[%c0_105, %c0_106] : memref<32x16xf32, #tpu.memory_space<vmem>>, vector<32x16xf32>
    %cst_107 = arith.constant dense<0.000000e+00> : vector<32x16xf32>
    %200 = tpu.matmul %198, %199, %cst_107 {dimension_numbers = #tpu.dot_dimension_numbers<[1], [0], [0], [1], [0, 0, 1, 1], [], []>} : vector<32x32xf32>, vector<32x16xf32>, vector<32x16xf32> -> vector<32x16xf32>
    %c0_108 = arith.constant 0 : index
    %c0_109 = arith.constant 0 : index
    %201 = vector.load %arg29[%c0_108, %c0_109] : memref<1x16xf32, #tpu.memory_space<vmem>>, vector<1x16xf32>
    %202 = vector.broadcast %201 : vector<1x16xf32> to vector<32x16xf32>
    %203 = arith.addf %200, %202 : vector<32x16xf32>
    %cst_110 = arith.constant 0.000000e+00 : f32
    %204 = vector.broadcast %cst_110 : f32 to vector<32x16xf32>
    %205 = arith.maximumf %203, %204 : vector<32x16xf32>
    %c0_111 = arith.constant 0 : index
    %c0_112 = arith.constant 0 : index
    %206 = vector.load %arg30[%c0_111, %c0_112] : memref<16x2xf32, #tpu.memory_space<vmem>>, vector<16x2xf32>
    %cst_113 = arith.constant dense<0.000000e+00> : vector<32x2xf32>
    %207 = tpu.matmul %205, %206, %cst_113 {dimension_numbers = #tpu.dot_dimension_numbers<[1], [0], [0], [1], [0, 0, 1, 1], [], []>} : vector<32x16xf32>, vector<16x2xf32>, vector<32x2xf32> -> vector<32x2xf32>
    %c0_114 = arith.constant 0 : index
    %c0_115 = arith.constant 0 : index
    %208 = vector.load %arg31[%c0_114, %c0_115] : memref<1x2xf32, #tpu.memory_space<vmem>>, vector<1x2xf32>
    %209 = vector.broadcast %208 : vector<1x2xf32> to vector<32x2xf32>
    %210 = arith.addf %207, %209 : vector<32x2xf32>
    %cst_116 = arith.constant dense<0xFF800000> : vector<32xf32>
    %211 = vector.multi_reduction <maximumf>, %210, %cst_116 [1] : vector<32x2xf32> to vector<32xf32>
    %212 = vector.shape_cast %211 : vector<32xf32> to vector<32x1xf32>
    %213 = vector.broadcast %212 : vector<32x1xf32> to vector<32x2xf32>
    %214 = arith.subf %210, %213 : vector<32x2xf32>
    %215 = math.exp %214 : vector<32x2xf32>
    %cst_117 = arith.constant dense<0.000000e+00> : vector<32xf32>
    %216 = vector.multi_reduction <add>, %215, %cst_117 [1] : vector<32x2xf32> to vector<32xf32>
    %217 = vector.shape_cast %216 : vector<32xf32> to vector<32x1xf32>
    %218 = vector.broadcast %217 : vector<32x1xf32> to vector<32x2xf32>
    %219 = arith.divf %215, %218 : vector<32x2xf32>
    %220 = math.log %217 : vector<32x1xf32>
    %221 = vector.broadcast %220 : vector<32x1xf32> to vector<32x2xf32>
    %222 = arith.subf %214, %221 : vector<32x2xf32>
    %c0_118 = arith.constant 0 : index
    %c0_119 = arith.constant 0 : index
    %223 = vector.load %arg3[%c0_118, %c0_119] : memref<8x3xf32, #tpu.memory_space<vmem>>, vector<8x3xf32>
    %224 = arith.mulf %223, %183 : vector<8x3xf32>
    %cst_120 = arith.constant dense<0.000000e+00> : vector<8xf32>
    %225 = vector.multi_reduction <add>, %224, %cst_120 [1] : vector<8x3xf32> to vector<8xf32>
    %226 = vector.shape_cast %225 : vector<8xf32> to vector<8x1xf32>
    %cst_121 = arith.constant dense<0.000000e+00> : vector<1xf32>
    %227 = vector.multi_reduction <add>, %226, %cst_121 [0] : vector<8x1xf32> to vector<1xf32>
    %228 = vector.shape_cast %227 : vector<1xf32> to vector<1x1xf32>
    %cst_122 = arith.constant 0.000000e+00 : f32
    %229 = vector.broadcast %cst_122 : f32 to vector<1x1xf32>
    %230 = arith.subf %229, %228 : vector<1x1xf32>
    %cst_123 = arith.constant 1.250000e-01 : f32
    %231 = vector.broadcast %cst_123 : f32 to vector<1x1xf32>
    %232 = arith.mulf %230, %231 : vector<1x1xf32>
    %c0_124 = arith.constant 0 : index
    %c0_125 = arith.constant 0 : index
    %233 = vector.load %arg2[%c0_124, %c0_125] : memref<8x3xf32, #tpu.memory_space<vmem>>, vector<8x3xf32>
    %cst_126 = arith.constant dense<0.000000e+00> : vector<32x3xf32>
    %234 = tpu.matmul %184, %233, %cst_126 {dimension_numbers = #tpu.dot_dimension_numbers<[1], [0], [0], [1], [0, 0, 1, 1], [], []>} : vector<32x8xf32>, vector<8x3xf32>, vector<32x3xf32> -> vector<32x3xf32>
    %c0_127 = arith.constant 0 : index
    %c0_128 = arith.constant 0 : index
    %235 = vector.load %arg2[%c0_127, %c0_128] : memref<8x3xf32, #tpu.memory_space<vmem>>, vector<8x3xf32>
    %cst_129 = arith.constant dense<0.000000e+00> : vector<32x3xf32>
    %236 = tpu.matmul %185, %235, %cst_129 {dimension_numbers = #tpu.dot_dimension_numbers<[1], [0], [0], [1], [0, 0, 1, 1], [], []>} : vector<32x8xf32>, vector<8x3xf32>, vector<32x3xf32> -> vector<32x3xf32>
    %237 = arith.mulf %234, %236 : vector<32x3xf32>
    %cst_130 = arith.constant dense<0xFF800000> : vector<32xf32>
    %238 = vector.multi_reduction <maximumf>, %237, %cst_130 [1] : vector<32x3xf32> to vector<32xf32>
    %239 = vector.shape_cast %238 : vector<32xf32> to vector<32x1xf32>
    %240 = vector.extract_strided_slice %222 {offsets = [0, 1], sizes = [32, 1], strides = [1, 1]} : vector<32x2xf32> to vector<32x1xf32>
    %241 = arith.mulf %239, %240 : vector<32x1xf32>
    %cst_131 = arith.constant 1.000000e+00 : f32
    %242 = vector.broadcast %cst_131 : f32 to vector<32x1xf32>
    %243 = arith.subf %242, %239 : vector<32x1xf32>
    %244 = vector.extract_strided_slice %222 {offsets = [0, 0], sizes = [32, 1], strides = [1, 1]} : vector<32x2xf32> to vector<32x1xf32>
    %245 = arith.mulf %243, %244 : vector<32x1xf32>
    %246 = arith.addf %241, %245 : vector<32x1xf32>
    %cst_132 = arith.constant dense<0.000000e+00> : vector<32xf32>
    %247 = vector.multi_reduction <add>, %246, %cst_132 [1] : vector<32x1xf32> to vector<32xf32>
    %248 = vector.shape_cast %247 : vector<32xf32> to vector<32x1xf32>
    %cst_133 = arith.constant dense<0.000000e+00> : vector<1xf32>
    %249 = vector.multi_reduction <add>, %248, %cst_133 [0] : vector<32x1xf32> to vector<1xf32>
    %250 = vector.shape_cast %249 : vector<1xf32> to vector<1x1xf32>
    %cst_134 = arith.constant 0.000000e+00 : f32
    %251 = vector.broadcast %cst_134 : f32 to vector<1x1xf32>
    %252 = arith.subf %251, %250 : vector<1x1xf32>
    %cst_135 = arith.constant 3.125000e-02 : f32
    %253 = vector.broadcast %cst_135 : f32 to vector<1x1xf32>
    %254 = arith.mulf %252, %253 : vector<1x1xf32>
    %255 = arith.addf %232, %254 : vector<1x1xf32>
    %256 = vector.extract_strided_slice %219 {offsets = [0, 1], sizes = [32, 1], strides = [1, 1]} : vector<32x2xf32> to vector<32x1xf32>
    %c0_136 = arith.constant 0 : index
    %c0_137 = arith.constant 0 : index
    %257 = vector.load %arg7[%c0_136, %c0_137] : memref<8x32xf32, #tpu.memory_space<vmem>>, vector<8x32xf32>
    %cst_138 = arith.constant dense<0.000000e+00> : vector<32x3xf32>
    %258 = tpu.matmul %185, %180, %cst_138 {dimension_numbers = #tpu.dot_dimension_numbers<[1], [0], [0], [1], [0, 0, 1, 1], [], []>} : vector<32x8xf32>, vector<8x3xf32>, vector<32x3xf32> -> vector<32x3xf32>
    %259 = vector.broadcast %256 : vector<32x1xf32> to vector<32x3xf32>
    %260 = arith.mulf %259, %258 : vector<32x3xf32>
    %cst_139 = arith.constant dense<0.000000e+00> : vector<8x3xf32>
    %261 = tpu.matmul %257, %260, %cst_139 {dimension_numbers = #tpu.dot_dimension_numbers<[1], [0], [0], [1], [0, 0, 1, 1], [], []>} : vector<8x32xf32>, vector<32x3xf32>, vector<8x3xf32> -> vector<8x3xf32>
    %cst_140 = arith.constant dense<0.000000e+00> : vector<8xf32>
    %262 = vector.multi_reduction <add>, %261, %cst_140 [1] : vector<8x3xf32> to vector<8xf32>
    %263 = vector.shape_cast %262 : vector<8xf32> to vector<8x1xf32>
    %264 = vector.broadcast %263 : vector<8x1xf32> to vector<8x3xf32>
    %265 = arith.divf %261, %264 : vector<8x3xf32>
    %cst_141 = arith.constant 0.000000e+00 : f32
    %266 = vector.broadcast %cst_141 : f32 to vector<8x1xf32>
    %267 = vector.broadcast %255 : vector<1x1xf32> to vector<8x1xf32>
    %268 = arith.addf %266, %267 : vector<8x1xf32>
    %cst_142 = arith.constant 0.000000e+00 : f32
    %269 = vector.broadcast %cst_142 : f32 to vector<8x121xf32>
    %270 = tpu.concatenate %180, %265, %268, %269 in 1 : vector<8x3xf32>, vector<8x3xf32>, vector<8x1xf32>, vector<8x121xf32> -> vector<8x128xf32>
    %c0_143 = arith.constant 0 : index
    %c0_144 = arith.constant 0 : index
    %271 = vector.load %arg32[%c0_143, %c0_144] : memref<8x128xf32, #tpu.memory_space<vmem>>, vector<8x128xf32>
    tpu.vector_store %arg32[%c0_143, %c0_144], %270 {strides = array<i32>} : memref<8x128xf32, #tpu.memory_space<vmem>>, vector<8x128xf32>,
    return
  }
  func.func @transform_0(%arg0: i32) -> (i32, i32) {
    %c0_i32 = arith.constant 0 : i32
    %c0_i32_0 = arith.constant 0 : i32
    %c0_i32_1 = arith.constant 0 : i32
    return %c0_i32, %c0_i32_0 : i32, i32
  }
  func.func @transform_1(%arg0: i32) -> (i32, i32) {
    %c0_i32 = arith.constant 0 : i32
    %c0_i32_0 = arith.constant 0 : i32
    %c0_i32_1 = arith.constant 0 : i32
    return %c0_i32, %c0_i32_0 : i32, i32
  }
  func.func @transform_2(%arg0: i32) -> (i32, i32) {
    %c0_i32 = arith.constant 0 : i32
    %c0_i32_0 = arith.constant 0 : i32
    %c0_i32_1 = arith.constant 0 : i32
    return %c0_i32, %c0_i32_0 : i32, i32
  }
  func.func @transform_3(%arg0: i32) -> (i32, i32) {
    %c0_i32 = arith.constant 0 : i32
    %c0_i32_0 = arith.constant 0 : i32
    %c0_i32_1 = arith.constant 0 : i32
    return %c0_i32, %c0_i32_0 : i32, i32
  }
  func.func @transform_4(%arg0: i32) -> (i32, i32) {
    %c0_i32 = arith.constant 0 : i32
    %c0_i32_0 = arith.constant 0 : i32
    %c0_i32_1 = arith.constant 0 : i32
    return %c0_i32, %c0_i32_0 : i32, i32
  }
  func.func @transform_5(%arg0: i32) -> (i32, i32) {
    %c0_i32 = arith.constant 0 : i32
    %c0_i32_0 = arith.constant 0 : i32
    %c0_i32_1 = arith.constant 0 : i32
    return %c0_i32, %c0_i32_0 : i32, i32
  }
  func.func @transform_6(%arg0: i32) -> (i32, i32) {
    %c0_i32 = arith.constant 0 : i32
    %c0_i32_0 = arith.constant 0 : i32
    %c0_i32_1 = arith.constant 0 : i32
    return %c0_i32, %c0_i32_0 : i32, i32
  }
  func.func @transform_7(%arg0: i32) -> (i32, i32) {
    %c0_i32 = arith.constant 0 : i32
    %c0_i32_0 = arith.constant 0 : i32
    %c0_i32_1 = arith.constant 0 : i32
    return %c0_i32, %c0_i32_0 : i32, i32
  }
  func.func @transform_8(%arg0: i32) -> (i32, i32) {
    %c0_i32 = arith.constant 0 : i32
    %c0_i32_0 = arith.constant 0 : i32
    %c0_i32_1 = arith.constant 0 : i32
    return %c0_i32, %c0_i32_0 : i32, i32
  }
  func.func @transform_9(%arg0: i32) -> (i32, i32) {
    %c0_i32 = arith.constant 0 : i32
    %c0_i32_0 = arith.constant 0 : i32
    %c0_i32_1 = arith.constant 0 : i32
    return %c0_i32, %c0_i32_0 : i32, i32
  }
  func.func @transform_10(%arg0: i32) -> (i32, i32) {
    %c0_i32 = arith.constant 0 : i32
    %c0_i32_0 = arith.constant 0 : i32
    %c0_i32_1 = arith.constant 0 : i32
    return %c0_i32, %c0_i32_0 : i32, i32
  }
  func.func @transform_11(%arg0: i32) -> (i32, i32) {
    %c0_i32 = arith.constant 0 : i32
    %c0_i32_0 = arith.constant 0 : i32
    %c0_i32_1 = arith.constant 0 : i32
    return %c0_i32, %c0_i32_0 : i32, i32
  }
  func.func @transform_12(%arg0: i32) -> (i32, i32) {
    %c0_i32 = arith.constant 0 : i32
    %c0_i32_0 = arith.constant 0 : i32
    %c0_i32_1 = arith.constant 0 : i32
    return %c0_i32, %c0_i32_0 : i32, i32
  }
  func.func @transform_13(%arg0: i32) -> (i32, i32) {
    %c0_i32 = arith.constant 0 : i32
    %c0_i32_0 = arith.constant 0 : i32
    %c0_i32_1 = arith.constant 0 : i32
    return %c0_i32, %c0_i32_0 : i32, i32
  }
  func.func @transform_14(%arg0: i32) -> (i32, i32) {
    %c0_i32 = arith.constant 0 : i32
    %c0_i32_0 = arith.constant 0 : i32
    %c0_i32_1 = arith.constant 0 : i32
    return %c0_i32, %c0_i32_0 : i32, i32
  }
  func.func @transform_15(%arg0: i32) -> (i32, i32) {
    %c0_i32 = arith.constant 0 : i32
    %c0_i32_0 = arith.constant 0 : i32
    %c0_i32_1 = arith.constant 0 : i32
    return %c0_i32, %c0_i32_0 : i32, i32
  }
  func.func @transform_16(%arg0: i32) -> (i32, i32) {
    %c0_i32 = arith.constant 0 : i32
    %c0_i32_0 = arith.constant 0 : i32
    %c0_i32_1 = arith.constant 0 : i32
    return %c0_i32, %c0_i32_0 : i32, i32
  }
  func.func @transform_17(%arg0: i32) -> (i32, i32) {
    %c0_i32 = arith.constant 0 : i32
    %c0_i32_0 = arith.constant 0 : i32
    %c0_i32_1 = arith.constant 0 : i32
    return %c0_i32, %c0_i32_0 : i32, i32
  }
  func.func @transform_18(%arg0: i32) -> (i32, i32) {
    %c0_i32 = arith.constant 0 : i32
    %c0_i32_0 = arith.constant 0 : i32
    %c0_i32_1 = arith.constant 0 : i32
    return %c0_i32, %c0_i32_0 : i32, i32
  }
  func.func @transform_19(%arg0: i32) -> (i32, i32) {
    %c0_i32 = arith.constant 0 : i32
    %c0_i32_0 = arith.constant 0 : i32
    %c0_i32_1 = arith.constant 0 : i32
    return %c0_i32, %c0_i32_0 : i32, i32
  }
  func.func @transform_20(%arg0: i32) -> (i32, i32) {
    %c0_i32 = arith.constant 0 : i32
    %c0_i32_0 = arith.constant 0 : i32
    %c0_i32_1 = arith.constant 0 : i32
    return %c0_i32, %c0_i32_0 : i32, i32
  }
  func.func @transform_21(%arg0: i32) -> (i32, i32) {
    %c0_i32 = arith.constant 0 : i32
    %c0_i32_0 = arith.constant 0 : i32
    %c0_i32_1 = arith.constant 0 : i32
    return %c0_i32, %c0_i32_0 : i32, i32
  }
  func.func @transform_22(%arg0: i32) -> (i32, i32) {
    %c0_i32 = arith.constant 0 : i32
    %c0_i32_0 = arith.constant 0 : i32
    %c0_i32_1 = arith.constant 0 : i32
    return %c0_i32, %c0_i32_0 : i32, i32
  }
  func.func @transform_23(%arg0: i32) -> (i32, i32) {
    %c0_i32 = arith.constant 0 : i32
    %c0_i32_0 = arith.constant 0 : i32
    %c0_i32_1 = arith.constant 0 : i32
    return %c0_i32, %c0_i32_0 : i32, i32
  }
  func.func @transform_24(%arg0: i32) -> (i32, i32) {
    %c0_i32 = arith.constant 0 : i32
    %c0_i32_0 = arith.constant 0 : i32
    %c0_i32_1 = arith.constant 0 : i32
    return %c0_i32, %c0_i32_0 : i32, i32
  }
  func.func @transform_25(%arg0: i32) -> (i32, i32) {
    %c0_i32 = arith.constant 0 : i32
    %c0_i32_0 = arith.constant 0 : i32
    %c0_i32_1 = arith.constant 0 : i32
    return %c0_i32, %c0_i32_0 : i32, i32
  }
  func.func @transform_26(%arg0: i32) -> (i32, i32) {
    %c0_i32 = arith.constant 0 : i32
    %c0_i32_0 = arith.constant 0 : i32
    %c0_i32_1 = arith.constant 0 : i32
    return %c0_i32, %c0_i32_0 : i32, i32
  }
  func.func @transform_27(%arg0: i32) -> (i32, i32) {
    %c0_i32 = arith.constant 0 : i32
    %c0_i32_0 = arith.constant 0 : i32
    %c0_i32_1 = arith.constant 0 : i32
    return %c0_i32, %c0_i32_0 : i32, i32
  }
  func.func @transform_28(%arg0: i32) -> (i32, i32) {
    %c0_i32 = arith.constant 0 : i32
    %c0_i32_0 = arith.constant 0 : i32
    %c0_i32_1 = arith.constant 0 : i32
    return %c0_i32, %c0_i32_0 : i32, i32
  }
  func.func @transform_29(%arg0: i32) -> (i32, i32) {
    %c0_i32 = arith.constant 0 : i32
    %c0_i32_0 = arith.constant 0 : i32
    %c0_i32_1 = arith.constant 0 : i32
    return %c0_i32, %c0_i32_0 : i32, i32
  }
  func.func @transform_30(%arg0: i32) -> (i32, i32) {
    %c0_i32 = arith.constant 0 : i32
    %c0_i32_0 = arith.constant 0 : i32
    %c0_i32_1 = arith.constant 0 : i32
    return %c0_i32, %c0_i32_0 : i32, i32
  }
  func.func @transform_31(%arg0: i32) -> (i32, i32) {
    %c0_i32 = arith.constant 0 : i32
    %c0_i32_0 = arith.constant 0 : i32
    %c0_i32_1 = arith.constant 0 : i32
    return %c0_i32, %c0_i32_0 : i32, i32
  }
}

</mosaic_0001>

<bundles_post_ra>
// kernel: cl_model.2
= control target key start
LH: loop header
LB: loop body
LE: loop exit
PB: predicated region body
PF: predicated region fallthrough
CT: control target
= control target key end

     0   :  { %s4087_s0 = inlined_call_operand.vmem [shape: f32[8,16,4], index: 0, kind: input, shape index: {}]   ;;  %s4088_s1 = inlined_call_operand.vmem [shape: f32[16,32], index: 1, kind: input, shape index: {}]   ;;  %s4089_s2 = inlined_call_operand.vmem [shape: f32[1,32], index: 2, kind: input, shape index: {}]   ;;  %s4090_s3 = inlined_call_operand.vmem [shape: f32[1,32], index: 3, kind: input, shape index: {}]   ;;  %s4091_s4 = inlined_call_operand.vmem [shape: f32[1,32], index: 4, kind: input, shape index: {}]   ;;  %s4092_s5 = inlined_call_operand.vmem [shape: f32[128,32], index: 5, kind: input, shape index: {}]   ;;  %s4093_s6 = inlined_call_operand.vmem [shape: f32[1,32], index: 6, kind: input, shape index: {}]   ;;  %s4094_s7 = inlined_call_operand.vmem [shape: f32[1,32], index: 7, kind: input, shape index: {}]   ;;  %s4095_s8 = inlined_call_operand.vmem [shape: f32[1,32], index: 8, kind: input, shape index: {}]   ;;  %s4096_s9 = inlined_call_operand.vmem [shape: f32[32,96], index: 9, kind: input, shape index: {}]   ;;  %s4097_s10 = inlined_call_operand.vmem [shape: f32[1,96], index: 10, kind: input, shape index: {}]   ;;  %s4098_s11 = inlined_call_operand.vmem [shape: f32[32,32], index: 11, kind: input, shape index: {}]   ;;  %s4099_s12 = inlined_call_operand.vmem [shape: f32[1,32], index: 12, kind: input, shape index: {}]   ;;  %s4100_s13 = inlined_call_operand.vmem [shape: f32[1,32], index: 13, kind: input, shape index: {}]   ;;  %s4101_s14 = inlined_call_operand.vmem [shape: f32[1,32], index: 14, kind: input, shape index: {}]   ;;  %s4102_s15 = inlined_call_operand.vmem [shape: f32[32,32], index: 15, kind: input, shape index: {}]   ;;  %s4103_s16 = inlined_call_operand.vmem [shape: f32[1,32], index: 16, kind: input, shape index: {}]   ;;  %s4104_s17 = inlined_call_operand.vmem [shape: f32[32,32], index: 17, kind: input, shape index: {}]   ;;  %s4105_s18 = inlined_call_operand.vmem [shape: f32[1,32], index: 18, kind: input, shape index: {}]   ;;  %s4106_s19 = inlined_call_operand.vmem [shape: f32[1,32], index: 19, kind: input, shape index: {}]   ;;  %s4107_s20 = inlined_call_operand.vmem [shape: f32[1,32], index: 20, kind: input, shape index: {}]   ;;  %s4108_s21 = inlined_call_operand.vmem [shape: f32[8,1,32], index: 21, kind: output, shape index: {}]  }
   0x1   :  { %4111 = sst [smem:[#allocation3_spill]] %s4087_s0 }
   0x2   :  { %4112 = sst [smem:[#allocation4_spill]] %s4088_s1 }
   0x3   :  { %4113 = sst [smem:[#allocation5_spill]] %s4089_s2  ;;  %s3708_s2 = smov 0  }
   0x4   :  { %4114 = sst [smem:[#allocation6_spill]] %s4090_s3 }
   0x5   :  { %4115 = sst [smem:[#allocation7_spill]] %s4091_s4 }
   0x6   :  { %4116 = sst [smem:[#allocation8_spill]] %s4092_s5 }
   0x7 LB: > { %s3167_s25 = sadd.s32 4294967295, %s3579_s2   ;;  %p3171_p0 = scmp.ge.s32.totalorder %s3579_s2, 1  ;;  %s3579_s2 = sphi %s3708_s2, %s31_s2  }
   0x8   : > { %p587_p1 = scmp.lt.s32.totalorder %s3579_s2, 9 }
   0xa   : > { %p588_p2 = pnand %p3171_p0, %p587_p1 }
   0xb   : > { %p645_p3 = scmp.lt.s32.totalorder (!%p588_p2), %s3167_s25, 7  ;;  %s4117_s28 = sld [smem:[#allocation3_spill]] (!%p588_p2) }
   0xc   : > { %591 = sbr.rel (%p588_p2) target bundleno = 4379 (0x111b), region = 104  ;;  %s4118_s30 = sld [smem:[#allocation4_spill]] (!%p588_p2) }
   0xd   : > { %s4119_s24 = sld [smem:[#allocation5_spill]] (!%p588_p2)  ;;  %s3585_s27 = smov (!%p588_p2), 120  }
   0xe   : > { %s4120_s3 = sld [smem:[#allocation6_spill]] (!%p588_p2)  ;;  %s3590_s4 = smov (!%p588_p2), 64  }
   0xf   : > { %s4121_s0 = sld [smem:[#allocation7_spill]] (!%p588_p2)  ;;  %s3591_s5 = smov (!%p588_p2), 48  }
  0x10   : > { %s4122_s22 = sld [smem:[#allocation8_spill]] (!%p588_p2)  ;;  %s3592_s23 = smov (!%p588_p2), 40  }
  0x11   : > { %v660_v0 = vlaneseq  ;;  %v3581_v1 = vmov 0.0   ;;  %s4124_s25 = smov (!%p645_p3, %s3167_s25), 7  ;;  %vm3582_vm0 = vmmov 0   ;;  %vm669_vm2 = vcmask 130048   ;;  %s3593_s1 = smov 56  }
  0x12   : > { %3323 = vmatprep.subr.mxu0 %v3581_v1  ;;  %3330 = vmatprep.subr.mxu1 %v3581_v1  ;;  %s3236_s26 = sshll.u32 %s4124_s25, 4  ;;  %v655_v10 = vld [vmem:[%s4118_s30] sm:$0xff]  ;;  %vm825_vm4 = vcmask 1043456   ;;  %vm821_vm5 = vcmask 31744   ;;  %v656_v20 = vld [vmem:[%s4118_s30 + $0x8] sm:$0xff]  ;;  %vm1288_vm8 = vcmask 261120  }
  0x13   : > { %3327 = vmatprep.mubr.msk.f32.mxu0 %vm3582_vm0, %v3581_v1  ;;  %3334 = vmatprep.mubr.msk.f32.mxu1 %vm3582_vm0, %v3581_v1  ;;  %v661_v2 = vshrl.u32 %v660_v0, 7  ;;  %v663_v3 = vand.u32 127, %v660_v0  ;;  %s649_s29 = scalar_lea.vmem %s4117_s28, %s3236_s26  ;;  %v820_v11 = vrot.slane %v655_v10, 4  ;;  %v1204_v25 = vrot.slane %v656_v20, 4  ;;  %v3190_v35 = vld [vmem:[%s4119_s24] ss:$0 sm:$0xff] }
  0x14   : > { %v654_v5 = vld [vmem:[%s649_s29 + $0x8] sm:$0xff]  ;;  %v653_v6 = vld [vmem:[%s649_s29] sm:$0xff]  ;;  %vm1337_vm9 = vcmask 64512   ;;  %vm1927_vm10 = vcmask 257024   ;;  %s3583_s24 = smov 88   ;;  %s3584_s26 = smov 96  }
  0x15   : > { %v664_v4 = vmul.u32 2, %v661_v2  ;;  %3324 = vmatpush3.msra.mxu0 %v654_v5  ;;  %3331 = vmatpush3.msra.mxu1 %v654_v5  ;;  %v3191_v49 = vld [vmem:[%s4120_s3] ss:$0 sm:$0xff]  ;;  %s3586_s3 = smov 112   ;;  %s3587_s28 = smov 80   ;;  %vm2118_vm11 = vcmask 27648  }
  0x16   : > { %3325 = vmatprep.subr.mxu0 %v3581_v1  ;;  %3332 = vmatprep.subr.mxu1 %v3581_v1  ;;  %v3192_v51 = vld [vmem:[%s4121_s0] ss:$0 sm:$0xff]  ;;  %v1325_v55 = vld [vmem:[%s4122_s22 + $0x38] sm:$0xff]  ;;  %v1324_v57 = vld [vmem:[%s4122_s22 + $0x30] sm:$0xff]  ;;  %s3588_s29 = smov 104   ;;  %s3589_s0 = smov 72  }
  0x17   : > { %v665_v7 = vadd.s32 4294967295, %v664_v4  ;;  %vm743_vm1 = vcmp.eq.s32.totalorder %v663_v3, %v664_v4  ;;  %3326 = vmatpush3.msra.mxu0 %v653_v6  ;;  %3333 = vmatpush3.msra.mxu1 %v653_v6  ;;  %v973_v12 = vadd.s32 1, %v664_v4  ;;  %v1127_v13 = vadd.s32 2, %v664_v4  ;;  %v1321_v56 = vld [vmem:[%s4122_s22 + $0x18] sm:$0xff]  ;;  %v1320_v58 = vld [vmem:[%s4122_s22 + $0x10] sm:$0xff]  ;;  %v1323_v59 = vld [vmem:[%s4122_s22 + $0x28] sm:$0xff] }
  0x18   : > { %v3729_v8 = vsel %vm743_vm1, 1.0, %v3581_v1  ;;  %3337 = vmatprep.subr.mxu0 %v3581_v1  ;;  %3342 = vmatprep.subr.mxu1 %v3581_v1  ;;  %v1319_v60 = vld [vmem:[%s4122_s22 + $0x8] sm:$0xff]  ;;  %v1322_v61 = vld [vmem:[%s4122_s22 + $0x20] sm:$0xff]  ;;  %v1329_v2 = vld [vmem:[%s4122_s22 + $0x58] sm:$0xff]  ;;  %vm2207_vm12 = vcmask 60416   ;;  %vm2380_vm13 = vcmask 126016  }
  0x19   : > { %vm666_vm3 = vcmp.eq.s32.totalorder %v663_v3, %v665_v7  ;;  %3335 = vmatmul.mubr.msk.f32.vlgmr.msra.gmra.mxu1 %vm669_vm2, %v3729_v8  ;;  %vm974_vm6 = vcmp.eq.s32.totalorder %v663_v3, %v973_v12  ;;  %vm1128_vm7 = vcmp.eq.s32.totalorder %v663_v3, %v1127_v13  ;;  %v1318_v62 = vld [vmem:[%s4122_s22] sm:$0xff]  ;;  %v1333_v7 = vld [vmem:[%s4122_s22 + $0x78] sm:$0xff]  ;;  %vm2553_vm14 = vcmask 191616  }
  0x1a   : > { %v3734_v9 = vsel %vm666_vm3, 1.0, %v3581_v1  ;;  %3344 = vmatprep.mubr.msk.f32.mxu1 %vm3582_vm0, %v3581_v1  ;;  %3343 = vmatpush3.msk.msra.mxu1 %vm825_vm4, %v655_v10  ;;  %v3758_v17 = vsel %vm974_vm6, 1.0, %v3581_v1  ;;  %v3769_v19 = vsel %vm1128_vm7, 1.0, %v3581_v1  ;;  %v1331_v10 = vld [vmem:[%s4122_s22 + $0x68] sm:$0xff]  ;;  %vm2726_vm15 = vcmask 257216  }
  0x1b   : > { %3328 = vmatmul.mubr.msk.f32.vlgmr.msra.gmra.mxu0 %vm669_vm2, %v3734_v9  ;;  %3354 = vmatprep.subr.mxu1 %v3581_v1 }
  0x1c   : > { %3339 = vmatprep.mubr.msk.f32.mxu0 %vm3582_vm0, %v3581_v1  ;;  %3338 = vmatpush3.msk.msra.mxu0 %vm825_vm4, %v820_v11  ;;  %v1330_v11 = vld [vmem:[%s4122_s22 + $0x60] sm:$0xff] }
  0x1d   : > { %3347 = vmatprep.subr.mxu0 %v3581_v1 }
  0xd9   : > { %v815_v15 = vpop.f32.mrf.mxu1 }
  0xda   : > { %3340 = vmatmul.mubr.msk.f32.vlgmr.msra.gmra.mxu0 %vm821_vm5, %v815_v15 }
  0xdb   : > { %v739_v14 = vpop.f32.mrf.mxu0  ;;  %v3336_v16 = vpop.f32.mrf.mxu1  ;;  %3348 = vmatpush3.msra.mxu0 %v654_v5  ;;  %3351 = vmatprep.mubr.msk.f32.mxu0 %vm3582_vm0, %v3581_v1 }
  0xdc   : > { %3345 = vmatmul.mubr.msk.f32.vlgmr.msra.gmra.mxu1 %vm821_vm5, %v739_v14  ;;  %3349 = vmatprep.subr.mxu0 %v3581_v1 }
  0xdd   : > { %v3329_v18 = vpop.f32.mrf.mxu0  ;;  %3356 = vmatprep.mubr.msk.f32.mxu1 %vm3582_vm0, %v3581_v1  ;;  %3350 = vmatpush3.msra.mxu0 %v653_v6 }
  0xde   : > { %3352 = vmatmul.mubr.msk.f32.vlgmr.msra.gmra.mxu0 %vm669_vm2, %v3758_v17  ;;  %3359 = vmatprep.subr.mxu0 %v3581_v1 }
  0xdf   : > { %3360 = vmatpush3.msra.mxu0 %v654_v5  ;;  %3363 = vmatprep.mubr.msk.f32.mxu0 %vm3582_vm0, %v3581_v1  ;;  %v1328_v5 = vld [vmem:[%s4122_s22 + $0x50] sm:$0xff] }
  0xe0   : > { %3361 = vmatprep.subr.mxu0 %v3581_v1  ;;  %3355 = vmatpush3.msk.msra.mxu1 %vm825_vm4, %v656_v20 }
  0xe1   : > { %3362 = vmatpush3.msra.mxu0 %v653_v6  ;;  %3366 = vmatprep.subr.mxu1 %v3581_v1  ;;  %v1327_v6 = vld [vmem:[%s4122_s22 + $0x48] sm:$0xff] }
  0xe2   : > { %3364 = vmatmul.mubr.msk.f32.vlgmr.msra.gmra.mxu0 %vm669_vm2, %v3769_v19  ;;  %3371 = vmatprep.subr.mxu0 %v3581_v1 }
  0xe3   : > { %3373 = vmatprep.mubr.msk.f32.mxu0 %vm3582_vm0, %v3581_v1 }
 0x19a   : > { %v894_v21 = vpop.f32.mrf.mxu0 }
 0x19c   : > { %v969_v22 = vpop.f32.mrf.mxu1  ;;  %v3341_v24 = vpop.f32.mrf.mxu0 }
 0x19d   : > { %v970_v23 = vadd.f32 %v969_v22, %v894_v21 }
 0x19e   : > { %v3346_v26 = vpop.f32.mrf.mxu1  ;;  %v1046_v27 = vpop.f32.mrf.mxu0 }
 0x19f   : > { %3357 = vmatmul.mubr.msk.f32.vlgmr.msra.gmra.mxu1 %vm821_vm5, %v1046_v27 }
 0x1a0   : > { %v3353_v28 = vpop.f32.mrf.mxu0  ;;  %3367 = vmatpush3.msk.msra.mxu1 %vm825_vm4, %v1204_v25  ;;  %3368 = vmatprep.mubr.msk.f32.mxu1 %vm3582_vm0, %v3581_v1  ;;  %v3201_v25 = vld [vmem:[%s4093_s6] ss:$0 sm:$0xff] }
 0x1a1   : > { %3376 = vmatprep.subr.mxu1 %v3581_v1 }
 0x1a2   : > { %v1200_v29 = vpop.f32.mrf.mxu0 }
 0x1a3   : > { %3369 = vmatmul.mubr.msk.f32.vlgmr.msra.gmra.mxu1 %vm821_vm5, %v1200_v29 }
 0x1a4   : > { %v3365_v30 = vpop.f32.mrf.mxu0  ;;  %3378 = vmatprep.mubr.msk.f32.mxu1 %vm3582_vm0, %v3581_v1 }
 0x25f   : > { %v1122_v31 = vpop.f32.mrf.mxu1 }
 0x260   : > { %v1126_v33 = vadd.f32 %v1122_v31, %v970_v23 }
 0x261   : > { %v3358_v32 = vpop.f32.mrf.mxu1 }
 0x263   : > { %v1276_v34 = vpop.f32.mrf.mxu1 }
 0x264   : > { %v1280_v36 = vadd.f32 %v1276_v34, %v1126_v33 }
 0x265   : > { %v3370_v37 = vpop.f32.mrf.mxu1 }
 0x266   : > { %v1287_v38 = vadd.f32 %v3190_v35, %v1280_v36  ;;  %v1959_v35 = vld [vmem:[%s4096_s9 + $0x18] sm:$0xff]  ;;  %v1958_v36 = vld [vmem:[%s4096_s9 + $0x10] sm:$0xff]  ;;  %v1957_v37 = vld [vmem:[%s4096_s9 + $0x8] sm:$0xff] }
 0x268   : > { %v1289_v39 = vsel %vm1288_vm8, %v1287_v38, 0.0 }
 0x269   : > { %1290 = vadd.xlane.f32.xlu0 %v1289_v39 }
 0x2f2   : > { %v1291_v40 = vpop.xlane.xlu0 %1290 }
 0x2f3   : > { %v1293_v41 = vmul.f32 0.03125, %v1291_v40 }
 0x2f5   : > { %v1294_v42 = vsub.f32 %v1287_v38, %v1293_v41  ;;  %v1956_v38 = vld [vmem:[%s4096_s9] sm:$0xff] }
 0x2f7   : > { %v1295_v43 = vmul.f32 %v1294_v42, %v1294_v42 }
 0x2f9   : > { %v1296_v44 = vsel %vm1288_vm8, %v1295_v43, 0.0  ;;  %v3202_v43 = vld [vmem:[%s4094_s7] ss:$0 sm:$0xff] }
 0x2fa   : > { %1297 = vadd.xlane.f32.xlu0 %v1296_v44 }
 0x383   : > { %v1298_v45 = vpop.xlane.xlu0 %1297 }
 0x384   : > { %v1299_v46 = vmul.f32 0.032258064, %v1298_v45  ;;  %v3203_v45 = vld [vmem:[%s4095_s8] ss:$0 sm:$0xff] }
 0x386   : > { %v1300_v47 = vadd.f32 1e-05, %v1299_v46 }
 0x388   : > { %3549 = vrsqrt.f32 %v1300_v47 }
 0x395   : > { %v3550_v48 = vpop.eup %3549 }
 0x396   : > { %v1302_v50 = vmul.f32 %v3550_v48, %v1294_v42 }
 0x398   : > { %v1309_v52 = vmul.f32 %v3191_v49, %v1302_v50  ;;  %v3204_v49 = vld [vmem:[%s4097_s10] ss:$0 sm:$0xff] }
 0x39a   : > { %v1316_v53 = vadd.f32 %v3192_v51, %v1309_v52 }
 0x39c   : > { %v1317_v54 = vmax.f32 %v1316_v53, 0.0 }
 0x39e   : > { %3372 = vmatpush3.msra.mxu0 %v1317_v54  ;;  %3377 = vmatpush3.msra.mxu1 %v1317_v54 }
 0x39f   : > { %3374 = vmatmul.mubr.msk.f32.vlgmr.msra.gmra.mxu0 %vm1337_vm9, %v3734_v9  ;;  %3379 = vmatmul.mubr.msk.f32.vlgmr.msra.gmra.mxu1 %vm1337_vm9, %v3729_v8  ;;  %v1326_v8 = vld [vmem:[%s4122_s22 + $0x40] sm:$0xff]  ;;  %v1332_v9 = vld [vmem:[%s4122_s22 + $0x70] sm:$0xff] }
 0x3a0   : > { %3381 = vmatprep.subr.mxu0 %v3581_v1  ;;  %3392 = vmatprep.subr.mxu1 %v3581_v1 }
 0x3a1   : > { %3382 = vmatpush3.msra.mxu0 %v1325_v55  ;;  %3393 = vmatpush3.msra.mxu1 %v1321_v56 }
 0x3a2   : > { %3383 = vmatprep.subr.mxu0 %v3581_v1  ;;  %3394 = vmatprep.subr.mxu1 %v3581_v1 }
 0x3a3   : > { %3384 = vmatpush3.msra.mxu0 %v1324_v57  ;;  %3395 = vmatpush3.msra.mxu1 %v1320_v58 }
 0x3a4   : > { %3385 = vmatprep.subr.mxu0 %v3581_v1  ;;  %3396 = vmatprep.subr.mxu1 %v3581_v1 }
 0x3a5   : > { %3386 = vmatpush3.msra.mxu0 %v1323_v59  ;;  %3397 = vmatpush3.msra.mxu1 %v1319_v60 }
 0x3a6   : > { %3387 = vmatprep.subr.mxu0 %v3581_v1  ;;  %3398 = vmatprep.subr.mxu1 %v3581_v1 }
 0x3a7   : > { %3388 = vmatpush3.msra.mxu0 %v1322_v61  ;;  %3389 = vmatprep.mubr.msk.f32.mxu0 %vm3582_vm0, %v3581_v1 }
 0x3a8   : > { %3400 = vmatprep.mubr.msk.f32.mxu1 %vm3582_vm0, %v3581_v1  ;;  %3403 = vmatprep.subr.mxu0 %v3581_v1 }
 0x3a9   : > { %3399 = vmatpush3.msra.mxu1 %v1318_v62 }
 0x3aa   : > { %3408 = vmatprep.subr.mxu1 %v3581_v1 }
 0x45f   : > { %v1406_v63 = vpop.f32.mrf.mxu0  ;;  %v1478_v0 = vpop.f32.mrf.mxu1 }
 0x460   : > { %3390 = vmatmul.mubr.msk.f32.vlgmr.msra.gmra.mxu0 %vm1288_vm8, %v1478_v0  ;;  %3401 = vmatmul.mubr.msk.f32.vlgmr.msra.gmra.mxu1 %vm1288_vm8, %v1406_v63 }
 0x461   : > { %3404 = vmatpush3.msra.mxu0 %v1317_v54  ;;  %v3380_v3 = vpop.f32.mrf.mxu1  ;;  %3405 = vmatprep.mubr.msk.f32.mxu0 %vm3582_vm0, %v3581_v1  ;;  %v3375_v4 = vpop.f32.mrf.mxu0 }
 0x462   : > { %3419 = vmatprep.subr.mxu0 %v3581_v1  ;;  %3409 = vmatpush3.msra.mxu1 %v1329_v2 }
 0x463   : > { %3410 = vmatprep.subr.mxu1 %v3581_v1  ;;  %3416 = vmatprep.mubr.msk.f32.mxu1 %vm3582_vm0, %v3581_v1 }
 0x464   : > { %3406 = vmatmul.mubr.msk.f32.vlgmr.msra.gmra.mxu0 %vm1337_vm9, %v3758_v17  ;;  %3411 = vmatpush3.msra.mxu1 %v1328_v5 }
 0x465   : > { %3420 = vmatpush3.msra.mxu0 %v1317_v54  ;;  %3421 = vmatprep.mubr.msk.f32.mxu0 %vm3582_vm0, %v3581_v1 }
 0x466   : > { %3424 = vmatprep.subr.mxu0 %v3581_v1  ;;  %3412 = vmatprep.subr.mxu1 %v3581_v1 }
 0x467   : > { %3413 = vmatpush3.msra.mxu1 %v1327_v6 }
 0x468   : > { %3422 = vmatmul.mubr.msk.f32.vlgmr.msra.gmra.mxu0 %vm1337_vm9, %v3769_v19  ;;  %3414 = vmatprep.subr.mxu1 %v3581_v1 }
 0x469   : > { %3432 = vmatprep.mubr.msk.f32.mxu0 %vm3582_vm0, %v3581_v1  ;;  %3425 = vmatpush3.msra.mxu0 %v1333_v7 }
 0x46a   : > { %3426 = vmatprep.subr.mxu0 %v3581_v1  ;;  %3415 = vmatpush3.msra.mxu1 %v1326_v8 }
 0x46b   : > { %3427 = vmatpush3.msra.mxu0 %v1332_v9  ;;  %3435 = vmatprep.subr.mxu1 %v3581_v1 }
 0x46c   : > { %3428 = vmatprep.subr.mxu0 %v3581_v1 }
 0x46d   : > { %3429 = vmatpush3.msra.mxu0 %v1331_v10 }
 0x46e   : > { %3430 = vmatprep.subr.mxu0 %v3581_v1 }
 0x46f   : > { %3431 = vmatpush3.msra.mxu0 %v1330_v11 }
 0x470   : > { %3446 = vmatprep.subr.mxu0 %v3581_v1 }
 0x520   : > { %v1551_v12 = vpop.f32.mrf.mxu0  ;;  %v1624_v13 = vpop.f32.mrf.mxu1 }
 0x521   : > { %v1625_v14 = vadd.f32 %v1624_v13, %v1551_v12 }
 0x522   : > { %v3391_v15 = vpop.f32.mrf.mxu0  ;;  %v3402_v16 = vpop.f32.mrf.mxu1 }
 0x524   : > { %v1696_v17 = vpop.f32.mrf.mxu0 }
 0x525   : > { %3417 = vmatmul.mubr.msk.f32.vlgmr.msra.gmra.mxu1 %vm1288_vm8, %v1696_v17 }
 0x526   : > { %v3407_v18 = vpop.f32.mrf.mxu0  ;;  %3443 = vmatprep.mubr.msk.f32.mxu1 %vm3582_vm0, %v3581_v1  ;;  %3436 = vmatpush3.msra.mxu1 %v1959_v35 }
 0x527   : > { %3437 = vmatprep.subr.mxu1 %v3581_v1 }
 0x528   : > { %v1842_v19 = vpop.f32.mrf.mxu0  ;;  %3438 = vmatpush3.msra.mxu1 %v1958_v36 }
 0x529   : > { %3433 = vmatmul.mubr.msk.f32.vlgmr.msra.gmra.mxu0 %vm1288_vm8, %v1842_v19  ;;  %3439 = vmatprep.subr.mxu1 %v3581_v1 }
 0x52a   : > { %v3423_v20 = vpop.f32.mrf.mxu0  ;;  %3448 = vmatprep.mubr.msk.f32.mxu0 %vm3582_vm0, %v3581_v1  ;;  %3440 = vmatpush3.msra.mxu1 %v1957_v37 }
 0x52b   : > { %3441 = vmatprep.subr.mxu1 %v3581_v1 }
 0x52c   : > { %3442 = vmatpush3.msra.mxu1 %v1956_v38 }
 0x52d   : > { %3451 = vmatprep.subr.mxu1 %v3581_v1 }
 0x5e5   : > { %v1769_v21 = vpop.f32.mrf.mxu1 }
 0x5e6   : > { %v1773_v23 = vadd.f32 %v1769_v21, %v1625_v14 }
 0x5e7   : > { %v3418_v22 = vpop.f32.mrf.mxu1 }
 0x5e9   : > { %v1915_v24 = vpop.f32.mrf.mxu0 }
 0x5ea   : > { %v1919_v26 = vadd.f32 %v1915_v24, %v1773_v23 }
 0x5eb   : > { %v3434_v27 = vpop.f32.mrf.mxu0 }
 0x5ec   : > { %v1926_v28 = vadd.f32 %v3201_v25, %v1919_v26 }
 0x5ee   : > { %v1928_v29 = vsel %vm1927_vm10, %v1926_v28, 0.0 }
 0x5ef   : > { %1929 = vadd.xlane.f32.xlu1 %v1928_v29 }
 0x678   : > { %v1930_v30 = vpop.xlane.xlu1 %1929 }
 0x679   : > { %v1931_v31 = vmul.f32 0.03125, %v1930_v30 }
 0x67b   : > { %v1932_v32 = vsub.f32 %v1926_v28, %v1931_v31 }
 0x67d   : > { %v1933_v33 = vmul.f32 %v1932_v32, %v1932_v32 }
 0x67f   : > { %v1934_v34 = vsel %vm1927_vm10, %v1933_v33, 0.0 }
 0x680   : > { %1935 = vadd.xlane.f32.xlu1 %v1934_v34 }
 0x709   : > { %v1936_v39 = vpop.xlane.xlu1 %1935 }
 0x70a   : > { %v1937_v40 = vmul.f32 0.032258064, %v1936_v39 }
 0x70c   : > { %v1938_v41 = vadd.f32 1e-05, %v1937_v40 }
 0x70e   : > { %3551 = vrsqrt.f32 %v1938_v41 }
 0x71b   : > { %v3552_v42 = vpop.eup %3551 }
 0x71c   : > { %v1940_v44 = vmul.f32 %v3552_v42, %v1932_v32 }
 0x71e   : > { %v1947_v46 = vmul.f32 %v3202_v43, %v1940_v44 }
 0x720   : > { %v3924_v47 = vadd.f32 %v3203_v45, %v1947_v46 }
 0x722   : > { %v1955_v48 = vmax.f32 %v3924_v47, 0.0  ;;  %v2845_v47 = vld [vmem:[%s4102_s15 + $0x10] sm:$0xff] }
 0x724   : > { %3444 = vmatmul.mubr.msk.f32.vlgmr.msra.gmra.mxu1 %vm1288_vm8, %v1955_v48 }
 0x725   : > { %3453 = vmatprep.mubr.msk.f32.mxu1 %vm3582_vm0, %v3581_v1 }
 0x7e4   : > { %v2036_v50 = vpop.f32.mrf.mxu1 }
 0x7e5   : > { %v3935_v51 = vadd.f32 %v3204_v49, %v2036_v50 }
 0x7e6   : > { %v3445_v52 = vpop.f32.mrf.mxu1 }
 0x7e7   : > { %2211 = vrot.lane.b32.xlu1 %v3935_v51, %s3583_s24  ;;  %2041 = vrot.lane.b32.xlu0 %v3935_v51, %s3584_s26  ;;  %v2732_v52 = vld [vmem:[%s4098_s11 + $0x18] sm:$0xff] }
 0x7eb   : > { %2209 = vrot.lane.b32.xlu1 %v3935_v51, %s3585_s27  ;;  %2382 = vrot.lane.b32.xlu0 %v3935_v51, %s3586_s3 }
 0x7ef   : > { %2384 = vrot.lane.b32.xlu1 %v3935_v51, %s3587_s28  ;;  %2555 = vrot.lane.b32.xlu0 %v3935_v51, %s3588_s29 }
 0x7f3   : > { %2557 = vrot.lane.b32.xlu1 %v3935_v51, %s3589_s0 }
 0x859   : > { %v2212_v53 = vpop.permute.xlu1 %2211  ;;  %v2042_v54 = vpop.permute.xlu0 %2041 }
 0x85a   : > { %3447 = vmatpush3.xpose.msk.msra.mxu0 %vm1337_vm9, %v2042_v54 }
 0x85b   : > { %3456 = vmatprep.subr.mxu0 %v3581_v1 }
 0x85d   : > { %v2210_v55 = vpop.permute.xlu1 %2209  ;;  %3449 = vmatmul.mubr.msk.f32.vlgmr.msra.gmra.mxu0 %vm1337_vm9, %v3935_v51  ;;  %v2383_v57 = vpop.permute.xlu0 %2382 }
 0x85e   : > { %3457 = vmatpush3.xpose.msk.msra.mxu0 %vm1337_vm9, %v2212_v53  ;;  %3458 = vmatprep.mubr.msk.f32.mxu0 %vm3582_vm0, %v3581_v1  ;;  %v2731_v53 = vld [vmem:[%s4098_s11 + $0x10] sm:$0xff] }
 0x85f   : > { %3466 = vmatprep.subr.mxu0 %v3581_v1 }
 0x861   : > { %v2385_v56 = vpop.permute.xlu1 %2384  ;;  %3459 = vmatmul.mubr.msk.f32.vlgmr.msra.gmra.mxu0 %vm1337_vm9, %v2210_v55  ;;  %v2556_v59 = vpop.permute.xlu0 %2555  ;;  %v2730_v55 = vld [vmem:[%s4098_s11 + $0x8] sm:$0xff] }
 0x862   : > { %3467 = vmatpush3.xpose.msk.msra.mxu0 %vm1337_vm9, %v2385_v56  ;;  %3468 = vmatprep.mubr.msk.f32.mxu0 %vm3582_vm0, %v3581_v1 }
 0x863   : > { %3476 = vmatprep.subr.mxu0 %v3581_v1 }
 0x865   : > { %v2558_v58 = vpop.permute.xlu1 %2557  ;;  %3469 = vmatmul.mubr.msk.f32.vlgmr.msra.gmra.mxu0 %vm1337_vm9, %v2383_v57  ;;  %v2729_v57 = vld [vmem:[%s4098_s11] sm:$0xff] }
 0x866   : > { %3477 = vmatpush3.xpose.msk.msra.mxu0 %vm1337_vm9, %v2558_v58  ;;  %3478 = vmatprep.mubr.msk.f32.mxu0 %vm3582_vm0, %v3581_v1 }
 0x867   : > { %3486 = vmatprep.subr.mxu0 %v3581_v1 }
 0x869   : > { %3479 = vmatmul.mubr.msk.f32.vlgmr.msra.gmra.mxu0 %vm1337_vm9, %v2556_v59 }
 0x86a   : > { %3494 = vmatprep.mubr.msk.f32.mxu0 %vm3582_vm0, %v3581_v1  ;;  %3487 = vmatpush3.msra.mxu0 %v2732_v52 }
 0x86b   : > { %3488 = vmatprep.subr.mxu0 %v3581_v1 }
 0x86c   : > { %3489 = vmatpush3.msra.mxu0 %v2731_v53  ;;  %v3231_v53 = vld [vmem:[%s4107_s20] ss:$0 sm:$0xff] }
 0x86d   : > { %3490 = vmatprep.subr.mxu0 %v3581_v1 }
 0x86e   : > { %3491 = vmatpush3.msra.mxu0 %v2730_v55 }
 0x86f   : > { %3492 = vmatprep.subr.mxu0 %v3581_v1 }
 0x870   : > { %3493 = vmatpush3.msra.mxu0 %v2729_v57 }
 0x871   : > { %3508 = vmatprep.subr.mxu0 %v3581_v1 }
 0x91d   : > { %v2113_v60 = vpop.f32.mrf.mxu0 }
 0x91e   : > { %v2117_v61 = vmul.f32 0.35355338, %v2113_v60 }
 0x91f   : > { %v3450_v62 = vpop.f32.mrf.mxu0 }
 0x920   : > { %v2119_v63 = vsel %vm2118_vm11, %v2117_v61, -inf }
 0x921   : > { %2120 = vmax.xlane.f32.xlu1 %v2119_v63  ;;  %v2283_v0 = vpop.f32.mrf.mxu0 }
 0x922   : > { %v2287_v2 = vmul.f32 0.35355338, %v2283_v0 }
 0x923   : > { %v3460_v3 = vpop.f32.mrf.mxu0 }
 0x924   : > { %v2288_v4 = vsel %vm2118_vm11, %v2287_v2, -inf }
 0x925   : > { %2289 = vmax.xlane.f32.xlu0 %v2288_v4  ;;  %v2456_v5 = vpop.f32.mrf.mxu0  ;;  %v3222_v4 = vld [vmem:[%s4099_s12] ss:$0 sm:$0xff] }
 0x926   : > { %v2460_v6 = vmul.f32 0.35355338, %v2456_v5 }
 0x927   : > { %v3470_v7 = vpop.f32.mrf.mxu0 }
 0x928   : > { %v2461_v8 = vsel %vm2118_vm11, %v2460_v6, -inf }
 0x929   : > { %2462 = vmax.xlane.f32.xlu0 %v2461_v8  ;;  %v2629_v9 = vpop.f32.mrf.mxu0 }
 0x92a   : > { %v2633_v10 = vmul.f32 0.35355338, %v2629_v9 }
 0x92b   : > { %v3480_v11 = vpop.f32.mrf.mxu0 }
 0x92c   : > { %v2634_v12 = vsel %vm2118_vm11, %v2633_v10, -inf }
 0x92d   : > { %2635 = vmax.xlane.f32.xlu0 %v2634_v12 }
 0x932   : > { %2130 = vrot.lane.b32.xlu1 %v3935_v51, %s3590_s4 }
 0x9aa   : > { %v2121_v13 = vpop.xlane.xlu1 %2120 }
 0x9ab   : > { %v2122_v14 = vsub.f32 %v2117_v61, %v2121_v13 }
 0x9ad   : > { %v2123_v15 = vmul.f32 1.442695, %v2122_v14 }
 0x9ae   : > { %v2131_v16 = vpop.permute.xlu1 %2130  ;;  %v2290_v17 = vpop.xlane.xlu0 %2289 }
 0x9af   : > { %3553 = vpow2.f32 %v2123_v15  ;;  %v2291_v18 = vsub.f32 %v2287_v2, %v2290_v17  ;;  %3452 = vmatpush3.msk.msra.mxu1 %vm825_vm4, %v2131_v16  ;;  %v2846_v15 = vld [vmem:[%s4102_s15 + $0x18] sm:$0xff]  ;;  %v2843_v16 = vld [vmem:[%s4102_s15] sm:$0xff] }
 0x9b0   : > { %3461 = vmatprep.subr.mxu1 %v3581_v1  ;;  %v2931_v17 = vld [vmem:[%s4104_s17 + $0x18] sm:$0xff] }
 0x9b1   : > { %v2292_v19 = vmul.f32 1.442695, %v2291_v18 }
 0x9b2   : > { %v2463_v20 = vpop.xlane.xlu0 %2462 }
 0x9b3   : > { %3555 = vpow2.f32 %v2292_v19  ;;  %v2464_v21 = vsub.f32 %v2460_v6, %v2463_v20 }
 0x9b5   : > { %v2465_v22 = vmul.f32 1.442695, %v2464_v21 }
 0x9b6   : > { %v2636_v23 = vpop.xlane.xlu0 %2635 }
 0x9b7   : > { %3557 = vpow2.f32 %v2465_v22  ;;  %v2637_v24 = vsub.f32 %v2633_v10, %v2636_v23  ;;  %v3224_v22 = vld [vmem:[%s4100_s13] ss:$0 sm:$0xff] }
 0x9b9   : > { %v2638_v25 = vmul.f32 1.442695, %v2637_v24  ;;  %v3225_v24 = vld [vmem:[%s4101_s14] ss:$0 sm:$0xff] }
 0x9bb   : > { %3559 = vpow2.f32 %v2638_v25 }
 0x9bc   : > { %v3554_v26 = vpop.eup %3553 }
 0x9bd   : > { %v2125_v27 = vsel %vm2118_vm11, %v3554_v26, 0.0 }
 0x9be   : > { %2126 = vadd.xlane.f32.xlu1 %v2125_v27  ;;  %v2930_v27 = vld [vmem:[%s4104_s17 + $0x10] sm:$0xff] }
 0x9c0   : > { %v3556_v28 = vpop.eup %3555 }
 0x9c1   : > { %v2294_v29 = vsel %vm2118_vm11, %v3556_v28, 0.0 }
 0x9c2   : > { %2295 = vadd.xlane.f32.xlu0 %v2294_v29  ;;  %v2928_v29 = vld [vmem:[%s4104_s17] sm:$0xff] }
 0x9c4   : > { %v3558_v30 = vpop.eup %3557 }
 0x9c5   : > { %v2467_v31 = vsel %vm2118_vm11, %v3558_v30, 0.0 }
 0x9c6   : > { %2468 = vadd.xlane.f32.xlu1 %v2467_v31 }
 0x9c8   : > { %v3560_v32 = vpop.eup %3559 }
 0x9c9   : > { %v2640_v33 = vsel %vm2118_vm11, %v3560_v32, 0.0 }
 0x9ca   : > { %2641 = vadd.xlane.f32.xlu0 %v2640_v33 }
 0x9d7   : > { %2472 = vrot.lane.b32.xlu1 %v3935_v51, %s3591_s5  ;;  %s3594_s5 = smov 8  }
 0x9db   : > { %2645 = vrot.lane.b32.xlu1 %v3935_v51, %s3592_s23  ;;  %s3595_s23 = smov 16  }
 0x9e0   : > { %2299 = vrot.lane.b32.xlu0 %v3935_v51, %s3593_s1  ;;  %s3596_s1 = smov 24  }
 0xa47   : > { %v2127_v34 = vpop.xlane.xlu1 %2126 }
 0xa48   : > { %3561 = vrcp.f32 %v2127_v34 }
 0xa4b   : > { %v2296_v35 = vpop.xlane.xlu0 %2295 }
 0xa4c   : > { %3563 = vrcp.f32 %v2296_v35  ;;  %v3228_v35 = vld [vmem:[%s4105_s18] ss:$0 sm:$0xff] }
 0xa4f   : > { %v2469_v36 = vpop.xlane.xlu1 %2468 }
 0xa50   : > { %3565 = vrcp.f32 %v2469_v36 }
 0xa53   : > { %v2642_v37 = vpop.xlane.xlu0 %2641  ;;  %v2473_v42 = vpop.permute.xlu1 %2472 }
 0xa54   : > { %3567 = vrcp.f32 %v2642_v37 }
 0xa55   : > { %v3562_v38 = vpop.eup %3561 }
 0xa56   : > { %v2129_v39 = vmul.f32 %v3562_v38, %v3554_v26 }
 0xa57   : > { %v2300_v40 = vpop.permute.xlu0 %2299  ;;  %v2646_v46 = vpop.permute.xlu1 %2645 }
 0xa58   : > { %3454 = vmatmul.mubr.msk.f32.vlgmr.msra.gmra.mxu1 %vm821_vm5, %v2129_v39 }
 0xa59   : > { %v3564_v41 = vpop.eup %3563  ;;  %3462 = vmatpush3.msk.msra.mxu1 %vm825_vm4, %v2300_v40  ;;  %3463 = vmatprep.mubr.msk.f32.mxu1 %vm3582_vm0, %v3581_v1 }
 0xa5a   : > { %3471 = vmatprep.subr.mxu1 %v3581_v1  ;;  %v2298_v43 = vmul.f32 %v3564_v41, %v3556_v28  ;;  %v2929_v28 = vld [vmem:[%s4104_s17 + $0x8] sm:$0xff] }
 0xa5c   : > { %3464 = vmatmul.mubr.msk.f32.vlgmr.msra.gmra.mxu1 %vm821_vm5, %v2298_v43 }
 0xa5d   : > { %v3566_v44 = vpop.eup %3565  ;;  %3472 = vmatpush3.msk.msra.mxu1 %vm825_vm4, %v2473_v42  ;;  %3473 = vmatprep.mubr.msk.f32.mxu1 %vm3582_vm0, %v3581_v1 }
 0xa5e   : > { %3481 = vmatprep.subr.mxu1 %v3581_v1  ;;  %v2471_v45 = vmul.f32 %v3566_v44, %v3558_v30  ;;  %v3226_v30 = vld [vmem:[%s4103_s16] ss:$0 sm:$0xff] }
 0xa60   : > { %3474 = vmatmul.mubr.msk.f32.vlgmr.msra.gmra.mxu1 %vm821_vm5, %v2471_v45 }
 0xa61   : > { %v3568_v49 = vpop.eup %3567  ;;  %3482 = vmatpush3.msk.msra.mxu1 %vm825_vm4, %v2646_v46  ;;  %3483 = vmatprep.mubr.msk.f32.mxu1 %vm3582_vm0, %v3581_v1 }
 0xa62   : > { %v2644_v50 = vmul.f32 %v3568_v49, %v3560_v32  ;;  %3497 = vmatprep.subr.mxu1 %v3581_v1 }
 0xa64   : > { %3484 = vmatmul.mubr.msk.f32.vlgmr.msra.gmra.mxu1 %vm821_vm5, %v2644_v50 }
 0xa65   : > { %3505 = vmatprep.mubr.msk.f32.mxu1 %vm3582_vm0, %v3581_v1  ;;  %3498 = vmatpush3.msra.mxu1 %v2846_v15 }
 0xa66   : > { %3499 = vmatprep.subr.mxu1 %v3581_v1 }
 0xa67   : > { %3500 = vmatpush3.msra.mxu1 %v2845_v47 }
 0xa68   : > { %3501 = vmatprep.subr.mxu1 %v3581_v1 }
 0xb18   : > { %v2203_v51 = vpop.f32.mrf.mxu1 }
 0xb19   : > { %2208 = vst.msk [vmem:[#allocation2] sm:$0xf] %vm2207_vm12, %v2203_v51  ;;  %v3230_v51 = vld [vmem:[%s4106_s19] ss:$0 sm:$0xff] }
 0xb1a   : > { %v3455_v54 = vpop.f32.mrf.mxu1 }
 0xb1c   : > { %v2372_v56 = vpop.f32.mrf.mxu1 }
 0xb1d   : > { %2377 = vrot.lane.b32.xlu1 %v2372_v56, %s3594_s5  ;;  %v3597_v56 = vmov 0.25  }
 0xb1e   : > { %v3465_v58 = vpop.f32.mrf.mxu1 }
 0xb20   : > { %v2545_v59 = vpop.f32.mrf.mxu1 }
 0xb21   : > { %2550 = vrot.lane.b32.xlu0 %v2545_v59, %s3595_s23 }
 0xb22   : > { %v3475_v60 = vpop.f32.mrf.mxu1 }
 0xb24   : > { %v2718_v61 = vpop.f32.mrf.mxu1 }
 0xb25   : > { %2723 = vrot.lane.b32.xlu1 %v2718_v61, %s3596_s1  ;;  %s652_s1 = scalar_lea.vmem %s4108_s21, %s4124_s25 }
 0xb26   : > { %v3485_v62 = vpop.f32.mrf.mxu1 }
 0xb8f   : > { %v2378_v63 = vpop.permute.xlu1 %2377 }
 0xb90   : > { %2381 = vst.msk [vmem:[#allocation2] sm:$0xf] %vm2380_vm13, %v2378_v63 }
 0xb93   : > { %v2551_v0 = vpop.permute.xlu0 %2550 }
 0xb94   : > { %2554 = vst.msk [vmem:[#allocation2] sm:$0xf] %vm2553_vm14, %v2551_v0 }
 0xb97   : > { %v2724_v2 = vpop.permute.xlu1 %2723 }
 0xb98   : > { %2727 = vst.msk [vmem:[#allocation2] sm:$0xf] %vm2726_vm15, %v2724_v2 }
 0xb9f   : > { %v2728_v3 = vld [vmem:[#allocation2] sm:$0xf] }
 0xba0   : > { %3495 = vmatmul.mubr.msk.f32.vlgmr.msra.gmra.mxu0 %vm1288_vm8, %v2728_v3 }
 0xba1   : > { %3516 = vmatprep.mubr.msk.f32.mxu0 %vm3582_vm0, %v3581_v1  ;;  %3509 = vmatpush3.msra.mxu0 %v2931_v17 }
 0xba2   : > { %3510 = vmatprep.subr.mxu0 %v3581_v1 }
 0xba3   : > { %3511 = vmatpush3.msra.mxu0 %v2930_v27 }
 0xba4   : > { %3512 = vmatprep.subr.mxu0 %v3581_v1 }
 0xba5   : > { %3513 = vmatpush3.msra.mxu0 %v2929_v28 }
 0xba6   : > { %3514 = vmatprep.subr.mxu0 %v3581_v1 }
 0xba7   : > { %3515 = vmatpush3.msra.mxu0 %v2928_v29 }
 0xc60   : > { %v2809_v5 = vpop.f32.mrf.mxu0 }
 0xc61   : > { %v2810_v6 = vadd.f32 %v3222_v4, %v2809_v5 }
 0xc62   : > { %v3496_v7 = vpop.f32.mrf.mxu0 }
 0xc63   : > { %v2813_v8 = vadd.f32 %v2810_v6, %v1955_v48  ;;  %v2844_v48 = vld [vmem:[%s4102_s15 + $0x8] sm:$0xff] }
 0xc64   : > { %3502 = vmatpush3.msra.mxu1 %v2844_v48 }
 0xc65   : > { %v2816_v9 = vsel %vm1927_vm10, %v2813_v8, 0.0  ;;  %3503 = vmatprep.subr.mxu1 %v3581_v1 }
 0xc66   : > { %2817 = vadd.xlane.f32.xlu0 %v2816_v9  ;;  %3504 = vmatpush3.msra.mxu1 %v2843_v16 }
 0xc67   : > { %3519 = vmatprep.subr.mxu1 %v3581_v1 }
 0xcef   : > { %v2818_v10 = vpop.xlane.xlu0 %2817 }
 0xcf0   : > { %v2819_v11 = vmul.f32 0.03125, %v2818_v10 }
 0xcf2   : > { %v2820_v12 = vsub.f32 %v2813_v8, %v2819_v11 }
 0xcf4   : > { %v2821_v13 = vmul.f32 %v2820_v12, %v2820_v12 }
 0xcf6   : > { %v2822_v14 = vsel %vm1927_vm10, %v2821_v13, 0.0 }
 0xcf7   : > { %2823 = vadd.xlane.f32.xlu1 %v2822_v14 }
 0xd80   : > { %v2824_v18 = vpop.xlane.xlu1 %2823 }
 0xd81   : > { %v2825_v19 = vmul.f32 0.03125, %v2824_v18 }
 0xd83   : > { %v2826_v20 = vadd.f32 1e-12, %v2825_v19 }
 0xd85   : > { %3569 = vrsqrt.f32 %v2826_v20 }
 0xd92   : > { %v3570_v21 = vpop.eup %3569 }
 0xd93   : > { %v2828_v23 = vmul.f32 %v3570_v21, %v2820_v12 }
 0xd95   : > { %v2835_v25 = vmul.f32 %v3224_v22, %v2828_v23 }
 0xd97   : > { %v2842_v26 = vadd.f32 %v3225_v24, %v2835_v25 }
 0xd99   : > { %3506 = vmatmul.mubr.msk.f32.vlgmr.msra.gmra.mxu1 %vm1288_vm8, %v2842_v26 }
 0xd9a   : > { %3521 = vmatprep.mubr.msk.f32.mxu1 %vm3582_vm0, %v3581_v1  ;;  %vm3118_vm0 = vcmask 253952  }
 0xe59   : > { %v2923_v31 = vpop.f32.mrf.mxu1 }
 0xe5a   : > { %v2924_v32 = vadd.f32 %v3226_v30, %v2923_v31 }
 0xe5b   : > { %v3507_v33 = vpop.f32.mrf.mxu1 }
 0xe5c   : > { %v2927_v34 = vmax.f32 %v2924_v32, 0.0 }
 0xe5e   : > { %3517 = vmatmul.mubr.msk.f32.vlgmr.msra.gmra.mxu0 %vm1288_vm8, %v2927_v34 }
 0xf1e   : > { %v3008_v36 = vpop.f32.mrf.mxu0 }
 0xf1f   : > { %v3009_v37 = vadd.f32 %v3228_v35, %v3008_v36 }
 0xf20   : > { %v3518_v38 = vpop.f32.mrf.mxu0 }
 0xf21   : > { %v3012_v39 = vadd.f32 %v3009_v37, %v2842_v26 }
 0xf23   : > { %v3015_v1 = vsel %vm1927_vm10, %v3012_v39, 0.0 }
 0xf24   : > { %3016 = vadd.xlane.f32.xlu0 %v3015_v1 }
 0xfad   : > { %v3017_v40 = vpop.xlane.xlu0 %3016 }
 0xfae   : > { %v3018_v41 = vmul.f32 0.03125, %v3017_v40 }
 0xfb0   : > { %v3019_v42 = vsub.f32 %v3012_v39, %v3018_v41 }
 0xfb2   : > { %v3020_v43 = vmul.f32 %v3019_v42, %v3019_v42 }
 0xfb4   : > { %v3021_v44 = vsel %vm1927_vm10, %v3020_v43, 0.0 }
 0xfb5   : > { %3022 = vadd.xlane.f32.xlu0 %v3021_v44 }
0x103e   : > { %v3023_v45 = vpop.xlane.xlu0 %3022 }
0x103f   : > { %v3024_v46 = vmul.f32 0.03125, %v3023_v45 }
0x1041   : > { %v3025_v49 = vadd.f32 1e-12, %v3024_v46 }
0x1043   : > { %3571 = vrsqrt.f32 %v3025_v49 }
0x1050   : > { %v3572_v50 = vpop.eup %3571 }
0x1051   : > { %v3027_v52 = vmul.f32 %v3572_v50, %v3019_v42 }
0x1053   : > { %v3034_v54 = vmul.f32 %v3230_v51, %v3027_v52 }
0x1055   : > { %v3041_v55 = vadd.f32 %v3231_v53, %v3034_v54 }
0x1057   : > { %3520 = vmatpush3.msk.msra.mxu1 %vm825_vm4, %v3041_v55 }
0x1058   : > { %3522 = vmatmul.mubr.msk.f32.vlgmr.msra.gmra.mxu1 %vm821_vm5, %v3597_v56 }
0x1118   : > { %v3114_v57 = vpop.f32.mrf.mxu1 }
0x1119   : > { %3119 = vst.msk [vmem:[%s652_s1] sm:$0x1] %vm3118_vm0, %v3114_v57 }
0x111a   : > { %v3523_v58 = vpop.f32.mrf.mxu1 }
0x111b PF: > { %s31_s2 = sadd.s32 1, %s3579_s2  }
0x111c   : > { %p28_p4 = scmp.ge.s32.totalorder %s31_s2, 10  }
0x111e   :  { %30 = sbr.rel (!%p28_p4) target bundleno = 7 (0x7), region = 134 }

// kernel: cl_model.3
= control target key start
LH: loop header
LB: loop body
LE: loop exit
PB: predicated region body
PF: predicated region fallthrough
CT: control target
= control target key end

     0   :  { %v3095_v0 = vmov 0.0   ;;  %s3096_s3 = smov 7   ;;  %vm3097_vm0 = vmmov 0   ;;  %vm144_vm1 = vcmask 261120   ;;  %s3098_s10 = smov 8   ;;  %vm221_vm2 = vcmask 64512   ;;  %s3538_s0 = inlined_call_operand.smem [shape: u32[32], index: -1, kind: input, shape index: {}] }
   0x1   :  { %2786 = vmatprep.subr.mxu0 %v3095_v0  ;;  %s2594_s6 = sld [smem:[%s3538_s0 + %s3096_s3]]   ;;  %2794 = vmatprep.mubr.msk.f32.mxu0 %vm3097_vm0, %v3095_v0  ;;  %s3099_s14 = smov 120   ;;  %vm557_vm4 = vcmask 130112   ;;  %vm730_vm5 = vcmask 195712   ;;  %vm903_vm6 = vcmask 261312   ;;  %vm1399_vm7 = vcmask 130048  }
   0x2   :  { %2797 = vmatprep.subr.mxu1 %v3095_v0  ;;  %2799 = vmatprep.mubr.msk.f32.mxu1 %vm3097_vm0, %v3095_v0  ;;  %s1_s9 = sld [smem:[%s3538_s0]]   ;;  %s3100_s15 = smov 96   ;;  %vm1473_vm8 = vcmask 23552   ;;  %vm2071_vm9 = vcmask 15360   ;;  %vm2364_vm10 = vcmask 15368   ;;  %vm2579_vm11 = vcmask 48128  }
   0x3   :  { %s2595_s13 = sld [smem:[%s3538_s0 + %s3098_s10]]   ;;  %s3101_s16 = smov 80   ;;  %vm2581_vm12 = vcmask 56320  }
   0x4   :  { %s3102_s17 = smov 88   ;;  %s3103_s18 = smov 72  }
   0x5   :  { %s3104_s19 = smov 112   ;;  %s3105_s20 = smov 104  }
   0x6   :  { %s3106_s21 = smov 3   ;;  %s3107_s25 = smov 56  }
   0x7   :  { %v136_v1 = vld [vmem:[%s2594_s6 + $0x18] sm:$0xff]  ;;  %v135_v2 = vld [vmem:[%s2594_s6 + $0x10] sm:$0xff]  ;;  %v134_v3 = vld [vmem:[%s2594_s6 + $0x8] sm:$0xff]  ;;  %s2590_s24 = sld [smem:[%s3538_s0 + %s3106_s21]]   ;;  %s3108_s26 = smov 64  }
   0x8   :  { %2787 = vmatpush3.msra.mxu0 %v136_v1  ;;  %v133_v4 = vld [vmem:[%s2594_s6] sm:$0xff]  ;;  %s3109_s27 = smov 48   ;;  %s3110_s28 = smov 40  }
   0x9   :  { %2788 = vmatprep.subr.mxu0 %v3095_v0  ;;  %v3159_v5 = vld [vmem:[%s1_s9] sm:$0xff]  ;;  %s3111_s29 = smov 9   ;;  %s3112_s3 = smov 16  }
   0xa   :  { %2789 = vmatpush3.msra.mxu0 %v135_v2  ;;  %v2619_v6 = vld [vmem:[%s2595_s13] ss:$0 sm:$0xff]  ;;  %s2596_s2 = sld [smem:[%s3538_s0 + %s3111_s29]]   ;;  %s3113_s4 = smov 24  }
   0xb   :  { %2790 = vmatprep.subr.mxu0 %v3095_v0  ;;  %s3114_s5 = smov 10   ;;  %s3115_s9 = smov 13  }
   0xc   :  { %2791 = vmatpush3.msra.mxu0 %v134_v3  ;;  %s2597_s8 = sld [smem:[%s3538_s0 + %s3114_s5]]   ;;  %s3116_s13 = smov 15  }
   0xd   :  { %2792 = vmatprep.subr.mxu0 %v3095_v0  ;;  %v131_v17 = vld [vmem:[%s2590_s24] sm:$0xff]  ;;  %s2600_s12 = sld [smem:[%s3538_s0 + %s3115_s9]]   ;;  %s3118_s22 = smov 12  }
   0xe   :  { %2793 = vmatpush3.msra.mxu0 %v133_v4  ;;  %vm132_vm3 = vcmp.gt.f32.partialorder %v131_v17, 0.5  ;;  %s3120_s5 = smov 19   ;;  %s3131_s23 = smov 1  }
   0xf   :  { %2795 = vmatmul.mubr.msk.f32.vlgmr.msra.gmra.mxu0 %vm144_vm1, %v3159_v5  ;;  %2807 = vmatprep.subr.mxu0 %v3095_v0  ;;  %s3133_s1 = smov 29   ;;  %s3134_s7 = smov 28  }
  0x10   :  { %2809 = vmatprep.mubr.msk.f32.mxu0 %vm3097_vm0, %v3095_v0  ;;  %v908_v17 = vld [vmem:[%s2596_s2 + $0x10] sm:$0xff]  ;;  %s2616_s6 = sld [smem:[%s3538_s0 + %s3133_s1]]  }
  0xcf   :  { %v214_v7 = vpop.f32.mrf.mxu0 }
  0xd0   :  { %v3171_v8 = vadd.f32 %v2619_v6, %v214_v7 }
  0xd1   :  { %v2796_v9 = vpop.f32.mrf.mxu0 }
  0xd2   :  { %386 = vrot.lane.b32.xlu1 %v3171_v8, %s3099_s14  ;;  %219 = vrot.lane.b32.xlu0 %v3171_v8, %s3100_s15 }
  0xd6   :  { %561 = vrot.lane.b32.xlu1 %v3171_v8, %s3101_s16  ;;  %388 = vrot.lane.b32.xlu0 %v3171_v8, %s3102_s17  ;;  %s2602_s16 = sld [smem:[%s3538_s0 + %s3116_s13]]   ;;  %s3117_s17 = smov 11  }
  0xda   :  { %734 = vrot.lane.b32.xlu1 %v3171_v8, %s3103_s18  ;;  %559 = vrot.lane.b32.xlu0 %v3171_v8, %s3104_s19  ;;  %s2611_s18 = sld [smem:[%s3538_s0 + %s3113_s4]]  }
  0xde   :  { %732 = vrot.lane.b32.xlu0 %v3171_v8, %s3105_s20  ;;  %s2598_s20 = sld [smem:[%s3538_s0 + %s3117_s17]]  }
 0x144   :  { %v387_v10 = vpop.permute.xlu1 %386  ;;  %v220_v11 = vpop.permute.xlu0 %219 }
 0x145   :  { %2798 = vmatpush3.xpose.msk.msra.mxu1 %vm221_vm2, %v220_v11 }
 0x146   :  { %2802 = vmatprep.subr.mxu1 %v3095_v0 }
 0x148   :  { %2800 = vmatmul.mubr.msk.f32.vlgmr.msra.gmra.mxu1 %vm221_vm2, %v3171_v8  ;;  %v389_v12 = vpop.permute.xlu0 %388  ;;  %v562_v13 = vpop.permute.xlu1 %561 }
 0x149   :  { %2808 = vmatpush3.xpose.msk.msra.mxu0 %vm221_vm2, %v389_v12  ;;  %2804 = vmatprep.mubr.msk.f32.mxu1 %vm3097_vm0, %v3095_v0 }
 0x14a   :  { %2817 = vmatprep.subr.mxu0 %v3095_v0 }
 0x14c   :  { %2810 = vmatmul.mubr.msk.f32.vlgmr.msra.gmra.mxu0 %vm221_vm2, %v387_v10  ;;  %v560_v14 = vpop.permute.xlu0 %559  ;;  %v735_v15 = vpop.permute.xlu1 %734 }
 0x14d   :  { %2818 = vmatpush3.xpose.msk.msra.mxu0 %vm221_vm2, %v562_v13  ;;  %2819 = vmatprep.mubr.msk.f32.mxu0 %vm3097_vm0, %v3095_v0 }
 0x14e   :  { %2827 = vmatprep.subr.mxu0 %v3095_v0 }
 0x150   :  { %2820 = vmatmul.mubr.msk.f32.vlgmr.msra.gmra.mxu0 %vm221_vm2, %v560_v14  ;;  %v733_v16 = vpop.permute.xlu0 %732 }
 0x151   :  { %2828 = vmatpush3.xpose.msk.msra.mxu0 %vm221_vm2, %v735_v15  ;;  %2829 = vmatprep.mubr.msk.f32.mxu0 %vm3097_vm0, %v3095_v0 }
 0x152   :  { %2837 = vmatprep.subr.mxu0 %v3095_v0 }
 0x154   :  { %2830 = vmatmul.mubr.msk.f32.vlgmr.msra.gmra.mxu0 %vm221_vm2, %v733_v16  ;;  %v909_v16 = vld [vmem:[%s2596_s2 + $0x18] sm:$0xff] }
 0x155   :  { %2845 = vmatprep.mubr.msk.f32.mxu0 %vm3097_vm0, %v3095_v0  ;;  %2838 = vmatpush3.msra.mxu0 %v909_v16 }
 0x156   :  { %2839 = vmatprep.subr.mxu0 %v3095_v0 }
 0x157   :  { %2840 = vmatpush3.msra.mxu0 %v908_v17 }
 0x158   :  { %2841 = vmatprep.subr.mxu0 %v3095_v0 }
 0x208   :  { %v292_v18 = vpop.f32.mrf.mxu1 }
 0x209   :  { %v296_v19 = vmul.f32 0.35355338, %v292_v18  ;;  %v907_v18 = vld [vmem:[%s2596_s2 + $0x8] sm:$0xff] }
 0x20a   :  { %v2801_v20 = vpop.f32.mrf.mxu1  ;;  %2842 = vmatpush3.msra.mxu0 %v907_v18 }
 0x20b   :  { %v297_v21 = vsel %vm132_vm3, %v296_v19, -1e+30  ;;  %v906_v19 = vld [vmem:[%s2596_s2] sm:$0xff]  ;;  %2843 = vmatprep.subr.mxu0 %v3095_v0  ;;  %s2603_s2 = sld [smem:[%s3538_s0 + %s3112_s3]]  }
 0x20c   :  { %v460_v22 = vpop.f32.mrf.mxu0  ;;  %v298_v23 = vsel %vm221_vm2, %v297_v21, -inf  ;;  %2844 = vmatpush3.msra.mxu0 %v906_v19 }
 0x20d   :  { %v464_v24 = vmul.f32 0.35355338, %v460_v22  ;;  %299 = vmax.xlane.f32.xlu1 %v298_v23  ;;  %2859 = vmatprep.subr.mxu0 %v3095_v0 }
 0x20e   :  { %v2811_v25 = vpop.f32.mrf.mxu0 }
 0x20f   :  { %v465_v26 = vsel %vm132_vm3, %v464_v24, -1e+30 }
 0x210   :  { %v633_v27 = vpop.f32.mrf.mxu0  ;;  %v466_v28 = vsel %vm221_vm2, %v465_v26, -inf }
 0x211   :  { %v637_v29 = vmul.f32 0.35355338, %v633_v27  ;;  %467 = vmax.xlane.f32.xlu0 %v466_v28  ;;  %v2633_v28 = vld [vmem:[%s2597_s8] ss:$0 sm:$0xff]  ;;  %s3121_s8 = smov 21  }
 0x212   :  { %v2821_v30 = vpop.f32.mrf.mxu0  ;;  %s2608_s11 = sld [smem:[%s3538_s0 + %s3121_s8]]   ;;  %s3128_s8 = smov 5  }
 0x213   :  { %v638_v31 = vsel %vm132_vm3, %v637_v29, -1e+30 }
 0x214   :  { %v806_v32 = vpop.f32.mrf.mxu0  ;;  %v639_v33 = vsel %vm221_vm2, %v638_v31, -inf }
 0x215   :  { %v810_v34 = vmul.f32 0.35355338, %v806_v32  ;;  %640 = vmax.xlane.f32.xlu0 %v639_v33 }
 0x216   :  { %v2831_v35 = vpop.f32.mrf.mxu0 }
 0x217   :  { %v811_v36 = vsel %vm132_vm3, %v810_v34, -1e+30 }
 0x218   :  { %v812_v37 = vsel %vm221_vm2, %v811_v36, -inf }
 0x219   :  { %813 = vmax.xlane.f32.xlu1 %v812_v37 }
 0x22a   :  { %477 = vrot.lane.b32.xlu1 %v3171_v8, %s3107_s25  ;;  %s2599_s25 = sld [smem:[%s3538_s0 + %s3118_s22]]  }
 0x296   :  { %v300_v38 = vpop.xlane.xlu1 %299 }
 0x297   :  { %v301_v39 = vsub.f32 %v297_v21, %v300_v38 }
 0x299   :  { %v302_v40 = vmul.f32 1.442695, %v301_v39  ;;  %v1024_v39 = vld [vmem:[%s2600_s12 + $0x18] sm:$0xff] }
 0x29a   :  { %v468_v41 = vpop.xlane.xlu0 %467 }
 0x29b   :  { %3043 = vpow2.f32 %v302_v40  ;;  %v469_v42 = vsub.f32 %v465_v26, %v468_v41  ;;  %v1023_v40 = vld [vmem:[%s2600_s12 + $0x10] sm:$0xff]  ;;  %v1021_v41 = vld [vmem:[%s2600_s12] sm:$0xff] }
 0x29d   :  { %v470_v43 = vmul.f32 1.442695, %v469_v42  ;;  %v1109_v42 = vld [vmem:[%s2602_s16 + $0x18] sm:$0xff] }
 0x29e   :  { %v641_v53 = vpop.xlane.xlu0 %640 }
 0x29f   :  { %3045 = vpow2.f32 %v470_v43  ;;  %v642_v54 = vsub.f32 %v638_v31, %v641_v53  ;;  %v1107_v53 = vld [vmem:[%s2602_s16 + $0x8] sm:$0xff] }
 0x2a1   :  { %v643_v55 = vmul.f32 1.442695, %v642_v54  ;;  %v1106_v54 = vld [vmem:[%s2602_s16] sm:$0xff] }
 0x2a2   :  { %v814_v44 = vpop.xlane.xlu1 %813 }
 0x2a3   :  { %v815_v45 = vsub.f32 %v811_v36, %v814_v44 }
 0x2a5   :  { %v816_v46 = vmul.f32 1.442695, %v815_v45 }
 0x2a6   :  { %v478_v58 = vpop.permute.xlu1 %477 }
 0x2a7   :  { %3047 = vpow2.f32 %v816_v46 }
 0x2a8   :  { %v3044_v47 = vpop.eup %3043  ;;  %3049 = vpow2.f32 %v643_v55 }
 0x2a9   :  { %v304_v48 = vsel %vm221_vm2, %v3044_v47, 0.0 }
 0x2aa   :  { %305 = vadd.xlane.f32.xlu0 %v304_v48 }
 0x2ac   :  { %v3046_v49 = vpop.eup %3045 }
 0x2ad   :  { %v472_v50 = vsel %vm221_vm2, %v3046_v49, 0.0 }
 0x2ae   :  { %473 = vadd.xlane.f32.xlu1 %v472_v50 }
 0x2b4   :  { %v3048_v51 = vpop.eup %3047 }
 0x2b5   :  { %v818_v52 = vsel %vm221_vm2, %v3048_v51, 0.0  ;;  %v3050_v56 = vpop.eup %3049 }
 0x2b6   :  { %819 = vadd.xlane.f32.xlu1 %v818_v52  ;;  %v645_v57 = vsel %vm221_vm2, %v3050_v56, 0.0  ;;  %v1108_v52 = vld [vmem:[%s2602_s16 + $0x10] sm:$0xff]  ;;  %s3123_s16 = smov 18  }
 0x2b7   :  { %s2605_s19 = sld [smem:[%s3538_s0 + %s3123_s16]]  }
 0x2c0   :  { %309 = vrot.lane.b32.xlu0 %v3171_v8, %s3108_s26  ;;  %s3119_s26 = smov 14  }
 0x2c1   :  { %s2601_s29 = sld [smem:[%s3538_s0 + %s3119_s26]]  }
 0x2c2   :  { %s2588_s26 = sld [smem:[%s3538_s0 + %s3131_s23]]  }
 0x2c7   :  { %650 = vrot.lane.b32.xlu1 %v3171_v8, %s3109_s27  ;;  %v2637_v55 = vld [vmem:[%s2601_s29] ss:$0 sm:$0xff]  ;;  %s3126_s29 = smov 23   ;;  %s3132_s27 = smov 26  }
 0x2c8   :  { %s2613_s30 = sld [smem:[%s3538_s0 + %s3132_s27]]  }
 0x2df   :  { %646 = vadd.xlane.f32.xlu0 %v645_v57 }
 0x2f5   :  { %823 = vrot.lane.b32.xlu0 %v3171_v8, %s3110_s28 }
 0x333   :  { %v306_v59 = vpop.xlane.xlu0 %305 }
 0x334   :  { %3051 = vrcp.f32 %v306_v59 }
 0x337   :  { %v310_v60 = vpop.permute.xlu0 %309  ;;  %v474_v61 = vpop.xlane.xlu1 %473 }
 0x338   :  { %3053 = vrcp.f32 %v474_v61  ;;  %2803 = vmatpush3.msra.mxu1 %v310_v60  ;;  %v2639_v60 = vld [vmem:[%s2603_s2] ss:$0 sm:$0xff]  ;;  %s2610_s2 = sld [smem:[%s3538_s0 + %s3126_s29]]  }
 0x339   :  { %2812 = vmatprep.subr.mxu1 %v3095_v0 }
 0x33f   :  { %v820_v63 = vpop.xlane.xlu1 %819 }
 0x341   :  { %v3052_v62 = vpop.eup %3051 }
 0x342   :  { %v308_v1 = vmul.f32 %v3052_v62, %v3044_v47  ;;  %v2635_v47 = vld [vmem:[%s2598_s20] ss:$0 sm:$0xff]  ;;  %s3124_s20 = smov 20  }
 0x343   :  { %v651_v4 = vpop.permute.xlu1 %650  ;;  %s2607_s24 = sld [smem:[%s3538_s0 + %s3124_s20]]  }
 0x344   :  { %2805 = vmatmul.mubr.msk.f32.vlgmr.msra.gmra.mxu1 %vm221_vm2, %v308_v1 }
 0x345   :  { %v3054_v2 = vpop.eup %3053  ;;  %2813 = vmatpush3.msra.mxu1 %v478_v58  ;;  %2814 = vmatprep.mubr.msk.f32.mxu1 %vm3097_vm0, %v3095_v0 }
 0x346   :  { %2822 = vmatprep.subr.mxu1 %v3095_v0  ;;  %v476_v3 = vmul.f32 %v3054_v2, %v3046_v49  ;;  %v2636_v49 = vld [vmem:[%s2599_s25] ss:$0 sm:$0xff]  ;;  %s3125_s25 = smov 25  }
 0x347   :  { %s3324_s28 = sld [smem:[%s3538_s0 + %s3125_s25]]  }
 0x348   :  { %2815 = vmatmul.mubr.msk.f32.vlgmr.msra.gmra.mxu1 %vm221_vm2, %v476_v3 }
 0x349   :  { %2823 = vmatpush3.msra.mxu1 %v651_v4  ;;  %2824 = vmatprep.mubr.msk.f32.mxu1 %vm3097_vm0, %v3095_v0 }
 0x34a   :  { %2832 = vmatprep.subr.mxu1 %v3095_v0 }
 0x368   :  { %v647_v6 = vpop.xlane.xlu0 %646 }
 0x369   :  { %3055 = vrcp.f32 %v647_v6 }
 0x36a   :  { %3057 = vrcp.f32 %v820_v63 }
 0x36c   :  { %v824_v10 = vpop.permute.xlu0 %823 }
 0x376   :  { %v3056_v7 = vpop.eup %3055 }
 0x377   :  { %v649_v8 = vmul.f32 %v3056_v7, %v3050_v56  ;;  %v3058_v9 = vpop.eup %3057 }
 0x378   :  { %v822_v11 = vmul.f32 %v3058_v9, %v3048_v51 }
 0x379   :  { %2825 = vmatmul.mubr.msk.f32.vlgmr.msra.gmra.mxu1 %vm221_vm2, %v649_v8 }
 0x37a   :  { %2833 = vmatpush3.msra.mxu1 %v824_v10  ;;  %2834 = vmatprep.mubr.msk.f32.mxu1 %vm3097_vm0, %v3095_v0 }
 0x37b   :  { %2848 = vmatprep.subr.mxu1 %v3095_v0 }
 0x37d   :  { %2835 = vmatmul.mubr.msk.f32.vlgmr.msra.gmra.mxu1 %vm221_vm2, %v822_v11 }
 0x37e   :  { %2856 = vmatprep.mubr.msk.f32.mxu1 %vm3097_vm0, %v3095_v0  ;;  %2849 = vmatpush3.msra.mxu1 %v1024_v39 }
 0x37f   :  { %2850 = vmatprep.subr.mxu1 %v3095_v0 }
 0x380   :  { %2851 = vmatpush3.msra.mxu1 %v1023_v40 }
 0x381   :  { %2852 = vmatprep.subr.mxu1 %v3095_v0 }
 0x404   :  { %v381_v12 = vpop.f32.mrf.mxu1 }
 0x405   :  { %385 = vst.msk [vmem:[#allocation2] sm:$0xff] %vm221_vm2, %v381_v12 }
 0x406   :  { %v2806_v13 = vpop.f32.mrf.mxu1 }
 0x407   :  { %v1308_v13 = vld [vmem:[%s2608_s11 + $0x18] sm:$0xff] }
 0x408   :  { %v549_v14 = vpop.f32.mrf.mxu1 }
 0x409   :  { %554 = vrot.lane.b32.xlu1 %v549_v14, %s3098_s10  ;;  %v1307_v14 = vld [vmem:[%s2608_s11 + $0x10] sm:$0xff]  ;;  %s2615_s10 = sld [smem:[%s3538_s0 + %s3134_s7]]  }
 0x40a   :  { %v2816_v15 = vpop.f32.mrf.mxu1 }
 0x439   :  { %v722_v20 = vpop.f32.mrf.mxu1 }
 0x43a   :  { %727 = vrot.lane.b32.xlu0 %v722_v20, %s3112_s3  ;;  %s2606_s3 = sld [smem:[%s3538_s0 + %s3120_s5]]   ;;  %s3127_s5 = smov 22  }
 0x43b   :  { %v2826_v21 = vpop.f32.mrf.mxu1 }
 0x43c   :  { %v2642_v21 = vld [vmem:[%s2605_s19] ss:$0 sm:$0xff] }
 0x43d   :  { %v895_v22 = vpop.f32.mrf.mxu1 }
 0x43e   :  { %900 = vrot.lane.b32.xlu1 %v895_v22, %s3113_s4  ;;  %s3130_s4 = smov 27  }
 0x43f   :  { %v2836_v23 = vpop.f32.mrf.mxu1  ;;  %s2614_s22 = sld [smem:[%s3538_s0 + %s3130_s4]]   ;;  %s3138_s4 = smov 6  }
 0x440   :  { %v1223_v9 = vld [vmem:[%s2606_s3 + $0x18] sm:$0xff]  ;;  %v1222_v10 = vld [vmem:[%s2606_s3 + $0x10] sm:$0xff]  ;;  %v1221_v11 = vld [vmem:[%s2606_s3 + $0x8] sm:$0xff] }
 0x441   :  { %v1220_v12 = vld [vmem:[%s2606_s3] sm:$0xff]  ;;  %s2609_s3 = sld [smem:[%s3538_s0 + %s3127_s5]]  }
 0x47b   :  { %v555_v24 = vpop.permute.xlu1 %554 }
 0x47c   :  { %558 = vst.msk [vmem:[#allocation2] sm:$0xff] %vm557_vm4, %v555_v24  ;;  %v1306_v24 = vld [vmem:[%s2608_s11 + $0x8] sm:$0xff] }
 0x4ac   :  { %v728_v25 = vpop.permute.xlu0 %727 }
 0x4ad   :  { %731 = vst.msk [vmem:[#allocation2] sm:$0xff] %vm730_vm5, %v728_v25  ;;  %v1305_v25 = vld [vmem:[%s2608_s11] sm:$0xff]  ;;  %s2592_s11 = sld [smem:[%s3538_s0 + %s3128_s8]]  }
 0x4b0   :  { %v901_v26 = vpop.permute.xlu1 %900 }
 0x4b1   :  { %904 = vst.msk [vmem:[#allocation2] sm:$0xff] %vm903_vm6, %v901_v26  ;;  %v2643_v26 = vld [vmem:[%s2607_s24] ss:$0 sm:$0xff] }
 0x4b8   :  { %v905_v27 = vld [vmem:[#allocation2] sm:$0xff] }
 0x4b9   :  { %2846 = vmatmul.mubr.msk.f32.vlgmr.msra.gmra.mxu0 %vm144_vm1, %v905_v27 }
 0x4ba   :  { %2867 = vmatprep.mubr.msk.f32.mxu0 %vm3097_vm0, %v3095_v0  ;;  %2860 = vmatpush3.msra.mxu0 %v1109_v42  ;;  %v1498_v42 = vld [vmem:[%s3324_s28 + $0x10] sm:$0xff] }
 0x4bb   :  { %2861 = vmatprep.subr.mxu0 %v3095_v0 }
 0x4bc   :  { %2862 = vmatpush3.msra.mxu0 %v1108_v52  ;;  %v2647_v52 = vld [vmem:[%s2611_s18] ss:$0 sm:$0xff] }
 0x4bd   :  { %2863 = vmatprep.subr.mxu0 %v3095_v0 }
 0x4be   :  { %2864 = vmatpush3.msra.mxu0 %v1107_v53 }
 0x4bf   :  { %2865 = vmatprep.subr.mxu0 %v3095_v0 }
 0x4c0   :  { %2866 = vmatpush3.msra.mxu0 %v1106_v54 }
 0x4c1   :  { %2881 = vmatprep.subr.mxu0 %v3095_v0 }
 0x579   :  { %v986_v29 = vpop.f32.mrf.mxu0 }
 0x57a   :  { %v987_v30 = vadd.f32 %v2633_v28, %v986_v29 }
 0x57b   :  { %v2847_v31 = vpop.f32.mrf.mxu0 }
 0x57c   :  { %v990_v32 = vadd.f32 %v987_v30, %v3159_v5  ;;  %v1022_v5 = vld [vmem:[%s2600_s12 + $0x8] sm:$0xff]  ;;  %s3122_s12 = smov 17   ;;  %v1503_v31 = vld [vmem:[%s3324_s28 + $0x38] sm:$0xff] }
 0x57d   :  { %2853 = vmatpush3.msra.mxu1 %v1022_v5  ;;  %s2604_s15 = sld [smem:[%s3538_s0 + %s3122_s12]]   ;;  %s3129_s12 = smov 4  }
 0x57e   :  { %v993_v33 = vsel %vm144_vm1, %v990_v32, 0.0  ;;  %2854 = vmatprep.subr.mxu1 %v3095_v0 }
 0x57f   :  { %994 = vadd.xlane.f32.xlu0 %v993_v33  ;;  %2855 = vmatpush3.msra.mxu1 %v1021_v41  ;;  %v1501_v33 = vld [vmem:[%s3324_s28 + $0x28] sm:$0xff]  ;;  %v1499_v41 = vld [vmem:[%s3324_s28 + $0x18] sm:$0xff] }
 0x580   :  { %2870 = vmatprep.subr.mxu1 %v3095_v0 }
 0x583   :  { %v2641_v19 = vld [vmem:[%s2604_s15] ss:$0 sm:$0xff]  ;;  %s2591_s15 = sld [smem:[%s3538_s0 + %s3129_s12]]  }
 0x608   :  { %v995_v34 = vpop.xlane.xlu0 %994 }
 0x609   :  { %v997_v35 = vmul.f32 0.03125, %v995_v34  ;;  %v1500_v34 = vld [vmem:[%s3324_s28 + $0x20] sm:$0xff] }
 0x60b   :  { %v998_v36 = vsub.f32 %v990_v32, %v997_v35  ;;  %v1502_v32 = vld [vmem:[%s3324_s28 + $0x30] sm:$0xff]  ;;  %v1391_v35 = vld [vmem:[%s2610_s2 + $0x8] sm:$0xff] }
 0x60d   :  { %v999_v37 = vmul.f32 %v998_v36, %v998_v36 }
 0x60f   :  { %v1000_v38 = vsel %vm144_vm1, %v999_v37, 0.0  ;;  %v2645_v37 = vld [vmem:[%s2609_s3] ss:$0 sm:$0xff] }
 0x610   :  { %1001 = vadd.xlane.f32.xlu1 %v1000_v38 }
 0x699   :  { %v1002_v43 = vpop.xlane.xlu1 %1001 }
 0x69a   :  { %v1003_v44 = vmul.f32 0.03125, %v1002_v43  ;;  %v1497_v43 = vld [vmem:[%s3324_s28 + $0x8] sm:$0xff] }
 0x69c   :  { %v1004_v45 = vadd.f32 1e-12, %v1003_v44 }
 0x69e   :  { %3059 = vrsqrt.f32 %v1004_v45  ;;  %v1496_v45 = vld [vmem:[%s3324_s28] sm:$0xff] }
 0x6ab   :  { %v3060_v46 = vpop.eup %3059 }
 0x6ac   :  { %v1006_v48 = vmul.f32 %v3060_v46, %v998_v36  ;;  %v1390_v36 = vld [vmem:[%s2610_s2] sm:$0xff] }
 0x6ae   :  { %v1013_v50 = vmul.f32 %v2635_v47, %v1006_v48  ;;  %v3365_v47 = vld [vmem:[%s2592_s11] sm:$0xff]  ;;  %v3369_v48 = vld [vmem:[%s2592_s11 + $0x8] sm:$0xff] }
 0x6b0   :  { %v1020_v51 = vadd.f32 %v2636_v49, %v1013_v50  ;;  %v3371_v49 = vld [vmem:[%s2591_s15] sm:$0xff]  ;;  %v3377_v50 = vld [vmem:[%s2592_s11 + $0x10] sm:$0xff] }
 0x6b2   :  { %2857 = vmatmul.mubr.msk.f32.vlgmr.msra.gmra.mxu1 %vm144_vm1, %v1020_v51 }
 0x6b3   :  { %2878 = vmatprep.mubr.msk.f32.mxu1 %vm3097_vm0, %v3095_v0  ;;  %2871 = vmatpush3.msra.mxu1 %v1223_v9  ;;  %v3407_v9 = vld [vmem:[%s2588_s26] sm:$0xff] }
 0x6b4   :  { %2872 = vmatprep.subr.mxu1 %v3095_v0 }
 0x6b5   :  { %2873 = vmatpush3.msra.mxu1 %v1222_v10 }
 0x6b6   :  { %2874 = vmatprep.subr.mxu1 %v3095_v0 }
 0x6b7   :  { %2875 = vmatpush3.msra.mxu1 %v1221_v11 }
 0x6b8   :  { %2876 = vmatprep.subr.mxu1 %v3095_v0 }
 0x6b9   :  { %2877 = vmatpush3.msra.mxu1 %v1220_v12 }
 0x6ba   :  { %2892 = vmatprep.subr.mxu1 %v3095_v0 }
 0x772   :  { %v1101_v56 = vpop.f32.mrf.mxu1 }
 0x773   :  { %v1102_v57 = vadd.f32 %v2637_v55, %v1101_v56 }
 0x774   :  { %v2858_v58 = vpop.f32.mrf.mxu1 }
 0x775   :  { %v1105_v59 = vmax.f32 %v1102_v57, 0.0  ;;  %v3390_v58 = vld [vmem:[%s2591_s15 + $0x8] sm:$0xff] }
 0x777   :  { %2868 = vmatmul.mubr.msk.f32.vlgmr.msra.gmra.mxu0 %vm144_vm1, %v1105_v59  ;;  %v1490_v59 = vld [vmem:[%s2591_s15 + $0x10] sm:$0xff] }
 0x778   :  { %2889 = vmatprep.mubr.msk.f32.mxu0 %vm3097_vm0, %v3095_v0  ;;  %2882 = vmatpush3.msra.mxu0 %v1308_v13 }
 0x779   :  { %2883 = vmatprep.subr.mxu0 %v3095_v0 }
 0x77a   :  { %2884 = vmatpush3.msra.mxu0 %v1307_v14  ;;  %v2659_v14 = vld [vmem:[%s2613_s30] ss:$0 sm:$0xff] }
 0x77b   :  { %2885 = vmatprep.subr.mxu0 %v3095_v0 }
 0x77c   :  { %2886 = vmatpush3.msra.mxu0 %v1306_v24 }
 0x77d   :  { %2887 = vmatprep.subr.mxu0 %v3095_v0 }
 0x77e   :  { %2888 = vmatpush3.msra.mxu0 %v1305_v25 }
 0x77f   :  { %2910 = vmatprep.subr.mxu0 %v3095_v0 }
 0x837   :  { %v1186_v61 = vpop.f32.mrf.mxu0 }
 0x838   :  { %v1187_v62 = vadd.f32 %v2639_v60, %v1186_v61  ;;  %v1491_v61 = vld [vmem:[%s2591_s15 + $0x18] sm:$0xff]  ;;  %s3137_s15 = smov 2  }
 0x839   :  { %v2869_v63 = vpop.f32.mrf.mxu0  ;;  %s2589_s18 = sld [smem:[%s3538_s0 + %s3137_s15]]  }
 0x83a   :  { %v1190_v1 = vadd.f32 %v1187_v62, %v1020_v51  ;;  %v3381_v51 = vld [vmem:[%s2592_s11 + $0x18] sm:$0xff]  ;;  %v1855_v63 = vld [vmem:[%s2614_s22 + $0x10] sm:$0xff]  ;;  %s3135_s11 = smov 30  }
 0x83b   :  { %v1856_v62 = vld [vmem:[%s2614_s22 + $0x18] sm:$0xff]  ;;  %s2617_s14 = sld [smem:[%s3538_s0 + %s3135_s11]]  }
 0x83c   :  { %v1193_v2 = vsel %vm144_vm1, %v1190_v1, 0.0 }
 0x83d   :  { %1194 = vadd.xlane.f32.xlu0 %v1193_v2  ;;  %v1853_v2 = vld [vmem:[%s2614_s22] sm:$0xff] }
 0x8c6   :  { %v1195_v3 = vpop.xlane.xlu0 %1194 }
 0x8c7   :  { %v1196_v4 = vmul.f32 0.03125, %v1195_v3 }
 0x8c9   :  { %v1197_v6 = vsub.f32 %v1190_v1, %v1196_v4  ;;  %v1854_v1 = vld [vmem:[%s2614_s22 + $0x8] sm:$0xff]  ;;  %s2593_s22 = sld [smem:[%s3538_s0 + %s3138_s4]]  }
 0x8cb   :  { %v1198_v7 = vmul.f32 %v1197_v6, %v1197_v6 }
 0x8cd   :  { %v1199_v8 = vsel %vm144_vm1, %v1198_v7, 0.0 }
 0x8ce   :  { %1200 = vadd.xlane.f32.xlu0 %v1199_v8 }
 0x957   :  { %v1201_v15 = vpop.xlane.xlu0 %1200 }
 0x958   :  { %v1202_v16 = vmul.f32 0.03125, %v1201_v15 }
 0x95a   :  { %v1203_v17 = vadd.f32 1e-12, %v1202_v16 }
 0x95c   :  { %3061 = vrsqrt.f32 %v1203_v17 }
 0x969   :  { %v3062_v18 = vpop.eup %3061 }
 0x96a   :  { %v1205_v20 = vmul.f32 %v3062_v18, %v1197_v6 }
 0x96c   :  { %v1212_v22 = vmul.f32 %v2641_v19, %v1205_v20 }
 0x96e   :  { %v3310_v23 = vadd.f32 %v2642_v21, %v1212_v22 }
 0x970   :  { %2879 = vmatmul.mubr.msk.f32.vlgmr.msra.gmra.mxu1 %vm144_vm1, %v3310_v23 }
 0x971   :  { %2896 = vmatprep.mubr.msk.f32.mxu1 %vm3097_vm0, %v3095_v0  ;;  %2893 = vmatpush3.msra.mxu1 %v1391_v35 }
 0x972   :  { %2894 = vmatprep.subr.mxu1 %v3095_v0 }
 0x973   :  { %2895 = vmatpush3.msra.mxu1 %v1390_v36  ;;  %v2660_v36 = vld [vmem:[%s2615_s10] ss:$0 sm:$0xff] }
 0x974   :  { %2899 = vmatprep.subr.mxu1 %v3095_v0 }
 0xa30   :  { %v1300_v27 = vpop.f32.mrf.mxu1 }
 0xa31   :  { %v1301_v28 = vadd.f32 %v2643_v26, %v1300_v27 }
 0xa32   :  { %v2880_v29 = vpop.f32.mrf.mxu1 }
 0xa33   :  { %v1304_v30 = vmax.f32 %v1301_v28, 0.0 }
 0xa35   :  { %2890 = vmatmul.mubr.msk.f32.vlgmr.msra.gmra.mxu0 %vm144_vm1, %v1304_v30 }
 0xa36   :  { %2911 = vmatpush3.msra.mxu0 %v1503_v31  ;;  %2918 = vmatprep.mubr.msk.f32.mxu0 %vm3097_vm0, %v3095_v0  ;;  %v1966_v31 = vld [vmem:[%s2616_s6 + $0x8] sm:$0xff] }
 0xa37   :  { %2912 = vmatprep.subr.mxu0 %v3095_v0 }
 0xa38   :  { %2913 = vmatpush3.msra.mxu0 %v1502_v32  ;;  %v1965_v32 = vld [vmem:[%s2616_s6] sm:$0xff] }
 0xa39   :  { %2914 = vmatprep.subr.mxu0 %v3095_v0 }
 0xa3a   :  { %2915 = vmatpush3.msra.mxu0 %v1501_v33 }
 0xa3b   :  { %2916 = vmatprep.subr.mxu0 %v3095_v0 }
 0xa3c   :  { %2917 = vmatpush3.msra.mxu0 %v1500_v34 }
 0xa3d   :  { %2919 = vmatmul.mubr.msk.f32.vlgmr.msra.gmra.mxu0 %vm144_vm1, %v3310_v23 }
 0xa3e   :  { %2931 = vmatprep.mubr.msk.f32.mxu0 %vm221_vm2, %v3371_v49 }
 0xaf5   :  { %v1385_v38 = vpop.f32.mrf.mxu0 }
 0xaf6   :  { %v1386_v39 = vadd.f32 %v2645_v37, %v1385_v38 }
 0xaf7   :  { %v2891_v40 = vpop.f32.mrf.mxu0 }
 0xaf8   :  { %v1389_v5 = vmax.f32 %v1386_v39, 0.0 }
 0xafa   :  { %2897 = vmatmul.mubr.msk.f32.vlgmr.msra.gmra.mxu1 %vm1399_vm7, %v1389_v5 }
 0xafb   :  { %2900 = vmatpush3.msra.mxu1 %v1499_v41  ;;  %2907 = vmatprep.mubr.msk.f32.mxu1 %vm3097_vm0, %v3095_v0 }
 0xafc   :  { %2901 = vmatprep.subr.mxu1 %v3095_v0 }
 0xafd   :  { %2902 = vmatpush3.msra.mxu1 %v1498_v42  ;;  %v1640_v44 = vpop.f32.mrf.mxu0 }
 0xafe   :  { %2903 = vmatprep.subr.mxu1 %v3095_v0 }
 0xaff   :  { %2904 = vmatpush3.msra.mxu1 %v1497_v43  ;;  %v2920_v46 = vpop.f32.mrf.mxu0 }
 0xb00   :  { %2905 = vmatprep.subr.mxu1 %v3095_v0 }
 0xb01   :  { %2906 = vmatpush3.msra.mxu1 %v1496_v45 }
 0xb02   :  { %2908 = vmatmul.mubr.msk.f32.vlgmr.msra.gmra.mxu1 %vm144_vm1, %v3310_v23  ;;  %2921 = vmatprep.subr.mxu1 %v1640_v44 }
 0xb03   :  { %2922 = vmatpush3.msra.mxu1 %v1640_v44  ;;  %2923 = vmatprep.mubr.msk.f32.mxu1 %vm221_vm2, %v3365_v47 }
 0xb04   :  { %2937 = vmatprep.subr.mxu1 %v1856_v62 }
 0xb06   :  { %2924 = vmatmul.mubr.msk.f32.vlgmr.msra.gmra.mxu1 %vm221_vm2, %v3369_v48 }
 0xb07   :  { %2926 = vmatprep.mubr.msk.f32.mxu1 %vm221_vm2, %v3377_v50  ;;  %2938 = vmatpush3.msra.mxu1 %v1856_v62 }
 0xb08   :  { %2939 = vmatprep.subr.mxu1 %v1855_v63 }
 0xb09   :  { %2940 = vmatpush3.msra.mxu1 %v1855_v63 }
 0xb0a   :  { %2927 = vmatmul.mubr.msk.f32.gmra.mxu1 %vm221_vm2, %v3381_v51  ;;  %2941 = vmatprep.subr.mxu1 %v1854_v1 }
 0xb0b   :  { %2942 = vmatpush3.msra.mxu1 %v1854_v1 }
 0xb0c   :  { %2943 = vmatprep.subr.mxu1 %v1853_v2 }
 0xb0d   :  { %2944 = vmatpush3.msra.mxu1 %v1853_v2 }
 0xb0e   :  { %2961 = vmatprep.subr.mxu1 %v3407_v9 }
 0xbba   :  { %v1469_v53 = vpop.f32.mrf.mxu1 }
 0xbbb   :  { %v1470_v54 = vadd.f32 %v2647_v52, %v1469_v53 }
 0xbbc   :  { %v2898_v55 = vpop.f32.mrf.mxu1 }
 0xbbd   :  { %v1474_v56 = vsel %vm1473_vm8, %v1470_v54, -inf }
 0xbbe   :  { %1475 = vmax.xlane.f32.xlu1 %v1474_v56 }
 0xbc2   :  { %v1570_v57 = vpop.f32.mrf.mxu1 }
 0xbc3   :  { %2929 = vmatprep.subr.mxu0 %v1570_v57 }
 0xbc4   :  { %v2909_v60 = vpop.f32.mrf.mxu1  ;;  %2930 = vmatpush3.msra.mxu0 %v1570_v57 }
 0xbc5   :  { %2932 = vmatmul.mubr.msk.f32.vlgmr.msra.gmra.mxu0 %vm221_vm2, %v3390_v58  ;;  %2951 = vmatprep.subr.mxu0 %v1966_v31 }
 0xbc6   :  { %2934 = vmatprep.mubr.msk.f32.mxu0 %vm221_vm2, %v1490_v59  ;;  %v2925_v10 = vpop.f32.mrf.mxu1  ;;  %2952 = vmatpush3.msra.mxu0 %v1966_v31 }
 0xbc7   :  { %2953 = vmatprep.subr.mxu0 %v1965_v32 }
 0xbc8   :  { %v1722_v11 = vpop.f32.mrf.mxu1  ;;  %2954 = vmatpush3.msra.mxu0 %v1965_v32 }
 0xbc9   :  { %2935 = vmatmul.mubr.msk.f32.gmra.mxu0 %vm221_vm2, %v1491_v61  ;;  %2969 = vmatprep.subr.mxu0 %v3407_v9 }
 0xbca   :  { %v2928_v16 = vpop.f32.mrf.mxu1 }
 0xbcc   :  { %v1732_v22 = vpop.f32.mrf.mxu1 }
 0xc47   :  { %v1476_v3 = vpop.xlane.xlu1 %1475 }
 0xc48   :  { %v3399_v4 = vsub.f32 %v1470_v54, %v1476_v3 }
 0xc4a   :  { %v1478_v6 = vmul.f32 1.442695, %v3399_v4 }
 0xc4c   :  { %3063 = vpow2.f32 %v1478_v6 }
 0xc59   :  { %v3064_v7 = vpop.eup %3063 }
 0xc5a   :  { %v1480_v8 = vsel %vm1473_vm8, %v3064_v7, 0.0 }
 0xc5b   :  { %1481 = vadd.xlane.f32.xlu0 %v1480_v8 }
 0xc85   :  { %v2933_v12 = vpop.f32.mrf.mxu0 }
 0xc86   :  { %v1825_v13 = vadd.f32 %v2933_v12, %v2925_v10 }
 0xc87   :  { %v1819_v15 = vpop.f32.mrf.mxu0 }
 0xc88   :  { %v1820_v17 = vadd.f32 %v1819_v15, %v1722_v11  ;;  %v1846_v18 = vadd.f32 %v2659_v14, %v1825_v13 }
 0xc89   :  { %v2936_v19 = vpop.f32.mrf.mxu0 }
 0xc8a   :  { %v1845_v20 = vadd.f32 %v2659_v14, %v1820_v17  ;;  %v1835_v21 = vadd.f32 %v2936_v19, %v2928_v16  ;;  %v1850_v26 = vmax.f32 %v1846_v18, 0.0 }
 0xc8b   :  { %v1829_v23 = vpop.f32.mrf.mxu0 }
 0xc8c   :  { %v1849_v24 = vmax.f32 %v1845_v20, 0.0  ;;  %v1830_v25 = vadd.f32 %v1829_v23, %v1732_v22  ;;  %v1848_v27 = vadd.f32 %v2659_v14, %v1835_v21  ;;  %v3136_v20 = vmov 1  }
 0xc8d   :  { %3041 = vset.pattern.permute.xlu1 %v3136_v20  ;;  %3042 = vset.pattern.permute.xlu0 %v3136_v20 }
 0xc8e   :  { %v1847_v28 = vadd.f32 %v2659_v14, %v1830_v25  ;;  %2945 = vmatprep.mubr.msk.f32.mxu1 %vm144_vm1, %v1849_v24  ;;  %v1852_v30 = vmax.f32 %v1848_v27, 0.0 }
 0xc8f   :  { %2946 = vmatmul.mubr.msk.f32.vlgmr.msra.gmra.mxu1 %vm144_vm1, %v1850_v26 }
 0xc90   :  { %v1851_v29 = vmax.f32 %v1847_v28, 0.0  ;;  %2962 = vmatpush3.msra.mxu1 %v3407_v9 }
 0xc92   :  { %2948 = vmatprep.mubr.msk.f32.mxu1 %vm144_vm1, %v1851_v29 }
 0xc93   :  { %2949 = vmatmul.mubr.msk.f32.gmra.mxu1 %vm144_vm1, %v1852_v30 }
 0xc94   :  { %2963 = vmatprep.mubr.msk.f32.mxu1 %vm221_vm2, %v3371_v49 }
 0xc97   :  { %2964 = vmatmul.mubr.msk.f32.vlgmr.msra.gmra.mxu1 %vm221_vm2, %v3390_v58 }
 0xc98   :  { %2966 = vmatprep.mubr.msk.f32.mxu1 %vm221_vm2, %v1490_v59 }
 0xc9b   :  { %2967 = vmatmul.mubr.msk.f32.gmra.mxu1 %vm221_vm2, %v1491_v61 }
 0xc9c   :  { %2979 = vmatprep.mubr.msk.f32.mxu1 %vm221_vm2, %v3365_v47 }
 0xce4   :  { %v3430_v33 = vpop.xlane.xlu0 %1481 }
 0xce5   :  { %3065 = vrcp.f32 %v3430_v33 }
 0xcf2   :  { %v3066_v34 = vpop.eup %3065 }
 0xcf3   :  { %v3433_v35 = vmul.f32 %v3066_v34, %v3064_v7 }
 0xcf5   :  { %2977 = vmatprep.subr.mxu1 %v3433_v35 }
 0xcf6   :  { %2978 = vmatpush3.msra.mxu1 %v3433_v35 }
 0xcf7   :  { %2980 = vmatmul.mubr.msk.f32.vlgmr.msra.gmra.mxu1 %vm221_vm2, %v3369_v48 }
 0xcf8   :  { %2982 = vmatprep.mubr.msk.f32.mxu1 %vm221_vm2, %v3377_v50 }
 0xcfb   :  { %2983 = vmatmul.mubr.msk.f32.gmra.mxu1 %vm221_vm2, %v3381_v51 }
 0xd4f   :  { %v2947_v37 = vpop.f32.mrf.mxu1 }
 0xd50   :  { %v1948_v38 = vadd.f32 %v2947_v37, %v2660_v36 }
 0xd51   :  { %v1942_v39 = vpop.f32.mrf.mxu1 }
 0xd52   :  { %v1943_v40 = vadd.f32 %v2660_v36, %v1942_v39  ;;  %v1962_v42 = vmax.f32 %v1948_v38, 0.0 }
 0xd53   :  { %v2950_v5 = vpop.f32.mrf.mxu1 }
 0xd54   :  { %v1961_v41 = vmax.f32 %v1943_v40, 0.0  ;;  %v1958_v43 = vadd.f32 %v2950_v5, %v2660_v36 }
 0xd55   :  { %v1952_v44 = vpop.f32.mrf.mxu1 }
 0xd56   :  { %v1953_v45 = vadd.f32 %v2660_v36, %v1952_v44  ;;  %2955 = vmatprep.mubr.msk.f32.mxu0 %vm1399_vm7, %v1961_v41  ;;  %v1964_v49 = vmax.f32 %v1958_v43, 0.0 }
 0xd57   :  { %2956 = vmatmul.mubr.msk.f32.vlgmr.msra.gmra.mxu0 %vm1399_vm7, %v1962_v42  ;;  %v2965_v34 = vpop.f32.mrf.mxu1 }
 0xd58   :  { %v1963_v46 = vmax.f32 %v1953_v45, 0.0  ;;  %2970 = vmatpush3.msra.mxu0 %v3407_v9 }
 0xd59   :  { %2985 = vmatprep.subr.mxu0 %v3095_v0  ;;  %v2208_v39 = vpop.f32.mrf.mxu1 }
 0xd5a   :  { %2958 = vmatprep.mubr.msk.f32.mxu0 %vm1399_vm7, %v1963_v46 }
 0xd5b   :  { %2959 = vmatmul.mubr.msk.f32.gmra.mxu0 %vm1399_vm7, %v1964_v49  ;;  %v2968_v5 = vpop.f32.mrf.mxu1 }
 0xd5c   :  { %2971 = vmatprep.mubr.msk.f32.mxu0 %vm221_vm2, %v3365_v47  ;;  %v2665_v47 = vld [vmem:[%s2617_s14] ss:$0 sm:$0xff] }
 0xd5d   :  { %v2218_v43 = vpop.f32.mrf.mxu1 }
 0xd5f   :  { %2972 = vmatmul.mubr.msk.f32.vlgmr.msra.gmra.mxu0 %vm221_vm2, %v3369_v48 }
 0xd60   :  { %2974 = vmatprep.mubr.msk.f32.mxu0 %vm221_vm2, %v3377_v50 }
 0xd63   :  { %2975 = vmatmul.mubr.msk.f32.gmra.mxu0 %vm221_vm2, %v3381_v51 }
 0xd64   :  { %2993 = vmatprep.mubr.msk.f32.mxu0 %vm3097_vm0, %v3095_v0 }
 0xe17   :  { %v2957_v52 = vpop.f32.mrf.mxu0 }
 0xe18   :  { %v2058_v56 = vadd.f32 %v2957_v52, %v2665_v47 }
 0xe19   :  { %v2052_v53 = vpop.f32.mrf.mxu0 }
 0xe1a   :  { %v2053_v51 = vadd.f32 %v2665_v47, %v2052_v53  ;;  %v2075_v59 = vsel %vm2071_vm9, %v2058_v56, -inf }
 0xe1b   :  { %v2960_v54 = vpop.f32.mrf.mxu0 }
 0xe1c   :  { %v2068_v55 = vadd.f32 %v2960_v54, %v2665_v47  ;;  %v2072_v60 = vsel %vm2071_vm9, %v2053_v51, -inf  ;;  %v2128_v54 = vld [vmem:[%s2589_s18] sm:$0xff] }
 0xe1d   :  { %v2062_v48 = vpop.f32.mrf.mxu0 }
 0xe1e   :  { %v2063_v50 = vadd.f32 %v2665_v47, %v2062_v48  ;;  %v2081_v57 = vsel %vm2071_vm9, %v2068_v55, -inf }
 0xe1f   :  { %2082 = vmax.xlane.f32.xlu1 %v2081_v57  ;;  %v2973_v36 = vpop.f32.mrf.mxu0 }
 0xe20   :  { %v2078_v58 = vsel %vm2071_vm9, %v2063_v50, -inf  ;;  %v2313_v37 = vmul.f32 %v2973_v36, %v2965_v34 }
 0xe21   :  { %2079 = vmax.xlane.f32.xlu0 %v2078_v58  ;;  %v2293_v40 = vpop.f32.mrf.mxu0 }
 0xe22   :  { %v2319_v38 = vsel %vm1473_vm8, %v2313_v37, -inf  ;;  %v2312_v42 = vmul.f32 %v2293_v40, %v2208_v39 }
 0xe23   :  { %2076 = vmax.xlane.f32.xlu1 %v2075_v59  ;;  %v2976_v41 = vpop.f32.mrf.mxu0 }
 0xe24   :  { %v2316_v49 = vsel %vm1473_vm8, %v2312_v42, -inf  ;;  %v2315_v52 = vmul.f32 %v2976_v41, %v2968_v5 }
 0xe25   :  { %2073 = vmax.xlane.f32.xlu0 %v2072_v60  ;;  %v2303_v44 = vpop.f32.mrf.mxu0 }
 0xe26   :  { %v2314_v46 = vmul.f32 %v2303_v44, %v2218_v43 }
 0xe28   :  { %v2322_v53 = vsel %vm1473_vm8, %v2314_v46, -inf }
 0xea8   :  { %v2083_v61 = vpop.xlane.xlu1 %2082 }
 0xea9   :  { %v3469_v62 = vsub.f32 %v2068_v55, %v2083_v61  ;;  %v2325_v55 = vsel %vm1473_vm8, %v2315_v52, -inf }
 0xeaa   :  { %v2080_v63 = vpop.xlane.xlu0 %2079 }
 0xeab   :  { %v2094_v1 = vmul.f32 1.442695, %v3469_v62  ;;  %v3472_v2 = vsub.f32 %v2063_v50, %v2080_v63  ;;  %v2981_v50 = vpop.f32.mrf.mxu1 }
 0xeac   :  { %v2077_v3 = vpop.xlane.xlu1 %2076 }
 0xead   :  { %3067 = vpow2.f32 %v2094_v1  ;;  %v2092_v6 = vmul.f32 1.442695, %v3472_v2  ;;  %v3475_v7 = vsub.f32 %v2058_v56, %v2077_v3  ;;  %v2448_v57 = vpop.f32.mrf.mxu1 }
 0xeae   :  { %v2074_v8 = vpop.xlane.xlu0 %2073 }
 0xeaf   :  { %3069 = vpow2.f32 %v2092_v6  ;;  %v2090_v9 = vmul.f32 1.442695, %v3475_v7  ;;  %v3478_v10 = vsub.f32 %v2053_v51, %v2074_v8  ;;  %v2984_v51 = vpop.f32.mrf.mxu1  ;;  %v2381_v8 = vld [vmem:[%s2593_s22] sm:$0xff] }
 0xeb1   :  { %3071 = vpow2.f32 %v2090_v9  ;;  %v2088_v11 = vmul.f32 1.442695, %v3478_v10  ;;  %v2458_v59 = vpop.f32.mrf.mxu1 }
 0xeb3   :  { %3073 = vpow2.f32 %v2088_v11 }
 0xeba   :  { %v3068_v12 = vpop.eup %3067 }
 0xebb   :  { %v2105_v13 = vsel %vm2071_vm9, %v3068_v12, 0.0 }
 0xebc   :  { %v3070_v14 = vpop.eup %3069  ;;  %2106 = vadd.xlane.f32.xlu1 %v2105_v13 }
 0xebd   :  { %v2102_v15 = vsel %vm2071_vm9, %v3070_v14, 0.0 }
 0xebe   :  { %v3072_v16 = vpop.eup %3071  ;;  %2103 = vadd.xlane.f32.xlu0 %v2102_v15 }
 0xebf   :  { %v2099_v17 = vsel %vm2071_vm9, %v3072_v16, 0.0 }
 0xec0   :  { %v3074_v18 = vpop.eup %3073  ;;  %2100 = vadd.xlane.f32.xlu1 %v2099_v17 }
 0xec1   :  { %v2096_v19 = vsel %vm2071_vm9, %v3074_v18, 0.0 }
 0xec2   :  { %2097 = vadd.xlane.f32.xlu0 %v2096_v19 }
 0xf45   :  { %v3485_v21 = vpop.xlane.xlu1 %2106 }
 0xf46   :  { %3075 = vrcp.f32 %v3485_v21 }
 0xf47   :  { %v3488_v22 = vpop.xlane.xlu0 %2103 }
 0xf48   :  { %3077 = vrcp.f32 %v3488_v22 }
 0xf49   :  { %v3491_v23 = vpop.xlane.xlu1 %2100 }
 0xf4a   :  { %3079 = vrcp.f32 %v3491_v23 }
 0xf4b   :  { %v3494_v24 = vpop.xlane.xlu0 %2097 }
 0xf4c   :  { %3081 = vrcp.f32 %v3494_v24 }
 0xf4d   :  { %3083 = vlog2.f32 %v3430_v33 }
 0xf4e   :  { %3085 = vlog2.f32 %v3491_v23 }
 0xf4f   :  { %3087 = vlog2.f32 %v3494_v24 }
 0xf50   :  { %3089 = vlog2.f32 %v3488_v22 }
 0xf51   :  { %3091 = vlog2.f32 %v3485_v21 }
 0xf53   :  { %v3076_v25 = vpop.eup %3075 }
 0xf54   :  { %v2115_v26 = vmul.f32 %v3076_v25, %v3068_v12 }
 0xf55   :  { %v3078_v27 = vpop.eup %3077 }
 0xf56   :  { %2484 = vperm.xlu1 %3041, %v2115_v26   ;;  %v2113_v28 = vmul.f32 %v3078_v27, %v3070_v14 }
 0xf57   :  { %v3080_v29 = vpop.eup %3079 }
 0xf58   :  { %2479 = vperm.xlu0 %3042, %v2113_v28   ;;  %v2111_v30 = vmul.f32 %v3080_v29, %v3072_v16 }
 0xf59   :  { %v3082_v31 = vpop.eup %3081 }
 0xf5a   :  { %2474 = vperm.xlu1 %3041, %v2111_v30   ;;  %v2109_v32 = vmul.f32 %v3082_v31, %v3074_v18  ;;  %v3084_v45 = vpop.eup %3083 }
 0xf5b   :  { %v1486_v33 = vmul.f32 0.6931472, %v3084_v45  ;;  %v3086_v9 = vpop.eup %3085 }
 0xf5c   :  { %v2119_v11 = vmul.f32 0.6931472, %v3086_v9 }
 0xf5d   :  { %v1487_v47 = vsub.f32 %v3399_v4, %v1486_v33 }
 0xf5e   :  { %2469 = vperm.xlu1 %3041, %v2109_v32   ;;  %v2125_v13 = vsub.f32 %v3475_v7, %v2119_v11 }
 0xf5f   :  { %v2129_v48 = vmul.f32 %v2128_v54, %v1487_v47 }
 0xf61   :  { %v2130_v56 = vsel %vm1473_vm8, %v2129_v48, 0.0 }
 0xf77   :  { %2320 = vmax.xlane.f32.xlu0 %v2319_v38 }
 0xf82   :  { %2317 = vmax.xlane.f32.xlu1 %v2316_v49 }
 0xf86   :  { %2323 = vmax.xlane.f32.xlu1 %v2322_v53 }
 0xf8a   :  { %2326 = vmax.xlane.f32.xlu1 %v2325_v55 }
 0xf8e   :  { %2131 = vadd.xlane.f32.xlu1 %v2130_v56 }
 0xfd1   :  { %v2485_v58 = vpop.permute.xlu1 %2484 }
 0xfd2   :  { %v2490_v60 = vmul.f32 %v2984_v51, %v2485_v58 }
 0xfd3   :  { %v2480_v4 = vpop.permute.xlu0 %2479 }
 0xfd4   :  { %v2489_v61 = vmul.f32 %v2480_v4, %v2458_v59  ;;  %2986 = vmatpush3.msra.mxu0 %v2490_v60 }
 0xfd5   :  { %2987 = vmatprep.subr.mxu0 %v3095_v0  ;;  %v2475_v63 = vpop.permute.xlu1 %2474 }
 0xfd6   :  { %v2488_v1 = vmul.f32 %v2981_v50, %v2475_v63  ;;  %2988 = vmatpush3.msra.mxu0 %v2489_v61 }
 0xfd7   :  { %2989 = vmatprep.subr.mxu0 %v3095_v0 }
 0xfd8   :  { %2990 = vmatpush3.msra.mxu0 %v2488_v1 }
 0xfd9   :  { %v2470_v3 = vpop.permute.xlu1 %2469  ;;  %2991 = vmatprep.subr.mxu0 %v3095_v0  ;;  %v3088_v0 = vpop.eup %3087 }
 0xfda   :  { %v2487_v6 = vmul.f32 %v2470_v3, %v2448_v57  ;;  %v2117_v16 = vmul.f32 0.6931472, %v3088_v0  ;;  %v3090_v17 = vpop.eup %3089 }
 0xfdb   :  { %v2121_v18 = vmul.f32 0.6931472, %v3090_v17  ;;  %v3092_v20 = vpop.eup %3091 }
 0xfdc   :  { %2992 = vmatpush3.msra.mxu0 %v2487_v6  ;;  %v2124_v19 = vsub.f32 %v3478_v10, %v2117_v16  ;;  %v2123_v25 = vmul.f32 0.6931472, %v3092_v20 }
 0xfdd   :  { %2994 = vmatmul.mubr.msk.f32.vlgmr.msra.gmra.mxu0 %vm144_vm1, %v2381_v8  ;;  %v2126_v21 = vsub.f32 %v3472_v2, %v2121_v18 }
 0xfde   :  { %v2127_v30 = vsub.f32 %v3469_v62, %v2123_v25 }
0x1000   :  { %v2321_v12 = vpop.xlane.xlu0 %2320 }
0x1001   :  { %v2333_v14 = vsub.f32 1.0, %v2321_v12  ;;  %v2329_v36 = vmul.f32 %v2321_v12, %v2125_v13 }
0x1003   :  { %v2337_v15 = vmul.f32 %v2333_v14, %v2125_v13 }
0x1005   :  { %2346 = vrot.lane.b32.xlu0 %v2337_v15, %s3131_s23 }
0x100b   :  { %v2318_v23 = vpop.xlane.xlu1 %2317 }
0x100c   :  { %v2328_v24 = vmul.f32 %v2318_v23, %v2124_v19  ;;  %v2332_v22 = vsub.f32 1.0, %v2318_v23 }
0x100e   :  { %v2336_v26 = vmul.f32 %v2332_v22, %v2124_v19 }
0x100f   :  { %v2324_v27 = vpop.xlane.xlu1 %2323 }
0x1010   :  { %v2330_v7 = vmul.f32 %v2324_v27, %v2126_v21  ;;  %v2334_v28 = vsub.f32 1.0, %v2324_v27  ;;  %2344 = vrot.lane.b32.xlu1 %v2336_v26, %s3131_s23 }
0x1012   :  { %v2338_v29 = vmul.f32 %v2334_v28, %v2126_v21 }
0x1013   :  { %v2327_v31 = vpop.xlane.xlu1 %2326 }
0x1014   :  { %v2331_v32 = vmul.f32 %v2327_v31, %v2127_v30  ;;  %2348 = vrot.lane.b32.xlu1 %v2338_v29, %s3131_s23  ;;  %v2335_v49 = vsub.f32 1.0, %v2327_v31 }
0x1016   :  { %v2339_v33 = vmul.f32 %v2335_v49, %v2127_v30 }
0x1017   :  { %v2132_v10 = vpop.xlane.xlu1 %2131 }
0x1018   :  { %v2133_v52 = vrot.slane %v2132_v10, 4 }
0x101a   :  { %v2134_v53 = vadd.f32 %v2133_v52, %v2132_v10 }
0x101c   :  { %v2135_v54 = vrot.slane %v2134_v53, 2 }
0x101e   :  { %v2136_v50 = vadd.f32 %v2135_v54, %v2134_v53 }
0x1020   :  { %v2137_v58 = vrot.slane %v2136_v50, 1 }
0x1022   :  { %v2138_v63 = vadd.f32 %v2137_v58, %v2136_v50 }
0x1024   :  { %v2139_v6 = vsub.f32 0.0, %v2138_v63 }
0x1026   :  { %v2140_v11 = vmul.f32 0.125, %v2139_v6 }
0x1077   :  { %v2347_v34 = vpop.permute.xlu0 %2346 }
0x1078   :  { %v2357_v37 = vadd.f32 %v2347_v34, %v2329_v36 }
0x107a   :  { %v2366_v2 = vsel %vm2364_vm10, %v2357_v37, 0.0 }
0x1082   :  { %v2345_v38 = vpop.permute.xlu1 %2344 }
0x1083   :  { %v2356_v39 = vadd.f32 %v2345_v38, %v2328_v24 }
0x1085   :  { %v2365_v40 = vsel %vm2364_vm10, %v2356_v39, 0.0 }
0x1086   :  { %v2367_v5 = vadd.f32 %v2366_v2, %v2365_v40  ;;  %v2349_v41 = vpop.permute.xlu1 %2348 }
0x1087   :  { %v2358_v42 = vadd.f32 %v2349_v41, %v2330_v7 }
0x1089   :  { %v2368_v62 = vsel %vm2364_vm10, %v2358_v42, 0.0 }
0x108a   :  { %v2369_v43 = vadd.f32 %v2368_v62, %v2367_v5 }
0x109d   :  { %v2560_v44 = vpop.f32.mrf.mxu0 }
0x109e   :  { %v2564_v45 = vsel %vm1473_vm8, %v2560_v44, 0.0 }
0x109f   :  { %2565 = vadd.xlane.f32.xlu1 %v2564_v45  ;;  %v2995_v46 = vpop.f32.mrf.mxu0 }
0x10b0   :  { %2350 = vrot.lane.b32.xlu1 %v2339_v33, %s3131_s23  ;;  %s3139_s23 = smov 31  }
0x10b1   :  { %s2618_s26 = sld [smem:[%s3538_s0 + %s3139_s23]]  }
0x1128   :  { %v2566_v47 = vpop.xlane.xlu1 %2565 }
0x1129   :  { %3093 = vrcp.f32 %v2566_v47 }
0x112c   :  { %v2351_v55 = vpop.permute.xlu1 %2350 }
0x112d   :  { %v2359_v48 = vadd.f32 %v2351_v55, %v2331_v32 }
0x112f   :  { %v2370_v56 = vsel %vm2364_vm10, %v2359_v48, 0.0 }
0x1130   :  { %v2371_v57 = vadd.f32 %v2370_v56, %v2369_v43 }
0x1132   :  { %v2372_v51 = vrot.slane %v2371_v57, 4 }
0x1134   :  { %v2373_v59 = vadd.f32 %v2372_v51, %v2371_v57 }
0x1136   :  { %v3094_v60 = vpop.eup %3093  ;;  %v2374_v4 = vrot.slane %v2373_v59, 2 }
0x1137   :  { %v2568_v61 = vmul.f32 %v3094_v60, %v2560_v44 }
0x1138   :  { %v2375_v1 = vadd.f32 %v2374_v4, %v2373_v59 }
0x1139   :  { %2571 = vrot.lane.b32.xlu0 %v2568_v61, %s3106_s21 }
0x113a   :  { %v2376_v3 = vrot.slane %v2375_v1, 1 }
0x113c   :  { %v2377_v8 = vadd.f32 %v2376_v3, %v2375_v1 }
0x113e   :  { %v2378_v9 = vsub.f32 0.0, %v2377_v8 }
0x1140   :  { %v2379_v12 = vmul.f32 0.03125, %v2378_v9 }
0x1142   :  { %v2380_v13 = vadd.f32 %v2379_v12, %v2140_v11 }
0x1144   :  { %2575 = vrot.lane.b32.xlu1 %v2380_v13, %s3128_s8 }
0x11ab   :  { %v2572_v14 = vpop.permute.xlu0 %2571 }
0x11ac   :  { %v2578_v0 = vsel %vm1473_vm8, %v3433_v35, %v2572_v14 }
0x11b6   :  { %v2576_v15 = vpop.permute.xlu1 %2575 }
0x11b7   :  { %v2580_v16 = vsel %vm2579_vm11, %v2578_v0, %v2576_v15 }
0x11b8   :  { %v2582_v17 = vsel %vm2581_vm12, %v2580_v16, 0.0 }
0x11b9   :  { %2583 = vst [vmem:[%s2618_s26] sm:$0xff] %v2582_v17 }

</bundles_post_ra>
